<compile_context>
chip_gen: v5e
topology: v5e:2x2
jax: 0.10.0
libtpu: 0.0.40
codegen_flags: <defaults>
</compile_context>

<pallas_src>
import functools

import jax
import jax.numpy as jnp
from jax.experimental import pallas as pl
from jax.experimental.pallas import tpu as pltpu

LANE = 128          # channel padding target (TPU lane width)
FC_HIDDEN = 512


def _conv_dims(H, W):
    oh1, ow1 = (H - 8) // 4 + 1, (W - 8) // 4 + 1
    oh2, ow2 = (oh1 - 4) // 2 + 1, (ow1 - 4) // 2 + 1
    oh3, ow3 = oh2 - 2, ow2 - 2
    return oh1, ow1, oh2, ow2, oh3, ow3


# ---------------------------------------------------------------------------
# Fused forward kernel: conv1 -> conv2 -> conv3 -> fc1 -> fc2 for tb images.
# All weights are VMEM-resident; intermediate activations never leave VMEM.
# ---------------------------------------------------------------------------
def _qnet_fused_kernel(x_ref, w1_ref, b1_ref, w2_ref, b2_ref, w3_ref, b3_ref,
                       wf1_ref, bf1_ref, wf2_ref, bf2_ref, o_ref):
    hs, ws, tb, ck = x_ref.shape            # space-to-depth(4) input block
    H2, W2 = (hs - 1) // 2, (ws - 1) // 2   # phase-packed conv1 spatial dims
    oh2, ow2 = H2 - 1, W2 - 1               # conv2 output spatial dims
    oh3, ow3 = oh2 - 2, ow2 - 2             # conv3 output spatial dims
    c1p = w1_ref.shape[-1]                  # 128 = 4 parities x 32 channels
    c2 = w2_ref.shape[-1]
    c3 = w3_ref.shape[-1]

    f32, bf16 = jnp.float32, jnp.bfloat16

    x = x_ref[...]                          # (hs, ws, tb, 128) bf16

    # Stride-2 sub-sampled windows xs[2Y+r, 2X+s] for (r, s) in {0,1,2}^2.
    # Only leading-dim slicing / reshaping (the stride is absorbed by a
    # leading-dim split), so no lane/sublane movement.
    def row_sub2(v, off):
        if off < 2:
            return v[0:2 * H2].reshape((H2, 2) + v.shape[1:])[:, off]
        return v[1:2 * H2 + 1].reshape((H2, 2) + v.shape[1:])[:, 1]

    def col_sub2(v, off):
        if off < 2:
            return v[:, 0:2 * W2].reshape(
                (v.shape[0], W2, 2) + v.shape[2:])[:, :, off]
        return v[:, 1:2 * W2 + 1].reshape(
            (v.shape[0], W2, 2) + v.shape[2:])[:, :, 1]

    win = {}
    for r in range(3):
        rows = row_sub2(x, r)                                   # (H2, ws, tb, ck)
        for s in range(3):
            win[(r, s)] = col_sub2(rows, s).reshape(H2 * W2 * tb, ck)

    # ---- conv1 (8x8 s4 == 2x2 s1 on the s2d input), phase-packed output ----
    # Packed w1 already places output parity (pi, pj) at lane block
    # 32*(2*pi+pj), so the whole parity-packed map is 9 full matmuls.
    acc = jnp.zeros((H2 * W2 * tb, c1p), f32)
    for r in range(3):
        for s in range(3):
            acc = acc + jnp.dot(win[(r, s)], w1_ref[r, s],
                                preferred_element_type=f32)
    p1 = jnp.maximum(acc + b1_ref[...], 0.0).astype(bf16)       # bf16 once
    p1 = p1.reshape(H2, W2, tb, c1p)

    # ---- conv2 (4x4 s2): 4 full-density K=128 matmuls over the phase-packed
    # buffer, one per spatial offset (ih, jw) in {0,1}^2 ----------------------
    acc = jnp.zeros((oh2 * ow2 * tb, c2), f32)
    for ih in range(2):
        for jw in range(2):
            wv = p1[ih:ih + oh2, jw:jw + ow2].reshape(oh2 * ow2 * tb, c1p)
            acc = acc + jnp.dot(wv, w2_ref[ih, jw], preferred_element_type=f32)
    a2 = jnp.maximum(acc + b2_ref[...], 0.0).astype(bf16)
    a2 = a2.reshape(oh2, ow2, tb, c2)

    # ---- conv3 (3x3 s1) ------------------------------------------------------
    acc = jnp.zeros((oh3 * ow3 * tb, c3), f32)
    for i in range(3):
        for j in range(3):
            wv = a2[i:i + oh3, j:j + ow3].reshape(oh3 * ow3 * tb, c2)
            acc = acc + jnp.dot(wv, w3_ref[i, j], preferred_element_type=f32)
    a3 = jnp.maximum(acc + b3_ref[...], 0.0).astype(bf16)       # (oh3*ow3*tb, c3)

    # ---- fc1: ONE matmul over the flattened feature map ---------------------
    if oh3 == 1 and ow3 == 1:
        feat = a3                                               # already (tb, c3)
    else:
        feat = jnp.transpose(a3.reshape(oh3, ow3, tb, c3), (2, 0, 1, 3))
        feat = feat.reshape(tb, oh3 * ow3 * c3)
    h = jnp.maximum(jnp.dot(feat, wf1_ref[...], preferred_element_type=f32)
                    + bf1_ref[...], 0.0)

    # ---- fc2: num_actions padded to 128 lanes -> lane-dense store -----------
    o_ref[...] = (jnp.dot(h.astype(bf16), wf2_ref[...],
                          preferred_element_type=f32) + bf2_ref[...])


# ---------------------------------------------------------------------------
# Parameter init (raw, "PyTorch-like" layouts) and packing for the kernel.
# ---------------------------------------------------------------------------
def init_qnet_params(key, input_shape, num_actions):
    C, H, W = input_shape
    *_, oh3, ow3 = _conv_dims(H, W)
    feat = 64 * oh3 * ow3

    ks = jax.random.split(key, 10)

    def w_init(k, shape, fan_in):
        return jax.random.normal(k, shape, jnp.float32) / jnp.sqrt(fan_in)

    def b_init(k, n, fan_in):
        bound = 1.0 / jnp.sqrt(fan_in)
        return jax.random.uniform(k, (n,), jnp.float32, -bound, bound)

    return {
        # conv weights: (KH, KW, Cin, Cout); fc weights: (in, out).
        "w1": w_init(ks[0], (8, 8, C, 32), 8 * 8 * C),
        "b1": b_init(ks[1], 32, 8 * 8 * C),
        "w2": w_init(ks[2], (4, 4, 32, 64), 4 * 4 * 32),
        "b2": b_init(ks[3], 64, 4 * 4 * 32),
        "w3": w_init(ks[4], (3, 3, 64, 64), 3 * 3 * 64),
        "b3": b_init(ks[5], 64, 3 * 3 * 64),
        # fc1 rows follow PyTorch's NCHW flatten: idx = c*oh3*ow3 + h*ow3 + w.
        "wf1": w_init(ks[6], (feat, FC_HIDDEN), feat),
        "bf1": b_init(ks[7], FC_HIDDEN, feat),
        "wf2": w_init(ks[8], (FC_HIDDEN, num_actions), FC_HIDDEN),
        "bf2": b_init(ks[9], num_actions, FC_HIDDEN),
    }


def pack_qnet_params(params, input_shape, num_actions):
    """Fold x/255 into conv1, regroup for space-to-depth(4), phase-pack the
    conv1->conv2 boundary, reorder fc1 rows to the kernel's (h, w, c) feature
    order, zero-pad channels to 128 lanes, cast weights to bf16."""
    C, H, W = input_shape
    *_, oh3, ow3 = _conv_dims(H, W)
    k1 = 16 * C
    assert k1 <= LANE and num_actions <= LANE

    f32, bf16 = jnp.float32, jnp.bfloat16

    def pad_to(x, axis, size):
        pad = [(0, 0)] * x.ndim
        pad[axis] = (0, size - x.shape[axis])
        return jnp.pad(x, pad)

    # conv1: fold 1/255, regroup the 8x8 taps into 2x2 taps of 4x4 pixel
    # blocks matching the space-to-depth channel order (dh, dw, c).
    w1 = params["w1"].astype(f32) * (1.0 / 255.0)               # (8,8,C,32)
    w1 = w1.reshape(2, 4, 2, 4, C, 32)                          # (i,dh,j,dw,c,o)
    w1 = jnp.transpose(w1, (0, 2, 1, 3, 4, 5)).reshape(2, 2, k1, 32)

    # Phase-pack: conv1 output parity (pi, pj) lives at lane block
    # 32*(2*pi+pj); stride-2 input window (r, s) = (pi+i, pj+j) serves every
    # parity that can reach it, so conv1 is 9 matmuls total.
    w1p = jnp.zeros((3, 3, LANE, LANE), f32)
    for pi in range(2):
        for pj in range(2):
            off = 32 * (2 * pi + pj)
            for i in range(2):
                for j in range(2):
                    w1p = w1p.at[pi + i, pj + j, :k1, off:off + 32].set(w1[i, j])
    b1p = jnp.tile(params["b1"].astype(f32), 4).reshape(1, LANE)

    # conv2: regroup the 4x4 taps by spatial offset (ih, jw); K is the
    # phase-packed 128 lanes -> 4 full-density matmuls.
    w2 = params["w2"].astype(f32)                               # (4,4,32,64)
    w2p = jnp.zeros((2, 2, LANE, LANE), f32)
    for ih in range(2):
        for jw in range(2):
            for pi in range(2):
                for pj in range(2):
                    off = 32 * (2 * pi + pj)
                    w2p = w2p.at[ih, jw, off:off + 32, :64].set(
                        w2[2 * ih + pi, 2 * jw + pj])
    b2p = pad_to(params["b2"].astype(f32), 0, LANE).reshape(1, LANE)

    # conv3: plain channel padding.
    w3p = pad_to(pad_to(params["w3"].astype(f32), 2, LANE), 3, LANE)
    b3p = pad_to(params["b3"].astype(f32), 0, LANE).reshape(1, LANE)

    # fc1: (feat, 512) PyTorch-NCHW-flatten rows -> rows ordered (h, w, c_pad)
    # to match the kernel's flattened conv3 output.
    wf1 = params["wf1"].astype(f32).reshape(64, oh3, ow3, FC_HIDDEN)
    wf1 = jnp.transpose(wf1, (1, 2, 0, 3))                      # (oh3,ow3,64,512)
    wf1 = pad_to(wf1, 2, LANE).reshape(oh3 * ow3 * LANE, FC_HIDDEN)
    bf1 = params["bf1"].astype(f32).reshape(1, FC_HIDDEN)

    wf2 = pad_to(params["wf2"].astype(f32), 1, LANE)            # (512, 128)
    bf2 = pad_to(params["bf2"].astype(f32), 0, LANE).reshape(1, LANE)

    return {
        "w1": w1p.astype(bf16), "b1": b1p,
        "w2": w2p.astype(bf16), "b2": b2p,
        "w3": w3p.astype(bf16), "b3": b3p,
        "wf1": wf1.astype(bf16), "bf1": bf1,
        "wf2": wf2.astype(bf16), "bf2": bf2,
    }


# ---------------------------------------------------------------------------
# Forward wrapper: bf16 space-to-depth repack + one fused pallas_call.
# ---------------------------------------------------------------------------
def qnet_forward(packed, x_nchw, *, num_actions, block_batch=32):
    B, C, H, W = x_nchw.shape
    # TODO(synk): PyTorch's runtime `assert x.max().item() <= 1.0` is skipped
    # (cannot assert on traced values); the /255 scaling is folded into w1.
    assert H % 4 == 0 and W % 4 == 0, "spatial dims must be multiples of 4"
    oh1, ow1, oh2, ow2, oh3, ow3 = _conv_dims(H, W)
    assert oh1 % 2 == 0 and ow1 % 2 == 0, "conv1 output must be even"
    assert 16 * C <= LANE
    hs, ws = H // 4, W // 4

    # Batch tile: multiple of 16 (bf16 sublane packing); shrink for small
    # batches so the "parallel" grid keeps >= 2 steps where possible (v7x has
    # 2 TensorCores; harmless on v5e/v6e).
    tb = max(16, (block_batch // 16) * 16)
    tb = min(tb, max(16, pl.cdiv(B, 16) * 16))
    while tb > 16 and pl.cdiv(B, tb) < 2:
        tb -= 16
    nb = pl.cdiv(B, tb)
    b_pad = nb * tb

    # space-to-depth(4) + bf16 cast + batch-major packing: each grid step's
    # input block x[b] is ONE contiguous (hs, ws, tb, 128) chunk in HBM.
    x = jnp.transpose(x_nchw, (0, 2, 3, 1)).astype(jnp.bfloat16)   # (B,H,W,C)
    x = x.reshape(B, hs, 4, ws, 4, C)
    x = jnp.transpose(x, (0, 1, 3, 2, 4, 5)).reshape(B, hs, ws, 16 * C)
    x = jnp.pad(x, ((0, b_pad - B), (0, 0), (0, 0), (0, LANE - 16 * C)))
    x = jnp.transpose(x.reshape(nb, tb, hs, ws, LANE), (0, 2, 3, 1, 4))

    p = packed

    def resident(arr):   # whole array lives in VMEM, reused by every grid step
        return pl.BlockSpec(arr.shape, lambda b: (0,) * arr.ndim)

    # VMEM cap: the scoped default is only 32 MB; use most of the physical
    # VMEM (~110 MB on v5e/v6e's 128 MiB, ~56 MB on v7x's 64 MiB per core).
    try:
        vmem_phys = int(pltpu.get_tpu_info().vmem_capacity_bytes)
    except Exception:
        vmem_phys = 64 * 1024 * 1024
    vmem_cap = min((vmem_phys * 7) // 8, 110 * 1024 * 1024)

    H2, W2 = oh1 // 2, ow1 // 2
    flops = 2 * b_pad * (9 * H2 * W2 * LANE * LANE
                         + 4 * oh2 * ow2 * LANE * LANE
                         + 9 * oh3 * ow3 * LANE * LANE
                         + oh3 * ow3 * LANE * FC_HIDDEN
                         + FC_HIDDEN * LANE)
    bytes_accessed = (int(x.size) * 2
                      + sum(int(v.size) * v.dtype.itemsize for v in p.values())
                      + b_pad * LANE * 4)

    q_pad = pl.pallas_call(
        _qnet_fused_kernel,
        out_shape=jax.ShapeDtypeStruct((b_pad, LANE), jnp.float32),
        grid=(nb,),
        in_specs=[
            # leading batch-block dim squeezed; rest is the full block.
            pl.BlockSpec((None, hs, ws, tb, LANE),
                         lambda b: (b, 0, 0, 0, 0)),
            resident(p["w1"]), resident(p["b1"]),
            resident(p["w2"]), resident(p["b2"]),
            resident(p["w3"]), resident(p["b3"]),
            resident(p["wf1"]), resident(p["bf1"]),
            resident(p["wf2"]), resident(p["bf2"]),
        ],
        out_specs=pl.BlockSpec((tb, LANE), lambda b: (b, 0)),
        compiler_params=pltpu.CompilerParams(
            dimension_semantics=("parallel",),
            vmem_limit_bytes=vmem_cap),
        cost_estimate=pl.CostEstimate(flops=flops, transcendentals=0,
                                      bytes_accessed=bytes_accessed),
    )(x, p["w1"], p["b1"], p["w2"], p["b2"], p["w3"], p["b3"],
      p["wf1"], p["bf1"], p["wf2"], p["bf2"])

    return q_pad[:B, :num_actions]


# ---------------------------------------------------------------------------
# Pure-JAX f32 reference (matches the PyTorch module) for validation.
# ---------------------------------------------------------------------------
def reference_forward(params, x_nchw):
    x = jnp.transpose(x_nchw, (0, 2, 3, 1)).astype(jnp.float32) / 255.0
    hi = jax.lax.Precision.HIGHEST

    def conv(x, w, b, s):
        y = jax.lax.conv_general_dilated(
            x, w, window_strides=(s, s), padding="VALID",
            dimension_numbers=("NHWC", "HWIO", "NHWC"), precision=hi)
        return jax.nn.relu(y + b)

    x = conv(x, params["w1"], params["b1"], 4)
    x = conv(x, params["w2"], params["b2"], 2)
    x = conv(x, params["w3"], params["b3"], 1)
    x = jnp.transpose(x, (0, 3, 1, 2)).reshape(x.shape[0], -1)   # NCHW flatten
    h = jax.nn.relu(jnp.dot(x, params["wf1"], precision=hi) + params["bf1"])
    return jnp.dot(h, params["wf2"], precision=hi) + params["bf2"]


# ---------------------------------------------------------------------------
if __name__ == "__main__":
    key = jax.random.PRNGKey(0)
    kx, kp = jax.random.split(key)

    batch = 2
    input_shape = (4, 36, 36)   # (C, H, W): 36 -> 8 -> 3 -> 1 spatially
    num_actions = 6

    raw = init_qnet_params(kp, input_shape, num_actions)
    packed = pack_qnet_params(raw, input_shape, num_actions)

    # pixel-like input in [0, 255]
    x = jax.random.uniform(kx, (batch,) + input_shape, jnp.float32,
                           minval=0.0, maxval=255.0)

    fwd = jax.jit(functools.partial(qnet_forward, num_actions=num_actions))
    q = fwd(packed, x)
    jax.block_until_ready(q)
    assert q.shape == (batch, num_actions), q.shape

    # sanity check against the f32 reference (kernel uses bf16 MXU operands).
    q_ref = jax.jit(reference_forward)(raw, x)
    err = float(jnp.max(jnp.abs(q - q_ref)))
    assert err < 0.15, f"kernel/reference mismatch: max abs err {err}"

    print("KERNEL_OK")
</pallas_src>

<mosaic_0001>
module attributes {stable_mosaic.version = 11 : i64} {
  func.func @_qnet_fused_kernel(%arg0: i32, %arg1: memref<1x9x9x16x128xbf16, #tpu.memory_space<vmem>>, %arg2: memref<3x3x128x128xbf16, #tpu.memory_space<vmem>>, %arg3: memref<1x128xf32, #tpu.memory_space<vmem>>, %arg4: memref<2x2x128x128xbf16, #tpu.memory_space<vmem>>, %arg5: memref<1x128xf32, #tpu.memory_space<vmem>>, %arg6: memref<3x3x128x128xbf16, #tpu.memory_space<vmem>>, %arg7: memref<1x128xf32, #tpu.memory_space<vmem>>, %arg8: memref<128x512xbf16, #tpu.memory_space<vmem>>, %arg9: memref<1x512xf32, #tpu.memory_space<vmem>>, %arg10: memref<512x128xbf16, #tpu.memory_space<vmem>>, %arg11: memref<1x128xf32, #tpu.memory_space<vmem>>, %arg12: memref<16x128xf32, #tpu.memory_space<vmem>>) attributes {dimension_semantics = [#tpu.dimension_semantics<parallel>], iteration_bounds = array<i64: 1>, scalar_prefetch = 0 : i64, scratch_operands = 0 : i64, tpu.core_type = #tpu.core_type<tc>, window_params = [{transform_indices = @transform_0, window_bounds = array<i64: 1, 9, 9, 16, 128>}, {pipeline_mode = #tpu.pipeline_mode<synchronous>, transform_indices = @transform_1, window_bounds = array<i64: 3, 3, 128, 128>}, {pipeline_mode = #tpu.pipeline_mode<synchronous>, transform_indices = @transform_2, window_bounds = array<i64: 1, 128>}, {pipeline_mode = #tpu.pipeline_mode<synchronous>, transform_indices = @transform_3, window_bounds = array<i64: 2, 2, 128, 128>}, {pipeline_mode = #tpu.pipeline_mode<synchronous>, transform_indices = @transform_4, window_bounds = array<i64: 1, 128>}, {pipeline_mode = #tpu.pipeline_mode<synchronous>, transform_indices = @transform_5, window_bounds = array<i64: 3, 3, 128, 128>}, {pipeline_mode = #tpu.pipeline_mode<synchronous>, transform_indices = @transform_6, window_bounds = array<i64: 1, 128>}, {pipeline_mode = #tpu.pipeline_mode<synchronous>, transform_indices = @transform_7, window_bounds = array<i64: 128, 512>}, {pipeline_mode = #tpu.pipeline_mode<synchronous>, transform_indices = @transform_8, window_bounds = array<i64: 1, 512>}, {pipeline_mode = #tpu.pipeline_mode<synchronous>, transform_indices = @transform_9, window_bounds = array<i64: 512, 128>}, {pipeline_mode = #tpu.pipeline_mode<synchronous>, transform_indices = @transform_10, window_bounds = array<i64: 1, 128>}, {transform_indices = @transform_11, window_bounds = array<i64: 16, 128>}]} {
    %c0 = arith.constant 0 : index
    %c0_0 = arith.constant 0 : index
    %c0_1 = arith.constant 0 : index
    %c0_2 = arith.constant 0 : index
    %c0_3 = arith.constant 0 : index
    %0 = vector.load %arg1[%c0, %c0_0, %c0_1, %c0_2, %c0_3] : memref<1x9x9x16x128xbf16, #tpu.memory_space<vmem>>, vector<1x9x9x16x128xbf16>
    %1 = vector.shape_cast %0 : vector<1x9x9x16x128xbf16> to vector<9x9x16x128xbf16>
    %2 = vector.extract_strided_slice %1 {offsets = [0, 0, 0, 0], sizes = [8, 9, 16, 128], strides = [1, 1, 1, 1]} : vector<9x9x16x128xbf16> to vector<8x9x16x128xbf16>
    %3 = vector.shape_cast %2 : vector<8x9x16x128xbf16> to vector<4x2x9x16x128xbf16>
    %4 = vector.extract_strided_slice %3 {offsets = [0, 0, 0, 0, 0], sizes = [4, 1, 9, 16, 128], strides = [1, 1, 1, 1, 1]} : vector<4x2x9x16x128xbf16> to vector<4x1x9x16x128xbf16>
    %5 = vector.shape_cast %4 : vector<4x1x9x16x128xbf16> to vector<4x9x16x128xbf16>
    %6 = vector.extract_strided_slice %5 {offsets = [0, 0, 0, 0], sizes = [4, 8, 16, 128], strides = [1, 1, 1, 1]} : vector<4x9x16x128xbf16> to vector<4x8x16x128xbf16>
    %7 = vector.shape_cast %6 : vector<4x8x16x128xbf16> to vector<4x4x2x16x128xbf16>
    %8 = vector.extract_strided_slice %7 {offsets = [0, 0, 0, 0, 0], sizes = [4, 4, 1, 16, 128], strides = [1, 1, 1, 1, 1]} : vector<4x4x2x16x128xbf16> to vector<4x4x1x16x128xbf16>
    %9 = vector.shape_cast %8 : vector<4x4x1x16x128xbf16> to vector<4x4x16x128xbf16>
    %10 = vector.shape_cast %9 : vector<4x4x16x128xbf16> to vector<256x128xbf16>
    %11 = vector.extract_strided_slice %5 {offsets = [0, 0, 0, 0], sizes = [4, 8, 16, 128], strides = [1, 1, 1, 1]} : vector<4x9x16x128xbf16> to vector<4x8x16x128xbf16>
    %12 = vector.shape_cast %11 : vector<4x8x16x128xbf16> to vector<4x4x2x16x128xbf16>
    %13 = vector.extract_strided_slice %12 {offsets = [0, 0, 1, 0, 0], sizes = [4, 4, 1, 16, 128], strides = [1, 1, 1, 1, 1]} : vector<4x4x2x16x128xbf16> to vector<4x4x1x16x128xbf16>
    %14 = vector.shape_cast %13 : vector<4x4x1x16x128xbf16> to vector<4x4x16x128xbf16>
    %15 = vector.shape_cast %14 : vector<4x4x16x128xbf16> to vector<256x128xbf16>
    %16 = vector.extract_strided_slice %5 {offsets = [0, 1, 0, 0], sizes = [4, 8, 16, 128], strides = [1, 1, 1, 1]} : vector<4x9x16x128xbf16> to vector<4x8x16x128xbf16>
    %17 = vector.shape_cast %16 : vector<4x8x16x128xbf16> to vector<4x4x2x16x128xbf16>
    %18 = vector.extract_strided_slice %17 {offsets = [0, 0, 1, 0, 0], sizes = [4, 4, 1, 16, 128], strides = [1, 1, 1, 1, 1]} : vector<4x4x2x16x128xbf16> to vector<4x4x1x16x128xbf16>
    %19 = vector.shape_cast %18 : vector<4x4x1x16x128xbf16> to vector<4x4x16x128xbf16>
    %20 = vector.shape_cast %19 : vector<4x4x16x128xbf16> to vector<256x128xbf16>
    %21 = vector.extract_strided_slice %1 {offsets = [0, 0, 0, 0], sizes = [8, 9, 16, 128], strides = [1, 1, 1, 1]} : vector<9x9x16x128xbf16> to vector<8x9x16x128xbf16>
    %22 = vector.shape_cast %21 : vector<8x9x16x128xbf16> to vector<4x2x9x16x128xbf16>
    %23 = vector.extract_strided_slice %22 {offsets = [0, 1, 0, 0, 0], sizes = [4, 1, 9, 16, 128], strides = [1, 1, 1, 1, 1]} : vector<4x2x9x16x128xbf16> to vector<4x1x9x16x128xbf16>
    %24 = vector.shape_cast %23 : vector<4x1x9x16x128xbf16> to vector<4x9x16x128xbf16>
    %25 = vector.extract_strided_slice %24 {offsets = [0, 0, 0, 0], sizes = [4, 8, 16, 128], strides = [1, 1, 1, 1]} : vector<4x9x16x128xbf16> to vector<4x8x16x128xbf16>
    %26 = vector.shape_cast %25 : vector<4x8x16x128xbf16> to vector<4x4x2x16x128xbf16>
    %27 = vector.extract_strided_slice %26 {offsets = [0, 0, 0, 0, 0], sizes = [4, 4, 1, 16, 128], strides = [1, 1, 1, 1, 1]} : vector<4x4x2x16x128xbf16> to vector<4x4x1x16x128xbf16>
    %28 = vector.shape_cast %27 : vector<4x4x1x16x128xbf16> to vector<4x4x16x128xbf16>
    %29 = vector.shape_cast %28 : vector<4x4x16x128xbf16> to vector<256x128xbf16>
    %30 = vector.extract_strided_slice %24 {offsets = [0, 0, 0, 0], sizes = [4, 8, 16, 128], strides = [1, 1, 1, 1]} : vector<4x9x16x128xbf16> to vector<4x8x16x128xbf16>
    %31 = vector.shape_cast %30 : vector<4x8x16x128xbf16> to vector<4x4x2x16x128xbf16>
    %32 = vector.extract_strided_slice %31 {offsets = [0, 0, 1, 0, 0], sizes = [4, 4, 1, 16, 128], strides = [1, 1, 1, 1, 1]} : vector<4x4x2x16x128xbf16> to vector<4x4x1x16x128xbf16>
    %33 = vector.shape_cast %32 : vector<4x4x1x16x128xbf16> to vector<4x4x16x128xbf16>
    %34 = vector.shape_cast %33 : vector<4x4x16x128xbf16> to vector<256x128xbf16>
    %35 = vector.extract_strided_slice %24 {offsets = [0, 1, 0, 0], sizes = [4, 8, 16, 128], strides = [1, 1, 1, 1]} : vector<4x9x16x128xbf16> to vector<4x8x16x128xbf16>
    %36 = vector.shape_cast %35 : vector<4x8x16x128xbf16> to vector<4x4x2x16x128xbf16>
    %37 = vector.extract_strided_slice %36 {offsets = [0, 0, 1, 0, 0], sizes = [4, 4, 1, 16, 128], strides = [1, 1, 1, 1, 1]} : vector<4x4x2x16x128xbf16> to vector<4x4x1x16x128xbf16>
    %38 = vector.shape_cast %37 : vector<4x4x1x16x128xbf16> to vector<4x4x16x128xbf16>
    %39 = vector.shape_cast %38 : vector<4x4x16x128xbf16> to vector<256x128xbf16>
    %40 = vector.extract_strided_slice %1 {offsets = [1, 0, 0, 0], sizes = [8, 9, 16, 128], strides = [1, 1, 1, 1]} : vector<9x9x16x128xbf16> to vector<8x9x16x128xbf16>
    %41 = vector.shape_cast %40 : vector<8x9x16x128xbf16> to vector<4x2x9x16x128xbf16>
    %42 = vector.extract_strided_slice %41 {offsets = [0, 1, 0, 0, 0], sizes = [4, 1, 9, 16, 128], strides = [1, 1, 1, 1, 1]} : vector<4x2x9x16x128xbf16> to vector<4x1x9x16x128xbf16>
    %43 = vector.shape_cast %42 : vector<4x1x9x16x128xbf16> to vector<4x9x16x128xbf16>
    %44 = vector.extract_strided_slice %43 {offsets = [0, 0, 0, 0], sizes = [4, 8, 16, 128], strides = [1, 1, 1, 1]} : vector<4x9x16x128xbf16> to vector<4x8x16x128xbf16>
    %45 = vector.shape_cast %44 : vector<4x8x16x128xbf16> to vector<4x4x2x16x128xbf16>
    %46 = vector.extract_strided_slice %45 {offsets = [0, 0, 0, 0, 0], sizes = [4, 4, 1, 16, 128], strides = [1, 1, 1, 1, 1]} : vector<4x4x2x16x128xbf16> to vector<4x4x1x16x128xbf16>
    %47 = vector.shape_cast %46 : vector<4x4x1x16x128xbf16> to vector<4x4x16x128xbf16>
    %48 = vector.shape_cast %47 : vector<4x4x16x128xbf16> to vector<256x128xbf16>
    %49 = vector.extract_strided_slice %43 {offsets = [0, 0, 0, 0], sizes = [4, 8, 16, 128], strides = [1, 1, 1, 1]} : vector<4x9x16x128xbf16> to vector<4x8x16x128xbf16>
    %50 = vector.shape_cast %49 : vector<4x8x16x128xbf16> to vector<4x4x2x16x128xbf16>
    %51 = vector.extract_strided_slice %50 {offsets = [0, 0, 1, 0, 0], sizes = [4, 4, 1, 16, 128], strides = [1, 1, 1, 1, 1]} : vector<4x4x2x16x128xbf16> to vector<4x4x1x16x128xbf16>
    %52 = vector.shape_cast %51 : vector<4x4x1x16x128xbf16> to vector<4x4x16x128xbf16>
    %53 = vector.shape_cast %52 : vector<4x4x16x128xbf16> to vector<256x128xbf16>
    %54 = vector.extract_strided_slice %43 {offsets = [0, 1, 0, 0], sizes = [4, 8, 16, 128], strides = [1, 1, 1, 1]} : vector<4x9x16x128xbf16> to vector<4x8x16x128xbf16>
    %55 = vector.shape_cast %54 : vector<4x8x16x128xbf16> to vector<4x4x2x16x128xbf16>
    %56 = vector.extract_strided_slice %55 {offsets = [0, 0, 1, 0, 0], sizes = [4, 4, 1, 16, 128], strides = [1, 1, 1, 1, 1]} : vector<4x4x2x16x128xbf16> to vector<4x4x1x16x128xbf16>
    %57 = vector.shape_cast %56 : vector<4x4x1x16x128xbf16> to vector<4x4x16x128xbf16>
    %58 = vector.shape_cast %57 : vector<4x4x16x128xbf16> to vector<256x128xbf16>
    %cst = arith.constant 0.000000e+00 : f32
    %59 = vector.broadcast %cst : f32 to vector<256x128xf32>
    %c0_4 = arith.constant 0 : index
    %c0_5 = arith.constant 0 : index
    %c0_6 = arith.constant 0 : index
    %c0_7 = arith.constant 0 : index
    %60 = vector.load %arg2[%c0_4, %c0_5, %c0_6, %c0_7] : memref<3x3x128x128xbf16, #tpu.memory_space<vmem>>, vector<1x1x128x128xbf16>
    %61 = vector.shape_cast %60 : vector<1x1x128x128xbf16> to vector<128x128xbf16>
    %cst_8 = arith.constant dense<0.000000e+00> : vector<256x128xf32>
    %62 = tpu.matmul %10, %61, %cst_8 {dimension_numbers = #tpu.dot_dimension_numbers<[1], [0], [0], [1], [0, 0, 1, 1], [], []>} : vector<256x128xbf16>, vector<128x128xbf16>, vector<256x128xf32> -> vector<256x128xf32>
    %63 = arith.addf %59, %62 : vector<256x128xf32>
    %c0_9 = arith.constant 0 : index
    %c1 = arith.constant 1 : index
    %c0_10 = arith.constant 0 : index
    %c0_11 = arith.constant 0 : index
    %64 = vector.load %arg2[%c0_9, %c1, %c0_10, %c0_11] : memref<3x3x128x128xbf16, #tpu.memory_space<vmem>>, vector<1x1x128x128xbf16>
    %65 = vector.shape_cast %64 : vector<1x1x128x128xbf16> to vector<128x128xbf16>
    %cst_12 = arith.constant dense<0.000000e+00> : vector<256x128xf32>
    %66 = tpu.matmul %15, %65, %cst_12 {dimension_numbers = #tpu.dot_dimension_numbers<[1], [0], [0], [1], [0, 0, 1, 1], [], []>} : vector<256x128xbf16>, vector<128x128xbf16>, vector<256x128xf32> -> vector<256x128xf32>
    %67 = arith.addf %63, %66 : vector<256x128xf32>
    %c0_13 = arith.constant 0 : index
    %c2 = arith.constant 2 : index
    %c0_14 = arith.constant 0 : index
    %c0_15 = arith.constant 0 : index
    %68 = vector.load %arg2[%c0_13, %c2, %c0_14, %c0_15] : memref<3x3x128x128xbf16, #tpu.memory_space<vmem>>, vector<1x1x128x128xbf16>
    %69 = vector.shape_cast %68 : vector<1x1x128x128xbf16> to vector<128x128xbf16>
    %cst_16 = arith.constant dense<0.000000e+00> : vector<256x128xf32>
    %70 = tpu.matmul %20, %69, %cst_16 {dimension_numbers = #tpu.dot_dimension_numbers<[1], [0], [0], [1], [0, 0, 1, 1], [], []>} : vector<256x128xbf16>, vector<128x128xbf16>, vector<256x128xf32> -> vector<256x128xf32>
    %71 = arith.addf %67, %70 : vector<256x128xf32>
    %c1_17 = arith.constant 1 : index
    %c0_18 = arith.constant 0 : index
    %c0_19 = arith.constant 0 : index
    %c0_20 = arith.constant 0 : index
    %72 = vector.load %arg2[%c1_17, %c0_18, %c0_19, %c0_20] : memref<3x3x128x128xbf16, #tpu.memory_space<vmem>>, vector<1x1x128x128xbf16>
    %73 = vector.shape_cast %72 : vector<1x1x128x128xbf16> to vector<128x128xbf16>
    %cst_21 = arith.constant dense<0.000000e+00> : vector<256x128xf32>
    %74 = tpu.matmul %29, %73, %cst_21 {dimension_numbers = #tpu.dot_dimension_numbers<[1], [0], [0], [1], [0, 0, 1, 1], [], []>} : vector<256x128xbf16>, vector<128x128xbf16>, vector<256x128xf32> -> vector<256x128xf32>
    %75 = arith.addf %71, %74 : vector<256x128xf32>
    %c1_22 = arith.constant 1 : index
    %c1_23 = arith.constant 1 : index
    %c0_24 = arith.constant 0 : index
    %c0_25 = arith.constant 0 : index
    %76 = vector.load %arg2[%c1_22, %c1_23, %c0_24, %c0_25] : memref<3x3x128x128xbf16, #tpu.memory_space<vmem>>, vector<1x1x128x128xbf16>
    %77 = vector.shape_cast %76 : vector<1x1x128x128xbf16> to vector<128x128xbf16>
    %cst_26 = arith.constant dense<0.000000e+00> : vector<256x128xf32>
    %78 = tpu.matmul %34, %77, %cst_26 {dimension_numbers = #tpu.dot_dimension_numbers<[1], [0], [0], [1], [0, 0, 1, 1], [], []>} : vector<256x128xbf16>, vector<128x128xbf16>, vector<256x128xf32> -> vector<256x128xf32>
    %79 = arith.addf %75, %78 : vector<256x128xf32>
    %c1_27 = arith.constant 1 : index
    %c2_28 = arith.constant 2 : index
    %c0_29 = arith.constant 0 : index
    %c0_30 = arith.constant 0 : index
    %80 = vector.load %arg2[%c1_27, %c2_28, %c0_29, %c0_30] : memref<3x3x128x128xbf16, #tpu.memory_space<vmem>>, vector<1x1x128x128xbf16>
    %81 = vector.shape_cast %80 : vector<1x1x128x128xbf16> to vector<128x128xbf16>
    %cst_31 = arith.constant dense<0.000000e+00> : vector<256x128xf32>
    %82 = tpu.matmul %39, %81, %cst_31 {dimension_numbers = #tpu.dot_dimension_numbers<[1], [0], [0], [1], [0, 0, 1, 1], [], []>} : vector<256x128xbf16>, vector<128x128xbf16>, vector<256x128xf32> -> vector<256x128xf32>
    %83 = arith.addf %79, %82 : vector<256x128xf32>
    %c2_32 = arith.constant 2 : index
    %c0_33 = arith.constant 0 : index
    %c0_34 = arith.constant 0 : index
    %c0_35 = arith.constant 0 : index
    %84 = vector.load %arg2[%c2_32, %c0_33, %c0_34, %c0_35] : memref<3x3x128x128xbf16, #tpu.memory_space<vmem>>, vector<1x1x128x128xbf16>
    %85 = vector.shape_cast %84 : vector<1x1x128x128xbf16> to vector<128x128xbf16>
    %cst_36 = arith.constant dense<0.000000e+00> : vector<256x128xf32>
    %86 = tpu.matmul %48, %85, %cst_36 {dimension_numbers = #tpu.dot_dimension_numbers<[1], [0], [0], [1], [0, 0, 1, 1], [], []>} : vector<256x128xbf16>, vector<128x128xbf16>, vector<256x128xf32> -> vector<256x128xf32>
    %87 = arith.addf %83, %86 : vector<256x128xf32>
    %c2_37 = arith.constant 2 : index
    %c1_38 = arith.constant 1 : index
    %c0_39 = arith.constant 0 : index
    %c0_40 = arith.constant 0 : index
    %88 = vector.load %arg2[%c2_37, %c1_38, %c0_39, %c0_40] : memref<3x3x128x128xbf16, #tpu.memory_space<vmem>>, vector<1x1x128x128xbf16>
    %89 = vector.shape_cast %88 : vector<1x1x128x128xbf16> to vector<128x128xbf16>
    %cst_41 = arith.constant dense<0.000000e+00> : vector<256x128xf32>
    %90 = tpu.matmul %53, %89, %cst_41 {dimension_numbers = #tpu.dot_dimension_numbers<[1], [0], [0], [1], [0, 0, 1, 1], [], []>} : vector<256x128xbf16>, vector<128x128xbf16>, vector<256x128xf32> -> vector<256x128xf32>
    %91 = arith.addf %87, %90 : vector<256x128xf32>
    %c2_42 = arith.constant 2 : index
    %c2_43 = arith.constant 2 : index
    %c0_44 = arith.constant 0 : index
    %c0_45 = arith.constant 0 : index
    %92 = vector.load %arg2[%c2_42, %c2_43, %c0_44, %c0_45] : memref<3x3x128x128xbf16, #tpu.memory_space<vmem>>, vector<1x1x128x128xbf16>
    %93 = vector.shape_cast %92 : vector<1x1x128x128xbf16> to vector<128x128xbf16>
    %cst_46 = arith.constant dense<0.000000e+00> : vector<256x128xf32>
    %94 = tpu.matmul %58, %93, %cst_46 {dimension_numbers = #tpu.dot_dimension_numbers<[1], [0], [0], [1], [0, 0, 1, 1], [], []>} : vector<256x128xbf16>, vector<128x128xbf16>, vector<256x128xf32> -> vector<256x128xf32>
    %95 = arith.addf %91, %94 : vector<256x128xf32>
    %c0_47 = arith.constant 0 : index
    %c0_48 = arith.constant 0 : index
    %96 = vector.load %arg3[%c0_47, %c0_48] : memref<1x128xf32, #tpu.memory_space<vmem>>, vector<1x128xf32>
    %97 = vector.broadcast %96 : vector<1x128xf32> to vector<256x128xf32>
    %98 = arith.addf %95, %97 : vector<256x128xf32>
    %cst_49 = arith.constant 0.000000e+00 : f32
    %99 = vector.broadcast %cst_49 : f32 to vector<256x128xf32>
    %100 = arith.maximumf %98, %99 : vector<256x128xf32>
    %101 = arith.truncf %100 : vector<256x128xf32> to vector<256x128xbf16>
    %102 = vector.shape_cast %101 : vector<256x128xbf16> to vector<4x4x16x128xbf16>
    %cst_50 = arith.constant 0.000000e+00 : f32
    %103 = vector.broadcast %cst_50 : f32 to vector<144x128xf32>
    %104 = vector.extract_strided_slice %102 {offsets = [0, 0, 0, 0], sizes = [3, 3, 16, 128], strides = [1, 1, 1, 1]} : vector<4x4x16x128xbf16> to vector<3x3x16x128xbf16>
    %105 = vector.shape_cast %104 : vector<3x3x16x128xbf16> to vector<144x128xbf16>
    %c0_51 = arith.constant 0 : index
    %c0_52 = arith.constant 0 : index
    %c0_53 = arith.constant 0 : index
    %c0_54 = arith.constant 0 : index
    %106 = vector.load %arg4[%c0_51, %c0_52, %c0_53, %c0_54] : memref<2x2x128x128xbf16, #tpu.memory_space<vmem>>, vector<1x1x128x128xbf16>
    %107 = vector.shape_cast %106 : vector<1x1x128x128xbf16> to vector<128x128xbf16>
    %cst_55 = arith.constant dense<0.000000e+00> : vector<144x128xf32>
    %108 = tpu.matmul %105, %107, %cst_55 {dimension_numbers = #tpu.dot_dimension_numbers<[1], [0], [0], [1], [0, 0, 1, 1], [], []>} : vector<144x128xbf16>, vector<128x128xbf16>, vector<144x128xf32> -> vector<144x128xf32>
    %109 = arith.addf %103, %108 : vector<144x128xf32>
    %110 = vector.extract_strided_slice %102 {offsets = [0, 1, 0, 0], sizes = [3, 3, 16, 128], strides = [1, 1, 1, 1]} : vector<4x4x16x128xbf16> to vector<3x3x16x128xbf16>
    %111 = vector.shape_cast %110 : vector<3x3x16x128xbf16> to vector<144x128xbf16>
    %c0_56 = arith.constant 0 : index
    %c1_57 = arith.constant 1 : index
    %c0_58 = arith.constant 0 : index
    %c0_59 = arith.constant 0 : index
    %112 = vector.load %arg4[%c0_56, %c1_57, %c0_58, %c0_59] : memref<2x2x128x128xbf16, #tpu.memory_space<vmem>>, vector<1x1x128x128xbf16>
    %113 = vector.shape_cast %112 : vector<1x1x128x128xbf16> to vector<128x128xbf16>
    %cst_60 = arith.constant dense<0.000000e+00> : vector<144x128xf32>
    %114 = tpu.matmul %111, %113, %cst_60 {dimension_numbers = #tpu.dot_dimension_numbers<[1], [0], [0], [1], [0, 0, 1, 1], [], []>} : vector<144x128xbf16>, vector<128x128xbf16>, vector<144x128xf32> -> vector<144x128xf32>
    %115 = arith.addf %109, %114 : vector<144x128xf32>
    %116 = vector.extract_strided_slice %102 {offsets = [1, 0, 0, 0], sizes = [3, 3, 16, 128], strides = [1, 1, 1, 1]} : vector<4x4x16x128xbf16> to vector<3x3x16x128xbf16>
    %117 = vector.shape_cast %116 : vector<3x3x16x128xbf16> to vector<144x128xbf16>
    %c1_61 = arith.constant 1 : index
    %c0_62 = arith.constant 0 : index
    %c0_63 = arith.constant 0 : index
    %c0_64 = arith.constant 0 : index
    %118 = vector.load %arg4[%c1_61, %c0_62, %c0_63, %c0_64] : memref<2x2x128x128xbf16, #tpu.memory_space<vmem>>, vector<1x1x128x128xbf16>
    %119 = vector.shape_cast %118 : vector<1x1x128x128xbf16> to vector<128x128xbf16>
    %cst_65 = arith.constant dense<0.000000e+00> : vector<144x128xf32>
    %120 = tpu.matmul %117, %119, %cst_65 {dimension_numbers = #tpu.dot_dimension_numbers<[1], [0], [0], [1], [0, 0, 1, 1], [], []>} : vector<144x128xbf16>, vector<128x128xbf16>, vector<144x128xf32> -> vector<144x128xf32>
    %121 = arith.addf %115, %120 : vector<144x128xf32>
    %122 = vector.extract_strided_slice %102 {offsets = [1, 1, 0, 0], sizes = [3, 3, 16, 128], strides = [1, 1, 1, 1]} : vector<4x4x16x128xbf16> to vector<3x3x16x128xbf16>
    %123 = vector.shape_cast %122 : vector<3x3x16x128xbf16> to vector<144x128xbf16>
    %c1_66 = arith.constant 1 : index
    %c1_67 = arith.constant 1 : index
    %c0_68 = arith.constant 0 : index
    %c0_69 = arith.constant 0 : index
    %124 = vector.load %arg4[%c1_66, %c1_67, %c0_68, %c0_69] : memref<2x2x128x128xbf16, #tpu.memory_space<vmem>>, vector<1x1x128x128xbf16>
    %125 = vector.shape_cast %124 : vector<1x1x128x128xbf16> to vector<128x128xbf16>
    %cst_70 = arith.constant dense<0.000000e+00> : vector<144x128xf32>
    %126 = tpu.matmul %123, %125, %cst_70 {dimension_numbers = #tpu.dot_dimension_numbers<[1], [0], [0], [1], [0, 0, 1, 1], [], []>} : vector<144x128xbf16>, vector<128x128xbf16>, vector<144x128xf32> -> vector<144x128xf32>
    %127 = arith.addf %121, %126 : vector<144x128xf32>
    %c0_71 = arith.constant 0 : index
    %c0_72 = arith.constant 0 : index
    %128 = vector.load %arg5[%c0_71, %c0_72] : memref<1x128xf32, #tpu.memory_space<vmem>>, vector<1x128xf32>
    %129 = vector.broadcast %128 : vector<1x128xf32> to vector<144x128xf32>
    %130 = arith.addf %127, %129 : vector<144x128xf32>
    %cst_73 = arith.constant 0.000000e+00 : f32
    %131 = vector.broadcast %cst_73 : f32 to vector<144x128xf32>
    %132 = arith.maximumf %130, %131 : vector<144x128xf32>
    %133 = arith.truncf %132 : vector<144x128xf32> to vector<144x128xbf16>
    %134 = vector.shape_cast %133 : vector<144x128xbf16> to vector<3x3x16x128xbf16>
    %cst_74 = arith.constant 0.000000e+00 : f32
    %135 = vector.broadcast %cst_74 : f32 to vector<16x128xf32>
    %136 = vector.extract_strided_slice %134 {offsets = [0, 0, 0, 0], sizes = [1, 1, 16, 128], strides = [1, 1, 1, 1]} : vector<3x3x16x128xbf16> to vector<1x1x16x128xbf16>
    %137 = vector.shape_cast %136 : vector<1x1x16x128xbf16> to vector<16x128xbf16>
    %c0_75 = arith.constant 0 : index
    %c0_76 = arith.constant 0 : index
    %c0_77 = arith.constant 0 : index
    %c0_78 = arith.constant 0 : index
    %138 = vector.load %arg6[%c0_75, %c0_76, %c0_77, %c0_78] : memref<3x3x128x128xbf16, #tpu.memory_space<vmem>>, vector<1x1x128x128xbf16>
    %139 = vector.shape_cast %138 : vector<1x1x128x128xbf16> to vector<128x128xbf16>
    %cst_79 = arith.constant dense<0.000000e+00> : vector<16x128xf32>
    %140 = tpu.matmul %137, %139, %cst_79 {dimension_numbers = #tpu.dot_dimension_numbers<[1], [0], [0], [1], [0, 0, 1, 1], [], []>} : vector<16x128xbf16>, vector<128x128xbf16>, vector<16x128xf32> -> vector<16x128xf32>
    %141 = arith.addf %135, %140 : vector<16x128xf32>
    %142 = vector.extract_strided_slice %134 {offsets = [0, 1, 0, 0], sizes = [1, 1, 16, 128], strides = [1, 1, 1, 1]} : vector<3x3x16x128xbf16> to vector<1x1x16x128xbf16>
    %143 = vector.shape_cast %142 : vector<1x1x16x128xbf16> to vector<16x128xbf16>
    %c0_80 = arith.constant 0 : index
    %c1_81 = arith.constant 1 : index
    %c0_82 = arith.constant 0 : index
    %c0_83 = arith.constant 0 : index
    %144 = vector.load %arg6[%c0_80, %c1_81, %c0_82, %c0_83] : memref<3x3x128x128xbf16, #tpu.memory_space<vmem>>, vector<1x1x128x128xbf16>
    %145 = vector.shape_cast %144 : vector<1x1x128x128xbf16> to vector<128x128xbf16>
    %cst_84 = arith.constant dense<0.000000e+00> : vector<16x128xf32>
    %146 = tpu.matmul %143, %145, %cst_84 {dimension_numbers = #tpu.dot_dimension_numbers<[1], [0], [0], [1], [0, 0, 1, 1], [], []>} : vector<16x128xbf16>, vector<128x128xbf16>, vector<16x128xf32> -> vector<16x128xf32>
    %147 = arith.addf %141, %146 : vector<16x128xf32>
    %148 = vector.extract_strided_slice %134 {offsets = [0, 2, 0, 0], sizes = [1, 1, 16, 128], strides = [1, 1, 1, 1]} : vector<3x3x16x128xbf16> to vector<1x1x16x128xbf16>
    %149 = vector.shape_cast %148 : vector<1x1x16x128xbf16> to vector<16x128xbf16>
    %c0_85 = arith.constant 0 : index
    %c2_86 = arith.constant 2 : index
    %c0_87 = arith.constant 0 : index
    %c0_88 = arith.constant 0 : index
    %150 = vector.load %arg6[%c0_85, %c2_86, %c0_87, %c0_88] : memref<3x3x128x128xbf16, #tpu.memory_space<vmem>>, vector<1x1x128x128xbf16>
    %151 = vector.shape_cast %150 : vector<1x1x128x128xbf16> to vector<128x128xbf16>
    %cst_89 = arith.constant dense<0.000000e+00> : vector<16x128xf32>
    %152 = tpu.matmul %149, %151, %cst_89 {dimension_numbers = #tpu.dot_dimension_numbers<[1], [0], [0], [1], [0, 0, 1, 1], [], []>} : vector<16x128xbf16>, vector<128x128xbf16>, vector<16x128xf32> -> vector<16x128xf32>
    %153 = arith.addf %147, %152 : vector<16x128xf32>
    %154 = vector.extract_strided_slice %134 {offsets = [1, 0, 0, 0], sizes = [1, 1, 16, 128], strides = [1, 1, 1, 1]} : vector<3x3x16x128xbf16> to vector<1x1x16x128xbf16>
    %155 = vector.shape_cast %154 : vector<1x1x16x128xbf16> to vector<16x128xbf16>
    %c1_90 = arith.constant 1 : index
    %c0_91 = arith.constant 0 : index
    %c0_92 = arith.constant 0 : index
    %c0_93 = arith.constant 0 : index
    %156 = vector.load %arg6[%c1_90, %c0_91, %c0_92, %c0_93] : memref<3x3x128x128xbf16, #tpu.memory_space<vmem>>, vector<1x1x128x128xbf16>
    %157 = vector.shape_cast %156 : vector<1x1x128x128xbf16> to vector<128x128xbf16>
    %cst_94 = arith.constant dense<0.000000e+00> : vector<16x128xf32>
    %158 = tpu.matmul %155, %157, %cst_94 {dimension_numbers = #tpu.dot_dimension_numbers<[1], [0], [0], [1], [0, 0, 1, 1], [], []>} : vector<16x128xbf16>, vector<128x128xbf16>, vector<16x128xf32> -> vector<16x128xf32>
    %159 = arith.addf %153, %158 : vector<16x128xf32>
    %160 = vector.extract_strided_slice %134 {offsets = [1, 1, 0, 0], sizes = [1, 1, 16, 128], strides = [1, 1, 1, 1]} : vector<3x3x16x128xbf16> to vector<1x1x16x128xbf16>
    %161 = vector.shape_cast %160 : vector<1x1x16x128xbf16> to vector<16x128xbf16>
    %c1_95 = arith.constant 1 : index
    %c1_96 = arith.constant 1 : index
    %c0_97 = arith.constant 0 : index
    %c0_98 = arith.constant 0 : index
    %162 = vector.load %arg6[%c1_95, %c1_96, %c0_97, %c0_98] : memref<3x3x128x128xbf16, #tpu.memory_space<vmem>>, vector<1x1x128x128xbf16>
    %163 = vector.shape_cast %162 : vector<1x1x128x128xbf16> to vector<128x128xbf16>
    %cst_99 = arith.constant dense<0.000000e+00> : vector<16x128xf32>
    %164 = tpu.matmul %161, %163, %cst_99 {dimension_numbers = #tpu.dot_dimension_numbers<[1], [0], [0], [1], [0, 0, 1, 1], [], []>} : vector<16x128xbf16>, vector<128x128xbf16>, vector<16x128xf32> -> vector<16x128xf32>
    %165 = arith.addf %159, %164 : vector<16x128xf32>
    %166 = vector.extract_strided_slice %134 {offsets = [1, 2, 0, 0], sizes = [1, 1, 16, 128], strides = [1, 1, 1, 1]} : vector<3x3x16x128xbf16> to vector<1x1x16x128xbf16>
    %167 = vector.shape_cast %166 : vector<1x1x16x128xbf16> to vector<16x128xbf16>
    %c1_100 = arith.constant 1 : index
    %c2_101 = arith.constant 2 : index
    %c0_102 = arith.constant 0 : index
    %c0_103 = arith.constant 0 : index
    %168 = vector.load %arg6[%c1_100, %c2_101, %c0_102, %c0_103] : memref<3x3x128x128xbf16, #tpu.memory_space<vmem>>, vector<1x1x128x128xbf16>
    %169 = vector.shape_cast %168 : vector<1x1x128x128xbf16> to vector<128x128xbf16>
    %cst_104 = arith.constant dense<0.000000e+00> : vector<16x128xf32>
    %170 = tpu.matmul %167, %169, %cst_104 {dimension_numbers = #tpu.dot_dimension_numbers<[1], [0], [0], [1], [0, 0, 1, 1], [], []>} : vector<16x128xbf16>, vector<128x128xbf16>, vector<16x128xf32> -> vector<16x128xf32>
    %171 = arith.addf %165, %170 : vector<16x128xf32>
    %172 = vector.extract_strided_slice %134 {offsets = [2, 0, 0, 0], sizes = [1, 1, 16, 128], strides = [1, 1, 1, 1]} : vector<3x3x16x128xbf16> to vector<1x1x16x128xbf16>
    %173 = vector.shape_cast %172 : vector<1x1x16x128xbf16> to vector<16x128xbf16>
    %c2_105 = arith.constant 2 : index
    %c0_106 = arith.constant 0 : index
    %c0_107 = arith.constant 0 : index
    %c0_108 = arith.constant 0 : index
    %174 = vector.load %arg6[%c2_105, %c0_106, %c0_107, %c0_108] : memref<3x3x128x128xbf16, #tpu.memory_space<vmem>>, vector<1x1x128x128xbf16>
    %175 = vector.shape_cast %174 : vector<1x1x128x128xbf16> to vector<128x128xbf16>
    %cst_109 = arith.constant dense<0.000000e+00> : vector<16x128xf32>
    %176 = tpu.matmul %173, %175, %cst_109 {dimension_numbers = #tpu.dot_dimension_numbers<[1], [0], [0], [1], [0, 0, 1, 1], [], []>} : vector<16x128xbf16>, vector<128x128xbf16>, vector<16x128xf32> -> vector<16x128xf32>
    %177 = arith.addf %171, %176 : vector<16x128xf32>
    %178 = vector.extract_strided_slice %134 {offsets = [2, 1, 0, 0], sizes = [1, 1, 16, 128], strides = [1, 1, 1, 1]} : vector<3x3x16x128xbf16> to vector<1x1x16x128xbf16>
    %179 = vector.shape_cast %178 : vector<1x1x16x128xbf16> to vector<16x128xbf16>
    %c2_110 = arith.constant 2 : index
    %c1_111 = arith.constant 1 : index
    %c0_112 = arith.constant 0 : index
    %c0_113 = arith.constant 0 : index
    %180 = vector.load %arg6[%c2_110, %c1_111, %c0_112, %c0_113] : memref<3x3x128x128xbf16, #tpu.memory_space<vmem>>, vector<1x1x128x128xbf16>
    %181 = vector.shape_cast %180 : vector<1x1x128x128xbf16> to vector<128x128xbf16>
    %cst_114 = arith.constant dense<0.000000e+00> : vector<16x128xf32>
    %182 = tpu.matmul %179, %181, %cst_114 {dimension_numbers = #tpu.dot_dimension_numbers<[1], [0], [0], [1], [0, 0, 1, 1], [], []>} : vector<16x128xbf16>, vector<128x128xbf16>, vector<16x128xf32> -> vector<16x128xf32>
    %183 = arith.addf %177, %182 : vector<16x128xf32>
    %184 = vector.extract_strided_slice %134 {offsets = [2, 2, 0, 0], sizes = [1, 1, 16, 128], strides = [1, 1, 1, 1]} : vector<3x3x16x128xbf16> to vector<1x1x16x128xbf16>
    %185 = vector.shape_cast %184 : vector<1x1x16x128xbf16> to vector<16x128xbf16>
    %c2_115 = arith.constant 2 : index
    %c2_116 = arith.constant 2 : index
    %c0_117 = arith.constant 0 : index
    %c0_118 = arith.constant 0 : index
    %186 = vector.load %arg6[%c2_115, %c2_116, %c0_117, %c0_118] : memref<3x3x128x128xbf16, #tpu.memory_space<vmem>>, vector<1x1x128x128xbf16>
    %187 = vector.shape_cast %186 : vector<1x1x128x128xbf16> to vector<128x128xbf16>
    %cst_119 = arith.constant dense<0.000000e+00> : vector<16x128xf32>
    %188 = tpu.matmul %185, %187, %cst_119 {dimension_numbers = #tpu.dot_dimension_numbers<[1], [0], [0], [1], [0, 0, 1, 1], [], []>} : vector<16x128xbf16>, vector<128x128xbf16>, vector<16x128xf32> -> vector<16x128xf32>
    %189 = arith.addf %183, %188 : vector<16x128xf32>
    %c0_120 = arith.constant 0 : index
    %c0_121 = arith.constant 0 : index
    %190 = vector.load %arg7[%c0_120, %c0_121] : memref<1x128xf32, #tpu.memory_space<vmem>>, vector<1x128xf32>
    %191 = vector.broadcast %190 : vector<1x128xf32> to vector<16x128xf32>
    %192 = arith.addf %189, %191 : vector<16x128xf32>
    %cst_122 = arith.constant 0.000000e+00 : f32
    %193 = vector.broadcast %cst_122 : f32 to vector<16x128xf32>
    %194 = arith.maximumf %192, %193 : vector<16x128xf32>
    %195 = arith.truncf %194 : vector<16x128xf32> to vector<16x128xbf16>
    %c0_123 = arith.constant 0 : index
    %c0_124 = arith.constant 0 : index
    %196 = vector.load %arg8[%c0_123, %c0_124] : memref<128x512xbf16, #tpu.memory_space<vmem>>, vector<128x512xbf16>
    %cst_125 = arith.constant dense<0.000000e+00> : vector<16x512xf32>
    %197 = tpu.matmul %195, %196, %cst_125 {dimension_numbers = #tpu.dot_dimension_numbers<[1], [0], [0], [1], [0, 0, 1, 1], [], []>} : vector<16x128xbf16>, vector<128x512xbf16>, vector<16x512xf32> -> vector<16x512xf32>
    %c0_126 = arith.constant 0 : index
    %c0_127 = arith.constant 0 : index
    %198 = vector.load %arg9[%c0_126, %c0_127] : memref<1x512xf32, #tpu.memory_space<vmem>>, vector<1x512xf32>
    %199 = vector.broadcast %198 : vector<1x512xf32> to vector<16x512xf32>
    %200 = arith.addf %197, %199 : vector<16x512xf32>
    %cst_128 = arith.constant 0.000000e+00 : f32
    %201 = vector.broadcast %cst_128 : f32 to vector<16x512xf32>
    %202 = arith.maximumf %200, %201 : vector<16x512xf32>
    %203 = arith.truncf %202 : vector<16x512xf32> to vector<16x512xbf16>
    %c0_129 = arith.constant 0 : index
    %c0_130 = arith.constant 0 : index
    %204 = vector.load %arg10[%c0_129, %c0_130] : memref<512x128xbf16, #tpu.memory_space<vmem>>, vector<512x128xbf16>
    %cst_131 = arith.constant dense<0.000000e+00> : vector<16x128xf32>
    %205 = tpu.matmul %203, %204, %cst_131 {dimension_numbers = #tpu.dot_dimension_numbers<[1], [0], [0], [1], [0, 0, 1, 1], [], []>} : vector<16x512xbf16>, vector<512x128xbf16>, vector<16x128xf32> -> vector<16x128xf32>
    %c0_132 = arith.constant 0 : index
    %c0_133 = arith.constant 0 : index
    %206 = vector.load %arg11[%c0_132, %c0_133] : memref<1x128xf32, #tpu.memory_space<vmem>>, vector<1x128xf32>
    %207 = vector.broadcast %206 : vector<1x128xf32> to vector<16x128xf32>
    %208 = arith.addf %205, %207 : vector<16x128xf32>
    %c0_134 = arith.constant 0 : index
    %c0_135 = arith.constant 0 : index
    %209 = vector.load %arg12[%c0_134, %c0_135] : memref<16x128xf32, #tpu.memory_space<vmem>>, vector<16x128xf32>
    tpu.vector_store %arg12[%c0_134, %c0_135], %208 {strides = array<i32>} : memref<16x128xf32, #tpu.memory_space<vmem>>, vector<16x128xf32>,
    return
  }
  func.func @transform_0(%arg0: i32) -> (i32, i32, i32, i32, i32) {
    %c0_i32 = arith.constant 0 : i32
    %c0_i32_0 = arith.constant 0 : i32
    %c0_i32_1 = arith.constant 0 : i32
    %c0_i32_2 = arith.constant 0 : i32
    %c0_i32_3 = arith.constant 0 : i32
    return %arg0, %c0_i32, %c0_i32_0, %c0_i32_1, %c0_i32_2 : i32, i32, i32, i32, i32
  }
  func.func @transform_1(%arg0: i32) -> (i32, i32, i32, i32) {
    %c0_i32 = arith.constant 0 : i32
    %c0_i32_0 = arith.constant 0 : i32
    %c0_i32_1 = arith.constant 0 : i32
    %c0_i32_2 = arith.constant 0 : i32
    %c0_i32_3 = arith.constant 0 : i32
    return %c0_i32, %c0_i32_0, %c0_i32_1, %c0_i32_2 : i32, i32, i32, i32
  }
  func.func @transform_2(%arg0: i32) -> (i32, i32) {
    %c0_i32 = arith.constant 0 : i32
    %c0_i32_0 = arith.constant 0 : i32
    %c0_i32_1 = arith.constant 0 : i32
    return %c0_i32, %c0_i32_0 : i32, i32
  }
  func.func @transform_3(%arg0: i32) -> (i32, i32, i32, i32) {
    %c0_i32 = arith.constant 0 : i32
    %c0_i32_0 = arith.constant 0 : i32
    %c0_i32_1 = arith.constant 0 : i32
    %c0_i32_2 = arith.constant 0 : i32
    %c0_i32_3 = arith.constant 0 : i32
    return %c0_i32, %c0_i32_0, %c0_i32_1, %c0_i32_2 : i32, i32, i32, i32
  }
  func.func @transform_4(%arg0: i32) -> (i32, i32) {
    %c0_i32 = arith.constant 0 : i32
    %c0_i32_0 = arith.constant 0 : i32
    %c0_i32_1 = arith.constant 0 : i32
    return %c0_i32, %c0_i32_0 : i32, i32
  }
  func.func @transform_5(%arg0: i32) -> (i32, i32, i32, i32) {
    %c0_i32 = arith.constant 0 : i32
    %c0_i32_0 = arith.constant 0 : i32
    %c0_i32_1 = arith.constant 0 : i32
    %c0_i32_2 = arith.constant 0 : i32
    %c0_i32_3 = arith.constant 0 : i32
    return %c0_i32, %c0_i32_0, %c0_i32_1, %c0_i32_2 : i32, i32, i32, i32
  }
  func.func @transform_6(%arg0: i32) -> (i32, i32) {
    %c0_i32 = arith.constant 0 : i32
    %c0_i32_0 = arith.constant 0 : i32
    %c0_i32_1 = arith.constant 0 : i32
    return %c0_i32, %c0_i32_0 : i32, i32
  }
  func.func @transform_7(%arg0: i32) -> (i32, i32) {
    %c0_i32 = arith.constant 0 : i32
    %c0_i32_0 = arith.constant 0 : i32
    %c0_i32_1 = arith.constant 0 : i32
    return %c0_i32, %c0_i32_0 : i32, i32
  }
  func.func @transform_8(%arg0: i32) -> (i32, i32) {
    %c0_i32 = arith.constant 0 : i32
    %c0_i32_0 = arith.constant 0 : i32
    %c0_i32_1 = arith.constant 0 : i32
    return %c0_i32, %c0_i32_0 : i32, i32
  }
  func.func @transform_9(%arg0: i32) -> (i32, i32) {
    %c0_i32 = arith.constant 0 : i32
    %c0_i32_0 = arith.constant 0 : i32
    %c0_i32_1 = arith.constant 0 : i32
    return %c0_i32, %c0_i32_0 : i32, i32
  }
  func.func @transform_10(%arg0: i32) -> (i32, i32) {
    %c0_i32 = arith.constant 0 : i32
    %c0_i32_0 = arith.constant 0 : i32
    %c0_i32_1 = arith.constant 0 : i32
    return %c0_i32, %c0_i32_0 : i32, i32
  }
  func.func @transform_11(%arg0: i32) -> (i32, i32) {
    %c0_i32 = arith.constant 0 : i32
    %c0_i32_0 = arith.constant 0 : i32
    return %arg0, %c0_i32 : i32, i32
  }
}

</mosaic_0001>

<bundles_post_ra>
// kernel: qnet_forward.1
= control target key start
LH: loop header
LB: loop body
LE: loop exit
PB: predicated region body
PF: predicated region fallthrough
CT: control target
= control target key end

     0   :  { %s8156_s1 = inlined_call_operand.vmem [shape: bf16[3,3,128,128], index: 1, kind: input, shape index: {}]   ;;  %s8157_s0 = inlined_call_operand.vmem [shape: bf16[1,9,9,16,128], index: 0, kind: input, shape index: {}]   ;;  %s8158_s3 = inlined_call_operand.vmem [shape: bf16[2,2,128,128], index: 3, kind: input, shape index: {}]   ;;  %s8159_s2 = inlined_call_operand.vmem [shape: f32[1,128], index: 2, kind: input, shape index: {}]   ;;  %s8160_s5 = inlined_call_operand.vmem [shape: bf16[3,3,128,128], index: 5, kind: input, shape index: {}]   ;;  %s8161_s4 = inlined_call_operand.vmem [shape: f32[1,128], index: 4, kind: input, shape index: {}]   ;;  %s8162_s7 = inlined_call_operand.vmem [shape: bf16[128,512], index: 7, kind: input, shape index: {}]   ;;  %s8163_s6 = inlined_call_operand.vmem [shape: f32[1,128], index: 6, kind: input, shape index: {}]   ;;  %s8164_s9 = inlined_call_operand.vmem [shape: bf16[512,128], index: 9, kind: input, shape index: {}]   ;;  %s8165_s8 = inlined_call_operand.vmem [shape: f32[1,512], index: 8, kind: input, shape index: {}]   ;;  %s8166_s10 = inlined_call_operand.vmem [shape: f32[1,128], index: 10, kind: input, shape index: {}]   ;;  %s8167_s11 = inlined_call_operand.vmem [shape: f32[16,128], index: 11, kind: output, shape index: {}]  }
   0x1   :  { %v6123_v0 = vld [vmem:[%s8156_s1 + $0x78] sm:$0xff]  ;;  %v6122_v4 = vld [vmem:[%s8156_s1 + $0x70] sm:$0xff]  ;;  %v6121_v8 = vld [vmem:[%s8156_s1 + $0x68] sm:$0xff] }
   0x2   :  { %v6115_v1 = vld [vmem:[%s8156_s1 + $0x38] sm:$0xff]  ;;  %377 = vmatpush.bf16.msra.mxu0 %v6123_v0  ;;  %v6114_v5 = vld [vmem:[%s8156_s1 + $0x30] sm:$0xff]  ;;  %v6113_v9 = vld [vmem:[%s8156_s1 + $0x28] sm:$0xff] }
   0x3   :  { %v6131_v2 = vld [vmem:[%s8156_s1 + $0xb8] sm:$0xff]  ;;  %610 = vmatpush.bf16.msra.mxu1 %v6115_v1  ;;  %v6130_v6 = vld [vmem:[%s8156_s1 + $0xb0] sm:$0xff]  ;;  %v6129_v10 = vld [vmem:[%s8156_s1 + $0xa8] sm:$0xff] }
   0x4   :  { %v6139_v3 = vld [vmem:[%s8156_s1 + $0xf8] sm:$0xff]  ;;  %788 = vmatpush.bf16.msra.mxu2 %v6131_v2  ;;  %v6138_v7 = vld [vmem:[%s8156_s1 + $0xf0] sm:$0xff]  ;;  %v6137_v11 = vld [vmem:[%s8156_s1 + $0xe8] sm:$0xff] }
   0x5   :  { %1070 = vmatpush.bf16.msra.mxu3 %v6139_v3  ;;  %v6120_v12 = vld [vmem:[%s8156_s1 + $0x60] sm:$0xff]  ;;  %v6119_v16 = vld [vmem:[%s8156_s1 + $0x58] sm:$0xff]  ;;  %v6118_v20 = vld [vmem:[%s8156_s1 + $0x50] sm:$0xff] }
   0x6   :  { %378 = vmatpush.bf16.msra.mxu0 %v6122_v4  ;;  %v6112_v13 = vld [vmem:[%s8156_s1 + $0x20] sm:$0xff]  ;;  %v6111_v17 = vld [vmem:[%s8156_s1 + $0x18] sm:$0xff]  ;;  %v6110_v21 = vld [vmem:[%s8156_s1 + $0x10] sm:$0xff] }
   0x7   :  { %611 = vmatpush.bf16.msra.mxu1 %v6114_v5  ;;  %v6128_v14 = vld [vmem:[%s8156_s1 + $0xa0] sm:$0xff]  ;;  %v6127_v18 = vld [vmem:[%s8156_s1 + $0x98] sm:$0xff]  ;;  %v6126_v22 = vld [vmem:[%s8156_s1 + $0x90] sm:$0xff] }
   0x8   :  { %789 = vmatpush.bf16.msra.mxu2 %v6130_v6  ;;  %v6136_v15 = vld [vmem:[%s8156_s1 + $0xe0] sm:$0xff]  ;;  %v6135_v19 = vld [vmem:[%s8156_s1 + $0xd8] sm:$0xff]  ;;  %v6134_v23 = vld [vmem:[%s8156_s1 + $0xd0] sm:$0xff] }
   0x9   :  { %1071 = vmatpush.bf16.msra.mxu3 %v6138_v7  ;;  %v6117_v24 = vld [vmem:[%s8156_s1 + $0x48] sm:$0xff]  ;;  %v6116_v28 = vld [vmem:[%s8156_s1 + $0x40] sm:$0xff]  ;;  %v6147_v32 = vld [vmem:[%s8156_s1 + $0x138] sm:$0xff] }
   0xa   :  { %379 = vmatpush.bf16.msra.mxu0 %v6121_v8  ;;  %v6109_v25 = vld [vmem:[%s8156_s1 + $0x8] sm:$0xff]  ;;  %v6108_v29 = vld [vmem:[%s8156_s1] sm:$0xff]  ;;  %v6029_v35 = vld [vmem:[%s8157_s0 + $0x10] sm:$0xff] }
   0xb   :  { %612 = vmatpush.bf16.msra.mxu1 %v6113_v9  ;;  %v6125_v26 = vld [vmem:[%s8156_s1 + $0x88] sm:$0xff]  ;;  %v6124_v30 = vld [vmem:[%s8156_s1 + $0x80] sm:$0xff]  ;;  %v6146_v37 = vld [vmem:[%s8156_s1 + $0x130] sm:$0xff] }
   0xc   :  { %790 = vmatpush.bf16.msra.mxu2 %v6129_v10  ;;  %v6133_v27 = vld [vmem:[%s8156_s1 + $0xc8] sm:$0xff]  ;;  %v6132_v31 = vld [vmem:[%s8156_s1 + $0xc0] sm:$0xff]  ;;  %v6030_v38 = vld [vmem:[%s8157_s0 + $0x18] sm:$0xff] }
   0xd   :  { %1072 = vmatpush.bf16.msra.mxu3 %v6137_v11  ;;  %v6028_v33 = vld [vmem:[%s8157_s0 + $0x8] sm:$0xff]  ;;  %v6027_v34 = vld [vmem:[%s8157_s0] sm:$0xff]  ;;  %v6545_v40 = vld [vmem:[%s8157_s0 + $0x58] sm:$0xff] }
   0xe   :  { %380 = vmatpush.bf16.msra.mxu0 %v6120_v12  ;;  %v6036_v36 = vld [vmem:[%s8157_s0 + $0x48] sm:$0xff]  ;;  %v6031_v39 = vld [vmem:[%s8157_s0 + $0x20] sm:$0xff]  ;;  %v6033_v42 = vld [vmem:[%s8157_s0 + $0x30] sm:$0xff] }
   0xf   :  { %613 = vmatpush.bf16.msra.mxu1 %v6112_v13  ;;  %v6032_v41 = vld [vmem:[%s8157_s0 + $0x28] sm:$0xff]  ;;  %v6034_v45 = vld [vmem:[%s8157_s0 + $0x38] sm:$0xff]  ;;  %v6035_v46 = vld [vmem:[%s8157_s0 + $0x40] sm:$0xff] }
  0x10   :  { %791 = vmatpush.bf16.msra.mxu2 %v6128_v14  ;;  %v6557_v43 = vld [vmem:[%s8157_s0 + $0x68] sm:$0xff]  ;;  %v6572_v47 = vld [vmem:[%s8157_s0 + $0x78] sm:$0xff]  ;;  %v6583_v49 = vld [vmem:[%s8157_s0 + $0x90] sm:$0xff] }
  0x11   :  { %1073 = vmatpush.bf16.msra.mxu3 %v6136_v15  ;;  %v6145_v44 = vld [vmem:[%s8156_s1 + $0x128] sm:$0xff]  ;;  %v6578_v48 = vld [vmem:[%s8157_s0 + $0x98] sm:$0xff]  ;;  %v6588_v50 = vld [vmem:[%s8157_s0 + $0xa0] sm:$0xff] }
  0x12   :  { %381 = vmatpush.bf16.msra.mxu0 %v6119_v16  ;;  %v6054_v51 = vld [vmem:[%s8157_s0 + $0xd8] sm:$0xff]  ;;  %v6144_v52 = vld [vmem:[%s8156_s1 + $0x120] sm:$0xff]  ;;  %v6602_v53 = vld [vmem:[%s8157_s0 + $0xa8] sm:$0xff] }
  0x13   :  { %614 = vmatpush.bf16.msra.mxu1 %v6111_v17  ;;  %v6607_v54 = vld [vmem:[%s8157_s0 + $0xb0] sm:$0xff]  ;;  %v6612_v55 = vld [vmem:[%s8157_s0 + $0xe8] sm:$0xff]  ;;  %v6621_v56 = vld [vmem:[%s8157_s0 + $0xb8] sm:$0xff] }
  0x14   :  { %792 = vmatpush.bf16.msra.mxu2 %v6127_v18  ;;  %v6626_v57 = vld [vmem:[%s8157_s0 + $0xc0] sm:$0xff]  ;;  %v6631_v58 = vld [vmem:[%s8157_s0 + $0xf8] sm:$0xff]  ;;  %v6643_v60 = vld [vmem:[%s8157_s0 + $0xc8] sm:$0xff] }
  0x15   :  { %1074 = vmatpush.bf16.msra.mxu3 %v6135_v19  ;;  %v6143_v59 = vld [vmem:[%s8156_s1 + $0x118] sm:$0xff]  ;;  %v6053_v61 = vld [vmem:[%s8157_s0 + $0xd0] sm:$0xff]  ;;  %v6651_v62 = vld [vmem:[%s8157_s0 + $0x108] sm:$0xff] }
  0x16   :  { %382 = vmatpush.bf16.msra.mxu0 %v6118_v20  ;;  %v6659_v63 = vld [vmem:[%s8157_s0 + $0x128] sm:$0xff]  ;;  %v6664_v0 = vld [vmem:[%s8157_s0 + $0x120] sm:$0xff]  ;;  %v6669_v3 = vld [vmem:[%s8157_s0 + $0x130] sm:$0xff] }
  0x17   :  { %615 = vmatpush.bf16.msra.mxu1 %v6110_v21  ;;  %v6072_v4 = vld [vmem:[%s8157_s0 + $0x168] sm:$0xff]  ;;  %v6142_v6 = vld [vmem:[%s8156_s1 + $0x110] sm:$0xff]  ;;  %v6685_v16 = vld [vmem:[%s8157_s0 + $0x138] sm:$0xff] }
  0x18   :  { %793 = vmatpush.bf16.msra.mxu2 %v6126_v22  ;;  %v6690_v20 = vld [vmem:[%s8157_s0 + $0x140] sm:$0xff]  ;;  %v6695_v21 = vld [vmem:[%s8157_s0 + $0x178] sm:$0xff] }
  0x19   :  { %1075 = vmatpush.bf16.msra.mxu3 %v6134_v23 }
  0x1a   :  { %383 = vmatpush.bf16.msra.mxu0 %v6117_v24 }
  0x1b   :  { %616 = vmatpush.bf16.msra.mxu1 %v6109_v25 }
  0x1c   :  { %794 = vmatpush.bf16.msra.mxu2 %v6125_v26 }
  0x1d   :  { %1076 = vmatpush.bf16.msra.mxu3 %v6133_v27 }
  0x1e   :  { %384 = vmatpush.bf16.msra.mxu0 %v6116_v28 }
  0x1f   :  { %617 = vmatpush.bf16.msra.mxu1 %v6108_v29 }
  0x20   :  { %795 = vmatpush.bf16.msra.mxu2 %v6124_v30 }
  0x21   :  { %1077 = vmatpush.bf16.msra.mxu3 %v6132_v31  ;;  %385 = vmatmul.bf16.vlgmr.msra.gmra.mxu0 %v6028_v33  ;;  %v6708_v33 = vld [vmem:[%s8157_s0 + $0x148] sm:$0xff] }
  0x22   :  { %1352 = vmatpush.bf16.msrb.mxu0 %v6147_v32  ;;  %618 = vmatmul.bf16.vlgmr.msra.gmra.mxu1 %v6027_v34 }
  0x23   :  { %796 = vmatmul.bf16.vlgmr.msra.gmra.mxu2 %v6029_v35 }
  0x24   :  { %1078 = vmatmul.bf16.vlgmr.msra.gmra.mxu3 %v6036_v36 }
  0x26   :  { %1353 = vmatpush.bf16.msrb.mxu0 %v6146_v37  ;;  %v6713_v37 = vld [vmem:[%s8157_s0 + $0x150] sm:$0xff] }
  0x2a   :  { %1354 = vmatpush.bf16.msrb.mxu0 %v6145_v44  ;;  %v6155_v44 = vld [vmem:[%s8156_s1 + $0x178] sm:$0xff] }
  0x2b   :  { %1562 = vmatpush.bf16.msrb.mxu1 %v6155_v44  ;;  %v6140_v44 = vld [vmem:[%s8156_s1 + $0x100] sm:$0xff] }
  0x2e   :  { %1355 = vmatpush.bf16.msrb.mxu0 %v6144_v52 }
  0x31   :  { %390 = vmatmul.bf16.gmra.mxu0 %v6030_v38  ;;  %v6718_v38 = vld [vmem:[%s8157_s0 + $0x188] sm:$0xff] }
  0x32   :  { %623 = vmatmul.bf16.gmra.mxu1 %v6029_v35  ;;  %1356 = vmatpush.bf16.msrb.mxu0 %v6143_v59 }
  0x33   :  { %801 = vmatmul.bf16.gmra.mxu2 %v6031_v39 }
  0x34   :  { %1083 = vmatmul.bf16.gmra.mxu3 %v6545_v40 }
  0x36   :  { %1357 = vmatpush.bf16.msrb.mxu0 %v6142_v6 }
  0x41   :  { %395 = vmatmul.bf16.gmra.mxu0 %v6032_v41 }
  0x42   :  { %628 = vmatmul.bf16.gmra.mxu1 %v6031_v39 }
  0x43   :  { %806 = vmatmul.bf16.gmra.mxu2 %v6033_v42 }
  0x44   :  { %1088 = vmatmul.bf16.gmra.mxu3 %v6557_v43 }
  0x51   :  { %400 = vmatmul.bf16.gmra.mxu0 %v6034_v45 }
  0x52   :  { %633 = vmatmul.bf16.gmra.mxu1 %v6033_v42  ;;  %v6141_v42 = vld [vmem:[%s8156_s1 + $0x108] sm:$0xff] }
  0x53   :  { %811 = vmatmul.bf16.gmra.mxu2 %v6035_v46  ;;  %1358 = vmatpush.bf16.msrb.mxu0 %v6141_v42  ;;  %v6163_v42 = vld [vmem:[%s8156_s1 + $0x1b8] sm:$0xff] }
  0x54   :  { %1093 = vmatmul.bf16.gmra.mxu3 %v6572_v47  ;;  %1772 = vmatpush.bf16.msrb.mxu2 %v6163_v42 }
  0x57   :  { %1359 = vmatpush.bf16.msrb.mxu0 %v6140_v44  ;;  %v6159_v44 = vld [vmem:[%s8156_s1 + $0x198] sm:$0xff] }
  0x61   :  { %405 = vmatmul.bf16.gmra.mxu0 %v6578_v48 }
  0x62   :  { %638 = vmatmul.bf16.gmra.mxu1 %v6583_v49 }
  0x63   :  { %816 = vmatmul.bf16.gmra.mxu2 %v6588_v50 }
  0x64   :  { %1098 = vmatmul.bf16.gmra.mxu3 %v6054_v51 }
  0x71   :  { %410 = vmatmul.bf16.gmra.mxu0 %v6602_v53 }
  0x72   :  { %643 = vmatmul.bf16.gmra.mxu1 %v6588_v50 }
  0x73   :  { %821 = vmatmul.bf16.gmra.mxu2 %v6607_v54 }
  0x74   :  { %1103 = vmatmul.bf16.gmra.mxu3 %v6612_v55 }
  0x81   :  { %415 = vmatmul.bf16.gmra.mxu0 %v6621_v56 }
  0x82   :  { %648 = vmatmul.bf16.gmra.mxu1 %v6607_v54 }
  0x83   :  { %826 = vmatmul.bf16.gmra.mxu2 %v6626_v57 }
  0x84   :  { %1108 = vmatmul.bf16.gmra.mxu3 %v6631_v58 }
  0x91   :  { %420 = vmatmul.bf16.gmra.mxu0 %v6643_v60 }
  0x92   :  { %653 = vmatmul.bf16.gmra.mxu1 %v6626_v57 }
  0x93   :  { %831 = vmatmul.bf16.gmra.mxu2 %v6053_v61 }
  0x94   :  { %1113 = vmatmul.bf16.gmra.mxu3 %v6651_v62 }
  0x9e   :  { %v386_v1 = vpop.f32.mrf.mxu0 }
  0x9f   :  { %v619_v2 = vpop.f32.mrf.mxu1 }
  0xa0   :  { %v620_v5 = vadd.f32 %v619_v2, %v386_v1 }
  0xa1   :  { %425 = vmatmul.bf16.gmra.mxu0 %v6659_v63 }
  0xa2   :  { %658 = vmatmul.bf16.gmra.mxu1 %v6664_v0 }
  0xa3   :  { %836 = vmatmul.bf16.gmra.mxu2 %v6669_v3 }
  0xa4   :  { %1118 = vmatmul.bf16.gmra.mxu3 %v6072_v4 }
  0xa6   :  { %v797_v7 = vpop.f32.mrf.mxu2  ;;  %v388_v10 = vpop.f32.mrf.mxu0 }
  0xa7   :  { %v1079_v8 = vpop.f32.mrf.mxu3  ;;  %v877_v9 = vadd.f32 %v797_v7, %v620_v5  ;;  %v621_v11 = vpop.f32.mrf.mxu1  ;;  %v6737_v5 = vld [vmem:[%s8157_s0 + $0x158] sm:$0xff] }
  0xa8   :  { %v622_v12 = vadd.f32 %v621_v11, %v388_v10  ;;  %v6745_v10 = vld [vmem:[%s8157_s0 + $0x198] sm:$0xff] }
  0xa9   :  { %v6680_v13 = vadd.f32 %v1079_v8, %v877_v9  ;;  %v6071_v9 = vld [vmem:[%s8157_s0 + $0x160] sm:$0xff] }
  0xae   :  { %v799_v14 = vpop.f32.mrf.mxu2  ;;  %v391_v18 = vpop.f32.mrf.mxu0 }
  0xaf   :  { %v1081_v15 = vpop.f32.mrf.mxu3  ;;  %v878_v17 = vadd.f32 %v799_v14, %v622_v12  ;;  %v624_v19 = vpop.f32.mrf.mxu1 }
  0xb0   :  { %v625_v22 = vadd.f32 %v624_v19, %v391_v18 }
  0xb1   :  { %v6697_v23 = vadd.f32 %v1081_v15, %v878_v17  ;;  %430 = vmatmul.bf16.gmra.mxu0 %v6685_v16 }
  0xb2   :  { %663 = vmatmul.bf16.gmra.mxu1 %v6669_v3 }
  0xb3   :  { %841 = vmatmul.bf16.gmra.mxu2 %v6690_v20 }
  0xb4   :  { %1123 = vmatmul.bf16.gmra.mxu3 %v6695_v21 }
  0xb6   :  { %v802_v24 = vpop.f32.mrf.mxu2  ;;  %v393_v27 = vpop.f32.mrf.mxu0 }
  0xb7   :  { %v1084_v25 = vpop.f32.mrf.mxu3  ;;  %v879_v26 = vadd.f32 %v802_v24, %v625_v22  ;;  %v626_v28 = vpop.f32.mrf.mxu1 }
  0xb8   :  { %v627_v29 = vadd.f32 %v626_v28, %v393_v27  ;;  %v6757_v27 = vld [vmem:[%s8157_s0 + $0x1b8] sm:$0xff]  ;;  %v6762_v28 = vld [vmem:[%s8157_s0 + $0x1b0] sm:$0xff] }
  0xb9   :  { %v6703_v30 = vadd.f32 %v1084_v25, %v879_v26 }
  0xbe   :  { %v804_v31 = vpop.f32.mrf.mxu2  ;;  %v396_v35 = vpop.f32.mrf.mxu0 }
  0xbf   :  { %v1086_v32 = vpop.f32.mrf.mxu3  ;;  %v880_v34 = vadd.f32 %v804_v31, %v627_v29  ;;  %v629_v36 = vpop.f32.mrf.mxu1 }
  0xc0   :  { %v630_v39 = vadd.f32 %v629_v36, %v396_v35  ;;  %v6090_v35 = vld [vmem:[%s8157_s0 + $0x1f8] sm:$0xff] }
  0xc1   :  { %v6720_v41 = vadd.f32 %v1086_v32, %v880_v34  ;;  %435 = vmatmul.bf16.gmra.mxu0 %v6708_v33  ;;  %v6767_v34 = vld [vmem:[%s8157_s0 + $0x1c0] sm:$0xff] }
  0xc2   :  { %668 = vmatmul.bf16.gmra.mxu1 %v6690_v20 }
  0xc3   :  { %846 = vmatmul.bf16.gmra.mxu2 %v6713_v37 }
  0xc4   :  { %1128 = vmatmul.bf16.gmra.mxu3 %v6718_v38 }
  0xc6   :  { %v807_v45 = vpop.f32.mrf.mxu2  ;;  %v398_v52 = vpop.f32.mrf.mxu0 }
  0xc7   :  { %v1089_v46 = vpop.f32.mrf.mxu3  ;;  %v881_v51 = vadd.f32 %v807_v45, %v630_v39  ;;  %v631_v59 = vpop.f32.mrf.mxu1  ;;  %v6154_v45 = vld [vmem:[%s8156_s1 + $0x170] sm:$0xff] }
  0xc8   :  { %v632_v61 = vadd.f32 %v631_v59, %v398_v52  ;;  %1563 = vmatpush.bf16.msrb.mxu1 %v6154_v45  ;;  %v6162_v59 = vld [vmem:[%s8156_s1 + $0x1b0] sm:$0xff]  ;;  %v6151_v45 = vld [vmem:[%s8156_s1 + $0x158] sm:$0xff] }
  0xc9   :  { %v6732_v1 = vadd.f32 %v1089_v46, %v881_v51  ;;  %v6171_v46 = vld [vmem:[%s8156_s1 + $0x1f8] sm:$0xff]  ;;  %1773 = vmatpush.bf16.msrb.mxu2 %v6162_v59  ;;  %v6158_v59 = vld [vmem:[%s8156_s1 + $0x190] sm:$0xff] }
  0xca   :  { %1982 = vmatpush.bf16.msrb.mxu3 %v6171_v46  ;;  %v6167_v46 = vld [vmem:[%s8156_s1 + $0x1d8] sm:$0xff] }
  0xce   :  { %v809_v2 = vpop.f32.mrf.mxu2  ;;  %v401_v7 = vpop.f32.mrf.mxu0 }
  0xcf   :  { %v1091_v4 = vpop.f32.mrf.mxu3  ;;  %v882_v6 = vadd.f32 %v809_v2, %v632_v61  ;;  %v634_v8 = vpop.f32.mrf.mxu1 }
  0xd0   :  { %v635_v11 = vadd.f32 %v634_v8, %v401_v7  ;;  %v6170_v7 = vld [vmem:[%s8156_s1 + $0x1f0] sm:$0xff] }
  0xd1   :  { %v6747_v12 = vadd.f32 %v1091_v4, %v882_v6  ;;  %440 = vmatmul.bf16.gmra.mxu0 %v6737_v5  ;;  %1983 = vmatpush.bf16.msrb.mxu3 %v6170_v7  ;;  %v6150_v7 = vld [vmem:[%s8156_s1 + $0x150] sm:$0xff] }
  0xd2   :  { %673 = vmatmul.bf16.gmra.mxu1 %v6713_v37 }
  0xd3   :  { %851 = vmatmul.bf16.gmra.mxu2 %v6071_v9  ;;  %v6161_v9 = vld [vmem:[%s8156_s1 + $0x1a8] sm:$0xff] }
  0xd4   :  { %1133 = vmatmul.bf16.gmra.mxu3 %v6745_v10  ;;  %1774 = vmatpush.bf16.msrb.mxu2 %v6161_v9  ;;  %v6166_v9 = vld [vmem:[%s8156_s1 + $0x1d0] sm:$0xff] }
  0xd6   :  { %v812_v14 = vpop.f32.mrf.mxu2  ;;  %v403_v18 = vpop.f32.mrf.mxu0 }
  0xd7   :  { %v1094_v15 = vpop.f32.mrf.mxu3  ;;  %v883_v17 = vadd.f32 %v812_v14, %v635_v11  ;;  %v636_v19 = vpop.f32.mrf.mxu1  ;;  %v6153_v11 = vld [vmem:[%s8156_s1 + $0x168] sm:$0xff] }
  0xd8   :  { %v637_v22 = vadd.f32 %v636_v19, %v403_v18  ;;  %v6169_v14 = vld [vmem:[%s8156_s1 + $0x1e8] sm:$0xff]  ;;  %1564 = vmatpush.bf16.msrb.mxu1 %v6153_v11  ;;  %v6160_v19 = vld [vmem:[%s8156_s1 + $0x1a0] sm:$0xff] }
  0xd9   :  { %v6752_v24 = vadd.f32 %v1094_v15, %v883_v17  ;;  %v6809_v18 = vld [vmem:[%s8157_s0 + $0x1c8] sm:$0xff]  ;;  %1984 = vmatpush.bf16.msrb.mxu3 %v6169_v14  ;;  %1775 = vmatpush.bf16.msrb.mxu2 %v6160_v19 }
  0xda   :  { %v6157_v14 = vld [vmem:[%s8156_s1 + $0x188] sm:$0xff] }
  0xdd   :  { %1776 = vmatpush.bf16.msrb.mxu2 %v6159_v44  ;;  %v6876_v44 = vld [vmem:[%s8157_s0 + $0x1e0] sm:$0xff] }
  0xde   :  { %v814_v25 = vpop.f32.mrf.mxu2  ;;  %v406_v31 = vpop.f32.mrf.mxu0 }
  0xdf   :  { %v1096_v26 = vpop.f32.mrf.mxu3  ;;  %v884_v29 = vadd.f32 %v814_v25, %v637_v22  ;;  %v639_v32 = vpop.f32.mrf.mxu1 }
  0xe0   :  { %v640_v36 = vadd.f32 %v639_v32, %v406_v31  ;;  %v6822_v31 = vld [vmem:[%s8157_s0 + $0x208] sm:$0xff] }
  0xe1   :  { %v6772_v39 = vadd.f32 %v1096_v26, %v884_v29  ;;  %445 = vmatmul.bf16.gmra.mxu0 %v6757_v27  ;;  %v6817_v29 = vld [vmem:[%s8157_s0 + $0x1d0] sm:$0xff]  ;;  %1777 = vmatpush.bf16.msrb.mxu2 %v6158_v59 }
  0xe2   :  { %678 = vmatmul.bf16.gmra.mxu1 %v6762_v28 }
  0xe3   :  { %856 = vmatmul.bf16.gmra.mxu2 %v6767_v34 }
  0xe4   :  { %1138 = vmatmul.bf16.gmra.mxu3 %v6090_v35  ;;  %v6152_v35 = vld [vmem:[%s8156_s1 + $0x160] sm:$0xff] }
  0xe5   :  { %1565 = vmatpush.bf16.msrb.mxu1 %v6152_v35  ;;  %1778 = vmatpush.bf16.msrb.mxu2 %v6157_v14 }
  0xe6   :  { %v817_v51 = vpop.f32.mrf.mxu2  ;;  %v408_v2 = vpop.f32.mrf.mxu0 }
  0xe7   :  { %v1099_v52 = vpop.f32.mrf.mxu3  ;;  %v885_v61 = vadd.f32 %v817_v51, %v640_v36  ;;  %v641_v4 = vpop.f32.mrf.mxu1  ;;  %v6168_v36 = vld [vmem:[%s8156_s1 + $0x1e0] sm:$0xff] }
  0xe8   :  { %v642_v6 = vadd.f32 %v641_v4, %v408_v2  ;;  %1985 = vmatpush.bf16.msrb.mxu3 %v6168_v36 }
  0xe9   :  { %v6795_v8 = vadd.f32 %v1099_v52, %v885_v61  ;;  %1566 = vmatpush.bf16.msrb.mxu1 %v6151_v45  ;;  %v6881_v45 = vld [vmem:[%s8157_s0 + $0x218] sm:$0xff] }
  0xec   :  { %1986 = vmatpush.bf16.msrb.mxu3 %v6167_v46 }
  0xed   :  { %1567 = vmatpush.bf16.msrb.mxu1 %v6150_v7 }
  0xee   :  { %v819_v15 = vpop.f32.mrf.mxu2  ;;  %v411_v25 = vpop.f32.mrf.mxu0 }
  0xef   :  { %v1101_v17 = vpop.f32.mrf.mxu3  ;;  %v886_v22 = vadd.f32 %v819_v15, %v642_v6  ;;  %v644_v26 = vpop.f32.mrf.mxu1  ;;  %v6149_v15 = vld [vmem:[%s8156_s1 + $0x148] sm:$0xff] }
  0xf0   :  { %v645_v32 = vadd.f32 %v644_v26, %v411_v25  ;;  %1987 = vmatpush.bf16.msrb.mxu3 %v6166_v9  ;;  %v6868_v25 = vld [vmem:[%s8157_s0 + $0x1d8] sm:$0xff]  ;;  %v6156_v26 = vld [vmem:[%s8156_s1 + $0x180] sm:$0xff] }
  0xf1   :  { %v6830_v42 = vadd.f32 %v1101_v17, %v886_v22  ;;  %450 = vmatmul.bf16.gmra.mxu0 %v6809_v18  ;;  %v6165_v17 = vld [vmem:[%s8156_s1 + $0x1c8] sm:$0xff]  ;;  %1568 = vmatpush.bf16.msrb.mxu1 %v6149_v15 }
  0xf2   :  { %683 = vmatmul.bf16.gmra.mxu1 %v6767_v34  ;;  %1779 = vmatpush.bf16.msrb.mxu2 %v6156_v26 }
  0xf3   :  { %861 = vmatmul.bf16.gmra.mxu2 %v6817_v29 }
  0xf4   :  { %1143 = vmatmul.bf16.gmra.mxu3 %v6822_v31 }
  0xf5   :  { %1988 = vmatpush.bf16.msrb.mxu3 %v6165_v17 }
  0xf6   :  { %v822_v51 = vpop.f32.mrf.mxu2  ;;  %v413_v2 = vpop.f32.mrf.mxu0 }
  0xf7   :  { %v1104_v52 = vpop.f32.mrf.mxu3  ;;  %v887_v61 = vadd.f32 %v822_v51, %v645_v32  ;;  %v646_v4 = vpop.f32.mrf.mxu1  ;;  %v6148_v51 = vld [vmem:[%s8156_s1 + $0x140] sm:$0xff] }
  0xf8   :  { %v647_v6 = vadd.f32 %v646_v4, %v413_v2  ;;  %1569 = vmatpush.bf16.msrb.mxu1 %v6148_v51 }
  0xf9   :  { %v6854_v11 = vadd.f32 %v1104_v52, %v887_v61  ;;  %v6164_v52 = vld [vmem:[%s8156_s1 + $0x1c0] sm:$0xff]  ;;  %v6179_v61 = vld [vmem:[%s8156_s1 + $0x238] sm:$0xff] }
  0xfa   :  { %1989 = vmatpush.bf16.msrb.mxu3 %v6164_v52  ;;  %2174 = vmatpush.bf16.msra.mxu0 %v6179_v61 }
  0xfe   :  { %v824_v19 = vpop.f32.mrf.mxu2  ;;  %v416_v35 = vpop.f32.mrf.mxu0 }
  0xff   :  { %v1106_v22 = vpop.f32.mrf.mxu3  ;;  %v888_v32 = vadd.f32 %v824_v19, %v647_v6  ;;  %v649_v36 = vpop.f32.mrf.mxu1 }
 0x100   :  { %v650_v46 = vadd.f32 %v649_v36, %v416_v35  ;;  %v6908_v36 = vld [vmem:[%s8157_s0 + $0x1f0] sm:$0xff] }
 0x101   :  { %v6889_v59 = vadd.f32 %v1106_v22, %v888_v32  ;;  %455 = vmatmul.bf16.gmra.mxu0 %v6868_v25  ;;  %v6903_v22 = vld [vmem:[%s8157_s0 + $0x1e8] sm:$0xff]  ;;  %8170 = vst [vmem:[#allocation3_spill] sm:$0xff] %v6908_v36 }
 0x102   :  { %688 = vmatmul.bf16.gmra.mxu1 %v6817_v29 }
 0x103   :  { %866 = vmatmul.bf16.gmra.mxu2 %v6876_v44 }
 0x104   :  { %1148 = vmatmul.bf16.gmra.mxu3 %v6881_v45 }
 0x106   :  { %v827_v2 = vpop.f32.mrf.mxu2  ;;  %v418_v7 = vpop.f32.mrf.mxu0 }
 0x107   :  { %v1109_v4 = vpop.f32.mrf.mxu3  ;;  %v889_v6 = vadd.f32 %v827_v2, %v650_v46  ;;  %v651_v9 = vpop.f32.mrf.mxu1  ;;  %v6913_v46 = vld [vmem:[%s8157_s0 + $0x228] sm:$0xff] }
 0x108   :  { %v652_v14 = vadd.f32 %v651_v9, %v418_v7 }
 0x109   :  { %v6898_v15 = vadd.f32 %v1109_v4, %v889_v6 }
 0x10b   :  { %8169 = vst [vmem:[#allocation2_spill] sm:$0xff] %v6898_v15 }
 0x10e   :  { %v829_v17 = vpop.f32.mrf.mxu2  ;;  %v421_v32 = vpop.f32.mrf.mxu0 }
 0x10f   :  { %v1111_v19 = vpop.f32.mrf.mxu3  ;;  %v890_v26 = vadd.f32 %v829_v17, %v652_v14  ;;  %v654_v35 = vpop.f32.mrf.mxu1 }
 0x110   :  { %v655_v51 = vadd.f32 %v654_v35, %v421_v32 }
 0x111   :  { %v6915_v52 = vadd.f32 %v1111_v19, %v890_v26  ;;  %460 = vmatmul.bf16.gmra.mxu0 %v6903_v22  ;;  %v6037_v19 = vld [vmem:[%s8157_s0 + $0x50] sm:$0xff] }
 0x112   :  { %693 = vmatmul.bf16.gmra.mxu1 %v6876_v44 }
 0x113   :  { %8171 = vst [vmem:[#allocation4_spill] sm:$0xff] %v6915_v52  ;;  %871 = vmatmul.bf16.gmra.mxu2 %v6908_v36 }
 0x114   :  { %1153 = vmatmul.bf16.gmra.mxu3 %v6913_v46 }
 0x116   :  { %v832_v61 = vpop.f32.mrf.mxu2  ;;  %v423_v6 = vpop.f32.mrf.mxu0 }
 0x117   :  { %v1114_v2 = vpop.f32.mrf.mxu3  ;;  %v891_v4 = vadd.f32 %v832_v61, %v655_v51  ;;  %v656_v7 = vpop.f32.mrf.mxu1  ;;  %v6178_v51 = vld [vmem:[%s8156_s1 + $0x230] sm:$0xff] }
 0x118   :  { %v657_v9 = vadd.f32 %v656_v7, %v423_v6  ;;  %2175 = vmatpush.bf16.msra.mxu0 %v6178_v51 }
 0x119   :  { %v6921_v14 = vadd.f32 %v1114_v2, %v891_v4 }
 0x11e   :  { %v834_v17 = vpop.f32.mrf.mxu2  ;;  %v426_v35 = vpop.f32.mrf.mxu0 }
 0x11f   :  { %v1116_v32 = vpop.f32.mrf.mxu3  ;;  %v892_v26 = vadd.f32 %v834_v17, %v657_v9  ;;  %v659_v52 = vpop.f32.mrf.mxu1 }
 0x120   :  { %v660_v36 = vadd.f32 %v659_v52, %v426_v35 }
 0x121   :  { %v6926_v15 = vadd.f32 %v1116_v32, %v892_v26  ;;  %1360 = vmatmul.bf16.vlgmr.msrb.gmra.mxu0 %v6037_v19 }
 0x122   :  { %1570 = vmatmul.bf16.vlgmr.msrb.gmra.mxu1 %v6545_v40  ;;  %v6039_v40 = vld [vmem:[%s8157_s0 + $0x60] sm:$0xff] }
 0x123   :  { %1780 = vmatmul.bf16.vlgmr.msrb.gmra.mxu2 %v6583_v49 }
 0x124   :  { %1990 = vmatmul.bf16.vlgmr.msrb.gmra.mxu3 %v6578_v48 }
 0x126   :  { %v837_v61 = vpop.f32.mrf.mxu2  ;;  %v428_v6 = vpop.f32.mrf.mxu0 }
 0x127   :  { %v1119_v2 = vpop.f32.mrf.mxu3  ;;  %v893_v4 = vadd.f32 %v837_v61, %v660_v36  ;;  %v661_v7 = vpop.f32.mrf.mxu1 }
 0x128   :  { %v662_v52 = vadd.f32 %v661_v7, %v428_v6 }
 0x129   :  { %v6934_v9 = vadd.f32 %v1119_v2, %v893_v4 }
 0x12e   :  { %v839_v17 = vpop.f32.mrf.mxu2  ;;  %v431_v49 = vpop.f32.mrf.mxu0 }
 0x12f   :  { %v1121_v32 = vpop.f32.mrf.mxu3  ;;  %v894_v48 = vadd.f32 %v839_v17, %v662_v52  ;;  %v664_v19 = vpop.f32.mrf.mxu1 }
 0x130   :  { %v665_v26 = vadd.f32 %v664_v19, %v431_v49 }
 0x131   :  { %v6939_v35 = vadd.f32 %v1121_v32, %v894_v48  ;;  %1365 = vmatmul.bf16.gmra.mxu0 %v6039_v40  ;;  %v6041_v32 = vld [vmem:[%s8157_s0 + $0x70] sm:$0xff] }
 0x132   :  { %1575 = vmatmul.bf16.gmra.mxu1 %v6557_v43 }
 0x133   :  { %1785 = vmatmul.bf16.gmra.mxu2 %v6588_v50 }
 0x134   :  { %1995 = vmatmul.bf16.gmra.mxu3 %v6602_v53  ;;  %v6177_v53 = vld [vmem:[%s8156_s1 + $0x228] sm:$0xff] }
 0x135   :  { %2176 = vmatpush.bf16.msra.mxu0 %v6177_v53 }
 0x136   :  { %v842_v36 = vpop.f32.mrf.mxu2  ;;  %v433_v2 = vpop.f32.mrf.mxu0 }
 0x137   :  { %v1124_v51 = vpop.f32.mrf.mxu3  ;;  %v895_v61 = vadd.f32 %v842_v36, %v665_v26  ;;  %v666_v4 = vpop.f32.mrf.mxu1 }
 0x138   :  { %v667_v6 = vadd.f32 %v666_v4, %v433_v2 }
 0x139   :  { %v6944_v7 = vadd.f32 %v1124_v51, %v895_v61 }
 0x13e   :  { %v844_v52 = vpop.f32.mrf.mxu2  ;;  %v436_v43 = vpop.f32.mrf.mxu0 }
 0x13f   :  { %v1126_v17 = vpop.f32.mrf.mxu3  ;;  %v896_v40 = vadd.f32 %v844_v52, %v667_v6  ;;  %v669_v48 = vpop.f32.mrf.mxu1 }
 0x140   :  { %v670_v50 = vadd.f32 %v669_v48, %v436_v43 }
 0x141   :  { %v6949_v49 = vadd.f32 %v1126_v17, %v896_v40  ;;  %1370 = vmatmul.bf16.gmra.mxu0 %v6041_v32 }
 0x142   :  { %1580 = vmatmul.bf16.gmra.mxu1 %v6572_v47  ;;  %v6043_v47 = vld [vmem:[%s8157_s0 + $0x80] sm:$0xff] }
 0x143   :  { %1790 = vmatmul.bf16.gmra.mxu2 %v6607_v54  ;;  %v6044_v54 = vld [vmem:[%s8157_s0 + $0x88] sm:$0xff] }
 0x144   :  { %2000 = vmatmul.bf16.gmra.mxu3 %v6621_v56 }
 0x146   :  { %v847_v19 = vpop.f32.mrf.mxu2  ;;  %v438_v51 = vpop.f32.mrf.mxu0 }
 0x147   :  { %v1129_v26 = vpop.f32.mrf.mxu3  ;;  %v897_v36 = vadd.f32 %v847_v19, %v670_v50  ;;  %v671_v61 = vpop.f32.mrf.mxu1 }
 0x148   :  { %v672_v2 = vadd.f32 %v671_v61, %v438_v51 }
 0x149   :  { %v6957_v4 = vadd.f32 %v1129_v26, %v897_v36 }
 0x14e   :  { %v849_v6 = vpop.f32.mrf.mxu2  ;;  %v441_v17 = vpop.f32.mrf.mxu0 }
 0x14f   :  { %v1131_v52 = vpop.f32.mrf.mxu3  ;;  %v898_v56 = vadd.f32 %v849_v6, %v672_v2  ;;  %v674_v32 = vpop.f32.mrf.mxu1  ;;  %v6055_v6 = vld [vmem:[%s8157_s0 + $0xe0] sm:$0xff] }
 0x150   :  { %v675_v40 = vadd.f32 %v674_v32, %v441_v17 }
 0x151   :  { %v6965_v43 = vadd.f32 %v1131_v52, %v898_v56  ;;  %1375 = vmatmul.bf16.gmra.mxu0 %v6043_v47 }
 0x152   :  { %1585 = vmatmul.bf16.gmra.mxu1 %v6044_v54 }
 0x153   :  { %1795 = vmatmul.bf16.gmra.mxu2 %v6626_v57 }
 0x154   :  { %2005 = vmatmul.bf16.gmra.mxu3 %v6643_v60  ;;  %v6176_v60 = vld [vmem:[%s8156_s1 + $0x220] sm:$0xff] }
 0x155   :  { %2177 = vmatpush.bf16.msra.mxu0 %v6176_v60 }
 0x156   :  { %v852_v48 = vpop.f32.mrf.mxu2  ;;  %v443_v19 = vpop.f32.mrf.mxu0 }
 0x157   :  { %v1134_v50 = vpop.f32.mrf.mxu3  ;;  %v899_v53 = vadd.f32 %v852_v48, %v675_v40  ;;  %v676_v26 = vpop.f32.mrf.mxu1 }
 0x158   :  { %v677_v36 = vadd.f32 %v676_v26, %v443_v19 }
 0x159   :  { %v6969_v51 = vadd.f32 %v1134_v50, %v899_v53 }
 0x15e   :  { %v854_v61 = vpop.f32.mrf.mxu2  ;;  %v446_v47 = vpop.f32.mrf.mxu0 }
 0x15f   :  { %v1136_v2 = vpop.f32.mrf.mxu3  ;;  %v900_v52 = vadd.f32 %v854_v61, %v677_v36  ;;  %v679_v54 = vpop.f32.mrf.mxu1 }
 0x160   :  { %v680_v57 = vadd.f32 %v679_v54, %v446_v47 }
 0x161   :  { %v6974_v56 = vadd.f32 %v1136_v2, %v900_v52  ;;  %1380 = vmatmul.bf16.gmra.mxu0 %v6055_v6 }
 0x162   :  { %1590 = vmatmul.bf16.gmra.mxu1 %v6612_v55  ;;  %v6057_v55 = vld [vmem:[%s8157_s0 + $0xf0] sm:$0xff] }
 0x163   :  { %1800 = vmatmul.bf16.gmra.mxu2 %v6664_v0 }
 0x164   :  { %2010 = vmatmul.bf16.gmra.mxu3 %v6659_v63 }
 0x166   :  { %v857_v17 = vpop.f32.mrf.mxu2  ;;  %v448_v48 = vpop.f32.mrf.mxu0 }
 0x167   :  { %v1139_v32 = vpop.f32.mrf.mxu3  ;;  %v901_v40 = vadd.f32 %v857_v17, %v680_v57  ;;  %v681_v50 = vpop.f32.mrf.mxu1 }
 0x168   :  { %v682_v53 = vadd.f32 %v681_v50, %v448_v48  ;;  %v6059_v50 = vld [vmem:[%s8157_s0 + $0x100] sm:$0xff] }
 0x169   :  { %v6982_v19 = vadd.f32 %v1139_v32, %v901_v40 }
 0x16e   :  { %v859_v26 = vpop.f32.mrf.mxu2  ;;  %v451_v0 = vpop.f32.mrf.mxu0 }
 0x16f   :  { %v1141_v36 = vpop.f32.mrf.mxu3  ;;  %v902_v63 = vadd.f32 %v859_v26, %v682_v53  ;;  %v684_v61 = vpop.f32.mrf.mxu1 }
 0x170   :  { %v685_v2 = vadd.f32 %v684_v61, %v451_v0 }
 0x171   :  { %v6987_v6 = vadd.f32 %v1141_v36, %v902_v63  ;;  %1385 = vmatmul.bf16.gmra.mxu0 %v6057_v55 }
 0x172   :  { %1595 = vmatmul.bf16.gmra.mxu1 %v6631_v58 }
 0x173   :  { %1805 = vmatmul.bf16.gmra.mxu2 %v6669_v3 }
 0x174   :  { %2015 = vmatmul.bf16.gmra.mxu3 %v6685_v16  ;;  %v6175_v16 = vld [vmem:[%s8156_s1 + $0x218] sm:$0xff] }
 0x175   :  { %2178 = vmatpush.bf16.msra.mxu0 %v6175_v16 }
 0x176   :  { %v862_v52 = vpop.f32.mrf.mxu2  ;;  %v453_v57 = vpop.f32.mrf.mxu0 }
 0x177   :  { %v1144_v47 = vpop.f32.mrf.mxu3  ;;  %v903_v54 = vadd.f32 %v862_v52, %v685_v2  ;;  %v686_v60 = vpop.f32.mrf.mxu1 }
 0x178   :  { %v687_v17 = vadd.f32 %v686_v60, %v453_v57 }
 0x179   :  { %v6992_v32 = vadd.f32 %v1144_v47, %v903_v54 }
 0x17e   :  { %v864_v40 = vpop.f32.mrf.mxu2  ;;  %v456_v58 = vpop.f32.mrf.mxu0 }
 0x17f   :  { %v1146_v48 = vpop.f32.mrf.mxu3  ;;  %v904_v53 = vadd.f32 %v864_v40, %v687_v17  ;;  %v689_v26 = vpop.f32.mrf.mxu1 }
 0x180   :  { %v690_v3 = vadd.f32 %v689_v26, %v456_v58 }
 0x181   :  { %v6997_v36 = vadd.f32 %v1146_v48, %v904_v53  ;;  %1390 = vmatmul.bf16.gmra.mxu0 %v6059_v50 }
 0x182   :  { %1600 = vmatmul.bf16.gmra.mxu1 %v6651_v62  ;;  %v6061_v62 = vld [vmem:[%s8157_s0 + $0x110] sm:$0xff] }
 0x183   :  { %1810 = vmatmul.bf16.gmra.mxu2 %v6690_v20  ;;  %v6062_v20 = vld [vmem:[%s8157_s0 + $0x118] sm:$0xff] }
 0x184   :  { %2020 = vmatmul.bf16.gmra.mxu3 %v6708_v33 }
 0x186   :  { %v867_v55 = vpop.f32.mrf.mxu2  ;;  %v458_v61 = vpop.f32.mrf.mxu0 }
 0x187   :  { %v1149_v63 = vpop.f32.mrf.mxu3  ;;  %v905_v0 = vadd.f32 %v867_v55, %v690_v3  ;;  %v691_v2 = vpop.f32.mrf.mxu1 }
 0x188   :  { %v692_v52 = vadd.f32 %v691_v2, %v458_v61  ;;  %v6073_v61 = vld [vmem:[%s8157_s0 + $0x170] sm:$0xff] }
 0x189   :  { %v7005_v47 = vadd.f32 %v1149_v63, %v905_v0 }
 0x18e   :  { %v869_v54 = vpop.f32.mrf.mxu2  ;;  %v461_v60 = vpop.f32.mrf.mxu0 }
 0x18f   :  { %v1151_v57 = vpop.f32.mrf.mxu3  ;;  %v906_v33 = vadd.f32 %v869_v54, %v692_v52  ;;  %v694_v17 = vpop.f32.mrf.mxu1 }
 0x190   :  { %v695_v40 = vadd.f32 %v694_v17, %v461_v60 }
 0x191   :  { %v7013_v48 = vadd.f32 %v1151_v57, %v906_v33  ;;  %1395 = vmatmul.bf16.gmra.mxu0 %v6061_v62  ;;  %v6174_v62 = vld [vmem:[%s8156_s1 + $0x210] sm:$0xff] }
 0x192   :  { %1605 = vmatmul.bf16.gmra.mxu1 %v6062_v20  ;;  %2179 = vmatpush.bf16.msra.mxu0 %v6174_v62 }
 0x193   :  { %1815 = vmatmul.bf16.gmra.mxu2 %v6713_v37 }
 0x194   :  { %2025 = vmatmul.bf16.gmra.mxu3 %v6737_v5 }
 0x196   :  { %v872_v50 = vpop.f32.mrf.mxu2  ;;  %v463_v26 = vpop.f32.mrf.mxu0 }
 0x197   :  { %v1154_v53 = vpop.f32.mrf.mxu3  ;;  %v907_v58 = vadd.f32 %v872_v50, %v695_v40  ;;  %v696_v3 = vpop.f32.mrf.mxu1 }
 0x198   :  { %v697_v16 = vadd.f32 %v696_v3, %v463_v26 }
 0x199   :  { %v7017_v55 = vadd.f32 %v1154_v53, %v907_v58 }
 0x19e   :  { %v874_v63 = vpop.f32.mrf.mxu2  ;;  %v1361_v52 = vpop.f32.mrf.mxu0 }
 0x19f   :  { %v1156_v0 = vpop.f32.mrf.mxu3  ;;  %v908_v2 = vadd.f32 %v874_v63, %v697_v16  ;;  %v1571_v54 = vpop.f32.mrf.mxu1  ;;  %v1441_v37 = vadd.f32 %v1361_v52, %v6680_v13 }
 0x1a1   :  { %v7023_v5 = vadd.f32 %v1156_v0, %v908_v2  ;;  %v1651_v57 = vadd.f32 %v1571_v54, %v1441_v37  ;;  %1400 = vmatmul.bf16.gmra.mxu0 %v6073_v61 }
 0x1a2   :  { %1610 = vmatmul.bf16.gmra.mxu1 %v6695_v21 }
 0x1a3   :  { %1820 = vmatmul.bf16.gmra.mxu2 %v6762_v28 }
 0x1a4   :  { %2030 = vmatmul.bf16.gmra.mxu3 %v6757_v27  ;;  %v6075_v27 = vld [vmem:[%s8157_s0 + $0x180] sm:$0xff] }
 0x1a6   :  { %v1781_v20 = vpop.f32.mrf.mxu2  ;;  %v1363_v17 = vpop.f32.mrf.mxu0 }
 0x1a7   :  { %v1991_v33 = vpop.f32.mrf.mxu3  ;;  %v1861_v60 = vadd.f32 %v1781_v20, %v1651_v57  ;;  %v1573_v13 = vpop.f32.mrf.mxu1  ;;  %v1442_v40 = vadd.f32 %v1363_v17, %v6697_v23 }
 0x1a9   :  { %v7032_v50 = vadd.f32 %v1991_v33, %v1861_v60  ;;  %v1652_v53 = vadd.f32 %v1573_v13, %v1442_v40  ;;  %v6195_v40 = vld [vmem:[%s8158_s3 + $0x78] sm:$0xff] }
 0x1aa   :  { %2530 = vmatpush.bf16.msra.mxu1 %v6195_v40 }
 0x1ae   :  { %v1783_v21 = vpop.f32.mrf.mxu2  ;;  %v1366_v26 = vpop.f32.mrf.mxu0 }
 0x1af   :  { %v1993_v58 = vpop.f32.mrf.mxu3  ;;  %v1862_v28 = vadd.f32 %v1783_v21, %v1652_v53  ;;  %v1576_v3 = vpop.f32.mrf.mxu1  ;;  %v1443_v16 = vadd.f32 %v1366_v26, %v6703_v30 }
 0x1b1   :  { %v7038_v63 = vadd.f32 %v1993_v58, %v1862_v28  ;;  %v1653_v0 = vadd.f32 %v1576_v3, %v1443_v16  ;;  %1405 = vmatmul.bf16.gmra.mxu0 %v6075_v27  ;;  %v6079_v3 = vld [vmem:[%s8157_s0 + $0x1a0] sm:$0xff]  ;;  %v6080_v16 = vld [vmem:[%s8157_s0 + $0x1a8] sm:$0xff] }
 0x1b2   :  { %1615 = vmatmul.bf16.gmra.mxu1 %v6718_v38  ;;  %v6077_v38 = vld [vmem:[%s8157_s0 + $0x190] sm:$0xff] }
 0x1b3   :  { %1825 = vmatmul.bf16.gmra.mxu2 %v6767_v34 }
 0x1b4   :  { %2035 = vmatmul.bf16.gmra.mxu3 %v6809_v18 }
 0x1b6   :  { %v1786_v23 = vpop.f32.mrf.mxu2  ;;  %v1368_v52 = vpop.f32.mrf.mxu0 }
 0x1b7   :  { %v1996_v61 = vpop.f32.mrf.mxu3  ;;  %v1863_v2 = vadd.f32 %v1786_v23, %v1653_v0  ;;  %v1578_v54 = vpop.f32.mrf.mxu1  ;;  %v1444_v37 = vadd.f32 %v1368_v52, %v6720_v41  ;;  %v6173_v41 = vld [vmem:[%s8156_s1 + $0x208] sm:$0xff] }
 0x1b8   :  { %2180 = vmatpush.bf16.msra.mxu0 %v6173_v41 }
 0x1b9   :  { %v7044_v57 = vadd.f32 %v1996_v61, %v1863_v2  ;;  %v1654_v30 = vadd.f32 %v1578_v54, %v1444_v37 }
 0x1be   :  { %v1788_v62 = vpop.f32.mrf.mxu2  ;;  %v1371_v34 = vpop.f32.mrf.mxu0 }
 0x1bf   :  { %v1998_v20 = vpop.f32.mrf.mxu3  ;;  %v1864_v33 = vadd.f32 %v1788_v62, %v1654_v30  ;;  %v1581_v60 = vpop.f32.mrf.mxu1  ;;  %v1445_v18 = vadd.f32 %v1371_v34, %v6732_v1 }
 0x1c1   :  { %v7050_v17 = vadd.f32 %v1998_v20, %v1864_v33  ;;  %v1655_v13 = vadd.f32 %v1581_v60, %v1445_v18  ;;  %1410 = vmatmul.bf16.gmra.mxu0 %v6077_v38  ;;  %v6091_v18 = vld [vmem:[%s8157_s0 + $0x200] sm:$0xff] }
 0x1c2   :  { %1620 = vmatmul.bf16.gmra.mxu1 %v6745_v10 }
 0x1c3   :  { %1830 = vmatmul.bf16.gmra.mxu2 %v6817_v29 }
 0x1c4   :  { %2040 = vmatmul.bf16.gmra.mxu3 %v6868_v25 }
 0x1c6   :  { %v1791_v1 = vpop.f32.mrf.mxu2  ;;  %v1373_v58 = vpop.f32.mrf.mxu0 }
 0x1c7   :  { %v2001_v53 = vpop.f32.mrf.mxu3  ;;  %v1865_v21 = vadd.f32 %v1791_v1, %v1655_v13  ;;  %v1583_v27 = vpop.f32.mrf.mxu1  ;;  %v1446_v10 = vadd.f32 %v1373_v58, %v6747_v12  ;;  %v6172_v58 = vld [vmem:[%s8156_s1 + $0x200] sm:$0xff] }
 0x1c8   :  { %2181 = vmatpush.bf16.msra.mxu0 %v6172_v58 }
 0x1c9   :  { %v7062_v29 = vadd.f32 %v2001_v53, %v1865_v21  ;;  %v1656_v25 = vadd.f32 %v1583_v27, %v1446_v10  ;;  %v6194_v27 = vld [vmem:[%s8158_s3 + $0x70] sm:$0xff] }
 0x1ca   :  { %2531 = vmatpush.bf16.msra.mxu1 %v6194_v27 }
 0x1ce   :  { %v1793_v28 = vpop.f32.mrf.mxu2  ;;  %v1376_v23 = vpop.f32.mrf.mxu0 }
 0x1cf   :  { %v2003_v26 = vpop.f32.mrf.mxu3  ;;  %v1866_v0 = vadd.f32 %v1793_v28, %v1656_v25  ;;  %v1586_v61 = vpop.f32.mrf.mxu1  ;;  %v1447_v2 = vadd.f32 %v1376_v23, %v6752_v24 }
 0x1d1   :  { %v7071_v52 = vadd.f32 %v2003_v26, %v1866_v0  ;;  %v1657_v12 = vadd.f32 %v1586_v61, %v1447_v2  ;;  %1415 = vmatmul.bf16.gmra.mxu0 %v6079_v3  ;;  %v7110_v3 = vld [vmem:[%s8157_s0 + $0x250] sm:$0xff] }
 0x1d2   :  { %1625 = vmatmul.bf16.gmra.mxu1 %v6080_v16  ;;  %v6102_v16 = vld [vmem:[%s8157_s0 + $0x258] sm:$0xff] }
 0x1d3   :  { %1835 = vmatmul.bf16.gmra.mxu2 %v6876_v44 }
 0x1d4   :  { %2045 = vmatmul.bf16.gmra.mxu3 %v6903_v22  ;;  %v6099_v22 = vld [vmem:[%s8157_s0 + $0x240] sm:$0xff] }
 0x1d6   :  { %v1796_v54 = vpop.f32.mrf.mxu2  ;;  %v1378_v62 = vpop.f32.mrf.mxu0 }
 0x1d7   :  { %v2006_v37 = vpop.f32.mrf.mxu3  ;;  %v1867_v30 = vadd.f32 %v1796_v54, %v1657_v12  ;;  %v1588_v20 = vpop.f32.mrf.mxu1  ;;  %v1448_v38 = vadd.f32 %v1378_v62, %v6772_v39  ;;  %v6100_v39 = vld [vmem:[%s8157_s0 + $0x248] sm:$0xff]  ;;  %v6095_v12 = vld [vmem:[%s8157_s0 + $0x220] sm:$0xff] }
 0x1d9   :  { %v7076_v33 = vadd.f32 %v2006_v37, %v1867_v30  ;;  %v1658_v34 = vadd.f32 %v1588_v20, %v1448_v38  ;;  %v7131_v37 = vld [vmem:[%s8157_s0 + $0x260] sm:$0xff] }
 0x1da   :  { %v8172_v30 = vld [vmem:[#allocation2_spill] sm:$0xff] }
 0x1de   :  { %v1798_v24 = vpop.f32.mrf.mxu2  ;;  %v1381_v41 = vpop.f32.mrf.mxu0 }
 0x1df   :  { %v2008_v60 = vpop.f32.mrf.mxu3  ;;  %v1868_v13 = vadd.f32 %v1798_v24, %v1658_v34  ;;  %v1591_v40 = vpop.f32.mrf.mxu1  ;;  %v1449_v1 = vadd.f32 %v1381_v41, %v6795_v8  ;;  %v8173_v24 = vld [vmem:[#allocation4_spill] sm:$0xff] }
 0x1e1   :  { %v7088_v53 = vadd.f32 %v2008_v60, %v1868_v13  ;;  %v7090_v21 = vadd.f32 %v1591_v40, %v1449_v1  ;;  %1420 = vmatmul.bf16.gmra.mxu0 %v6091_v18  ;;  %v6097_v18 = vld [vmem:[%s8157_s0 + $0x230] sm:$0xff] }
 0x1e2   :  { %1630 = vmatmul.bf16.gmra.mxu1 %v6822_v31  ;;  %v6093_v31 = vld [vmem:[%s8157_s0 + $0x210] sm:$0xff] }
 0x1e3   :  { %1840 = vmatmul.bf16.gmra.mxu2 %v6099_v22  ;;  %v7158_v40 = vld [vmem:[%s8157_s0 + $0x270] sm:$0xff]  ;;  %v6106_v22 = vld [vmem:[%s8157_s0 + $0x278] sm:$0xff] }
 0x1e4   :  { %2050 = vmatmul.bf16.gmra.mxu3 %v6100_v39 }
 0x1e6   :  { %v1383_v8 = vpop.f32.mrf.mxu0 }
 0x1e7   :  { %v7099_v10 = vpop.f32.mrf.mxu1  ;;  %v7102_v25 = vadd.f32 %v1383_v8, %v6830_v42 }
 0x1ee   :  { %v1386_v28 = vpop.f32.mrf.mxu0 }
 0x1ef   :  { %v1596_v26 = vpop.f32.mrf.mxu1  ;;  %v1451_v0 = vadd.f32 %v1386_v28, %v6854_v11 }
 0x1f1   :  { %v7116_v23 = vadd.f32 %v1596_v26, %v1451_v0  ;;  %1425 = vmatmul.bf16.gmra.mxu0 %v6093_v31  ;;  %v6192_v0 = vld [vmem:[%s8158_s3 + $0x60] sm:$0xff] }
 0x1f2   :  { %1635 = vmatmul.bf16.gmra.mxu1 %v6881_v45  ;;  %v6104_v45 = vld [vmem:[%s8157_s0 + $0x268] sm:$0xff] }
 0x1f3   :  { %1845 = vmatmul.bf16.gmra.mxu2 %v7110_v3 }
 0x1f4   :  { %2055 = vmatmul.bf16.gmra.mxu3 %v6102_v16 }
 0x1f6   :  { %v1388_v42 = vpop.f32.mrf.mxu0 }
 0x1f7   :  { %v7120_v61 = vpop.f32.mrf.mxu1  ;;  %v7123_v2 = vadd.f32 %v1388_v42, %v6889_v59  ;;  %v6193_v59 = vld [vmem:[%s8158_s3 + $0x68] sm:$0xff] }
 0x1f8   :  { %2532 = vmatpush.bf16.msra.mxu1 %v6193_v59 }
 0x1fc   :  { %2533 = vmatpush.bf16.msra.mxu1 %v6192_v0 }
 0x1fe   :  { %v1391_v54 = vpop.f32.mrf.mxu0 }
 0x1ff   :  { %v1601_v11 = vpop.f32.mrf.mxu1  ;;  %v1453_v62 = vadd.f32 %v1391_v54, %v8172_v30  ;;  %v6353_v30 = vld [vmem:[%s8157_s0 + $0xb0] sm:$0xff] }
 0x201   :  { %v7137_v20 = vadd.f32 %v1601_v11, %v1453_v62  ;;  %1430 = vmatmul.bf16.gmra.mxu0 %v6095_v12 }
 0x202   :  { %1640 = vmatmul.bf16.gmra.mxu1 %v6913_v46  ;;  %v6098_v46 = vld [vmem:[%s8157_s0 + $0x238] sm:$0xff] }
 0x203   :  { %1850 = vmatmul.bf16.gmra.mxu2 %v7131_v37 }
 0x204   :  { %2060 = vmatmul.bf16.gmra.mxu3 %v6104_v45 }
 0x206   :  { %v1393_v38 = vpop.f32.mrf.mxu0 }
 0x207   :  { %v7144_v34 = vpop.f32.mrf.mxu1  ;;  %v7147_v60 = vadd.f32 %v1393_v38, %v8173_v24 }
 0x20e   :  { %v1396_v13 = vpop.f32.mrf.mxu0 }
 0x20f   :  { %v1606_v41 = vpop.f32.mrf.mxu1  ;;  %v1455_v39 = vadd.f32 %v1396_v13, %v6921_v14  ;;  %v6352_v14 = vld [vmem:[%s8157_s0 + $0xa0] sm:$0xff]  ;;  %v6191_v13 = vld [vmem:[%s8158_s3 + $0x58] sm:$0xff] }
 0x210   :  { %2534 = vmatpush.bf16.msra.mxu1 %v6191_v13 }
 0x211   :  { %v7164_v1 = vadd.f32 %v1606_v41, %v1455_v39  ;;  %1435 = vmatmul.bf16.gmra.mxu0 %v6097_v18  ;;  %v6203_v39 = vld [vmem:[%s8158_s3 + $0xb8] sm:$0xff] }
 0x212   :  { %1645 = vmatmul.bf16.gmra.mxu1 %v6098_v46  ;;  %2787 = vmatpush.bf16.msra.mxu3 %v6203_v39 }
 0x213   :  { %1855 = vmatmul.bf16.gmra.mxu2 %v7158_v40 }
 0x214   :  { %2065 = vmatmul.bf16.gmra.mxu3 %v6106_v22 }
 0x216   :  { %v1398_v58 = vpop.f32.mrf.mxu0 }
 0x217   :  { %v7167_v27 = vpop.f32.mrf.mxu1  ;;  %v7170_v8 = vadd.f32 %v1398_v58, %v6926_v15 }
 0x21e   :  { %v1401_v31 = vpop.f32.mrf.mxu0 }
 0x21f   :  { %v1611_v28 = vpop.f32.mrf.mxu1  ;;  %v1457_v26 = vadd.f32 %v1401_v31, %v6934_v9 }
 0x221   :  { %v7173_v16 = vadd.f32 %v1611_v28, %v1457_v26  ;;  %2182 = vmatmul.bf16.vlgmr.msra.gmra.mxu0 %v6352_v14 }
 0x226   :  { %v1403_v42 = vpop.f32.mrf.mxu0 }
 0x227   :  { %v7181_v12 = vpop.f32.mrf.mxu1  ;;  %v7184_v15 = vadd.f32 %v1403_v42, %v6939_v35 }
 0x22e   :  { %v1406_v54 = vpop.f32.mrf.mxu0 }
 0x22f   :  { %v1616_v9 = vpop.f32.mrf.mxu1  ;;  %v1459_v11 = vadd.f32 %v1406_v54, %v6944_v7  ;;  %v6354_v7 = vld [vmem:[%s8157_s0 + $0xc0] sm:$0xff] }
 0x231   :  { %v7187_v45 = vadd.f32 %v1616_v9, %v1459_v11  ;;  %2187 = vmatmul.bf16.gmra.mxu0 %v6353_v30 }
 0x236   :  { %v1408_v62 = vpop.f32.mrf.mxu0 }
 0x237   :  { %v7192_v59 = vpop.f32.mrf.mxu1  ;;  %v7195_v38 = vadd.f32 %v1408_v62, %v6949_v49  ;;  %v6190_v62 = vld [vmem:[%s8158_s3 + $0x50] sm:$0xff] }
 0x238   :  { %2535 = vmatpush.bf16.msra.mxu1 %v6190_v62 }
 0x23e   :  { %v1411_v24 = vpop.f32.mrf.mxu0 }
 0x23f   :  { %v1621_v35 = vpop.f32.mrf.mxu1  ;;  %v1461_v18 = vadd.f32 %v1411_v24, %v6957_v4  ;;  %v6187_v4 = vld [vmem:[%s8158_s3 + $0x38] sm:$0xff] }
 0x240   :  { %2650 = vmatpush.bf16.msra.mxu2 %v6187_v4 }
 0x241   :  { %v7198_v46 = vadd.f32 %v1621_v35, %v1461_v18  ;;  %2192 = vmatmul.bf16.gmra.mxu0 %v6354_v7  ;;  %v6202_v18 = vld [vmem:[%s8158_s3 + $0xb0] sm:$0xff] }
 0x242   :  { %2788 = vmatpush.bf16.msra.mxu3 %v6202_v18  ;;  %v6181_v18 = vld [vmem:[%s8158_s3 + $0x8] sm:$0xff] }
 0x246   :  { %v1413_v41 = vpop.f32.mrf.mxu0 }
 0x247   :  { %v7206_v22 = vpop.f32.mrf.mxu1  ;;  %v7209_v49 = vadd.f32 %v1413_v41, %v6965_v43  ;;  %v6355_v43 = vld [vmem:[%s8157_s0 + $0xd0] sm:$0xff] }
 0x24e   :  { %v1416_v58 = vpop.f32.mrf.mxu0 }
 0x24f   :  { %v1626_v31 = vpop.f32.mrf.mxu1  ;;  %v1463_v28 = vadd.f32 %v1416_v58, %v6969_v51  ;;  %v6356_v51 = vld [vmem:[%s8157_s0 + $0x130] sm:$0xff] }
 0x251   :  { %v7218_v26 = vadd.f32 %v1626_v31, %v1463_v28  ;;  %2197 = vmatmul.bf16.gmra.mxu0 %v6355_v43  ;;  %v6185_v28 = vld [vmem:[%s8158_s3 + $0x28] sm:$0xff] }
 0x256   :  { %v1418_v14 = vpop.f32.mrf.mxu0 }
 0x257   :  { %v7223_v0 = vpop.f32.mrf.mxu1  ;;  %v7226_v42 = vadd.f32 %v1418_v14, %v6974_v56 }
 0x25e   :  { %v1421_v54 = vpop.f32.mrf.mxu0 }
 0x25f   :  { %v1631_v9 = vpop.f32.mrf.mxu1  ;;  %v1465_v11 = vadd.f32 %v1421_v54, %v6982_v19  ;;  %v6186_v19 = vld [vmem:[%s8158_s3 + $0x30] sm:$0xff]  ;;  %v6184_v54 = vld [vmem:[%s8158_s3 + $0x20] sm:$0xff] }
 0x260   :  { %2651 = vmatpush.bf16.msra.mxu2 %v6186_v19  ;;  %v6182_v19 = vld [vmem:[%s8158_s3 + $0x10] sm:$0xff] }
 0x261   :  { %v7229_v30 = vadd.f32 %v1631_v9, %v1465_v11  ;;  %2202 = vmatmul.bf16.gmra.mxu0 %v6356_v51  ;;  %v6183_v11 = vld [vmem:[%s8158_s3 + $0x18] sm:$0xff] }
 0x264   :  { %2652 = vmatpush.bf16.msra.mxu2 %v6185_v28  ;;  %v6201_v28 = vld [vmem:[%s8158_s3 + $0xa8] sm:$0xff] }
 0x265   :  { %2789 = vmatpush.bf16.msra.mxu3 %v6201_v28 }
 0x266   :  { %v1423_v24 = vpop.f32.mrf.mxu0 }
 0x267   :  { %v7237_v35 = vpop.f32.mrf.mxu1  ;;  %v7240_v56 = vadd.f32 %v1423_v24, %v6987_v6  ;;  %v6357_v6 = vld [vmem:[%s8157_s0 + $0x140] sm:$0xff]  ;;  %v6189_v24 = vld [vmem:[%s8158_s3 + $0x48] sm:$0xff] }
 0x268   :  { %2653 = vmatpush.bf16.msra.mxu2 %v6184_v54  ;;  %2536 = vmatpush.bf16.msra.mxu1 %v6189_v24  ;;  %v7307_v54 = vld [vmem:[%s8159_s2] ss:$0 sm:$0xff] }
 0x26c   :  { %2654 = vmatpush.bf16.msra.mxu2 %v6183_v11  ;;  %v7312_v11 = vpop.f32.mrf.mxu2 }
 0x26e   :  { %v1426_v7 = vpop.f32.mrf.mxu0 }
 0x26f   :  { %v1636_v13 = vpop.f32.mrf.mxu1  ;;  %v1467_v41 = vadd.f32 %v1426_v7, %v6992_v32 }
 0x270   :  { %2655 = vmatpush.bf16.msra.mxu2 %v6182_v19 }
 0x271   :  { %v7249_v4 = vadd.f32 %v1636_v13, %v1467_v41  ;;  %2207 = vmatmul.bf16.gmra.mxu0 %v6357_v6  ;;  %v6180_v41 = vld [vmem:[%s8158_s3] sm:$0xff] }
 0x274   :  { %2656 = vmatpush.bf16.msra.mxu2 %v6181_v18 }
 0x276   :  { %v1428_v39 = vpop.f32.mrf.mxu0 }
 0x277   :  { %v7254_v58 = vpop.f32.mrf.mxu1  ;;  %v7257_v31 = vadd.f32 %v1428_v39, %v6997_v36  ;;  %v6358_v36 = vld [vmem:[%s8157_s0 + $0x150] sm:$0xff]  ;;  %v6359_v39 = vld [vmem:[%s8157_s0 + $0x160] sm:$0xff] }
 0x278   :  { %2657 = vmatpush.bf16.msra.mxu2 %v6180_v41 }
 0x27e   :  { %v1431_v43 = vpop.f32.mrf.mxu0 }
 0x27f   :  { %v1641_v32 = vpop.f32.mrf.mxu1  ;;  %v1469_v14 = vadd.f32 %v1431_v43, %v7005_v47 }
 0x281   :  { %v7266_v9 = vadd.f32 %v1641_v32, %v1469_v14  ;;  %2212 = vmatmul.bf16.gmra.mxu0 %v6358_v36  ;;  %v6188_v36 = vld [vmem:[%s8158_s3 + $0x40] sm:$0xff] }
 0x282   :  { %2537 = vmatpush.bf16.msra.mxu1 %v6188_v36 }
 0x286   :  { %v1433_v51 = vpop.f32.mrf.mxu0 }
 0x287   :  { %v7274_v62 = vpop.f32.mrf.mxu1  ;;  %v7277_v47 = vadd.f32 %v1433_v51, %v7013_v48  ;;  %v6360_v51 = vld [vmem:[%s8157_s0 + $0x1c0] sm:$0xff] }
 0x28e   :  { %v1436_v7 = vpop.f32.mrf.mxu0 }
 0x28f   :  { %v1646_v13 = vpop.f32.mrf.mxu1  ;;  %v1471_v48 = vadd.f32 %v1436_v7, %v7017_v55  ;;  %v7320_v7 = vpop.f32.mrf.mxu3 }
 0x291   :  { %v7292_v6 = vadd.f32 %v1646_v13, %v1471_v48  ;;  %2217 = vmatmul.bf16.gmra.mxu0 %v6359_v39  ;;  %v7322_v13 = vpop.f32.mrf.mxu2 }
 0x293   :  { %8174 = vst [vmem:[#allocation2_spill] sm:$0xff] %v7292_v6 }
 0x296   :  { %v1438_v43 = vpop.f32.mrf.mxu0 }
 0x297   :  { %v7301_v55 = vadd.f32 %v1438_v43, %v7023_v5 }
 0x299   :  { %8175 = vst [vmem:[#allocation4_spill] sm:$0xff] %v7301_v55 }
 0x29e   :  { %v2183_v32 = vpop.f32.mrf.mxu0 }
 0x29f   :  { %v2263_v14 = vadd.f32 %v2183_v32, %v7032_v50 }
 0x2a1   :  { %2222 = vmatmul.bf16.gmra.mxu0 %v6360_v51  ;;  %v2299_v5 = vadd.f32 %v7307_v54, %v2263_v14  ;;  %v6200_v14 = vld [vmem:[%s8158_s3 + $0xa0] sm:$0xff] }
 0x2a2   :  { %2790 = vmatpush.bf16.msra.mxu3 %v6200_v14 }
 0x2a3   :  { %v2331_v24 = vmax.f32 %v2299_v5, 0.0 }
 0x2a5   :  { %v2363_v48 = vpack.c.bf16 %v2331_v24, %v2331_v24  ;;  %v7334_v24 = vpop.f32.mrf.mxu2 }
 0x2a6   :  { %v2185_v50 = vpop.f32.mrf.mxu0 }
 0x2a7   :  { %v2264_v19 = vadd.f32 %v2185_v50, %v7038_v63  ;;  %v2590_v43 = vunpack.c.l.b16 %v2363_v48  ;;  %v6361_v63 = vld [vmem:[%s8157_s0 + $0x1d0] sm:$0xff]  ;;  %v7332_v50 = vpop.f32.mrf.mxu3 }
 0x2a9   :  { %v2300_v18 = vadd.f32 %v7307_v54, %v2264_v19 }
 0x2ab   :  { %v2332_v41 = vmax.f32 %v2300_v18, 0.0 }
 0x2ad   :  { %v2364_v39 = vpack.c.bf16 %v2332_v41, %v2332_v41  ;;  %v7340_v14 = vpop.f32.mrf.mxu2 }
 0x2ae   :  { %v2188_v28 = vpop.f32.mrf.mxu0 }
 0x2af   :  { %v2591_v32 = vunpack.c.l.b16 %v2364_v39  ;;  %v2265_v36 = vadd.f32 %v2188_v28, %v7044_v57 }
 0x2b1   :  { %v2596_v51 = vpack.c.b16 %v2591_v32, %v2590_v43  ;;  %2227 = vmatmul.bf16.gmra.mxu0 %v6361_v63  ;;  %v2301_v5 = vadd.f32 %v7307_v54, %v2265_v36  ;;  %v7338_v32 = vpop.f32.mrf.mxu3 }
 0x2b3   :  { %2658 = vmatmul.bf16.vlgmr.msra.gmra.mxu2 %v2596_v51  ;;  %v2333_v57 = vmax.f32 %v2301_v5, 0.0 }
 0x2b5   :  { %v2365_v41 = vpack.c.bf16 %v2333_v57, %v2333_v57 }
 0x2b6   :  { %v2190_v19 = vpop.f32.mrf.mxu0 }
 0x2b7   :  { %v2266_v18 = vadd.f32 %v2190_v19, %v7050_v17  ;;  %v2446_v36 = vunpack.c.l.b16 %v2365_v41  ;;  %v6199_v17 = vld [vmem:[%s8158_s3 + $0x98] sm:$0xff] }
 0x2b8   :  { %2791 = vmatpush.bf16.msra.mxu3 %v6199_v17  ;;  %v6196_v17 = vld [vmem:[%s8158_s3 + $0x80] sm:$0xff] }
 0x2b9   :  { %v2302_v48 = vadd.f32 %v7307_v54, %v2266_v18 }
 0x2bb   :  { %v2334_v39 = vmax.f32 %v2302_v48, 0.0  ;;  %v7355_v48 = vpop.f32.mrf.mxu3 }
 0x2bd   :  { %v2366_v28 = vpack.c.bf16 %v2334_v39, %v2334_v39 }
 0x2be   :  { %v2193_v43 = vpop.f32.mrf.mxu0 }
 0x2bf   :  { %v2447_v51 = vunpack.c.l.b16 %v2366_v28  ;;  %v2267_v63 = vadd.f32 %v2193_v43, %v7062_v29  ;;  %v6211_v29 = vld [vmem:[%s8158_s3 + $0xf8] sm:$0xff] }
 0x2c0   :  { %2930 = vmatpush.bf16.msrb.mxu1 %v6211_v29 }
 0x2c1   :  { %v2464_v55 = vpack.c.b16 %v2447_v51, %v2446_v36  ;;  %2232 = vmatmul.bf16.gmra.mxu0 %v6876_v44  ;;  %v2303_v5 = vadd.f32 %v7307_v54, %v2267_v63  ;;  %v6198_v44 = vld [vmem:[%s8158_s3 + $0x90] sm:$0xff] }
 0x2c2   :  { %2792 = vmatpush.bf16.msra.mxu3 %v6198_v44 }
 0x2c3   :  { %2538 = vmatmul.bf16.vlgmr.msra.gmra.mxu1 %v2464_v55  ;;  %2663 = vmatmul.bf16.gmra.mxu2 %v2464_v55  ;;  %v2335_v57 = vmax.f32 %v2303_v5, 0.0  ;;  %v7357_v55 = vpop.f32.mrf.mxu2 }
 0x2c5   :  { %v2367_v39 = vpack.c.bf16 %v2335_v57, %v2335_v57  ;;  %v7368_v57 = vpop.f32.mrf.mxu3 }
 0x2c6   :  { %v2195_v19 = vpop.f32.mrf.mxu0 }
 0x2c7   :  { %v2268_v18 = vadd.f32 %v2195_v19, %v7071_v52  ;;  %v6197_v52 = vld [vmem:[%s8158_s3 + $0x88] sm:$0xff]  ;;  %v2448_v51 = vunpack.c.l.b16 %v2367_v39 }
 0x2c8   :  { %2793 = vmatpush.bf16.msra.mxu3 %v6197_v52  ;;  %v8176_v19 = vld [vmem:[#allocation3_spill] sm:$0xff]  ;;  %v1869_v52 = vadd.f32 %v7312_v11, %v7090_v21 }
 0x2c9   :  { %v2304_v41 = vadd.f32 %v7307_v54, %v2268_v18 }
 0x2cb   :  { %v2336_v28 = vmax.f32 %v2304_v41, 0.0  ;;  %v7370_v29 = vpop.f32.mrf.mxu2 }
 0x2cc   :  { %2794 = vmatpush.bf16.msra.mxu3 %v6196_v17 }
 0x2cd   :  { %v2368_v43 = vpack.c.bf16 %v2336_v28, %v2336_v28  ;;  %v6210_v28 = vld [vmem:[%s8158_s3 + $0xf0] sm:$0xff] }
 0x2ce   :  { %v2198_v36 = vpop.f32.mrf.mxu0  ;;  %2931 = vmatpush.bf16.msrb.mxu1 %v6210_v28 }
 0x2cf   :  { %v2449_v63 = vunpack.c.l.b16 %v2368_v43  ;;  %v2269_v5 = vadd.f32 %v2198_v36, %v7076_v33 }
 0x2d1   :  { %2237 = vmatmul.bf16.gmra.mxu0 %v8176_v19  ;;  %v2465_v18 = vpack.c.b16 %v2449_v63, %v2448_v51  ;;  %v2305_v44 = vadd.f32 %v7307_v54, %v2269_v5  ;;  %v2079_v63 = vadd.f32 %v7320_v7, %v1869_v52  ;;  %v7381_v5 = vpop.f32.mrf.mxu3 }
 0x2d3   :  { %2543 = vmatmul.bf16.gmra.mxu1 %v2465_v18  ;;  %2668 = vmatmul.bf16.gmra.mxu2 %v2465_v18  ;;  %v2337_v39 = vmax.f32 %v2305_v44, 0.0  ;;  %v7386_v21 = vpop.f32.mrf.mxu2 }
 0x2d5   :  { %v2369_v36 = vpack.c.bf16 %v2337_v39, %v2337_v39 }
 0x2d6   :  { %v2200_v41 = vpop.f32.mrf.mxu0 }
 0x2d7   :  { %v2270_v33 = vadd.f32 %v2200_v41, %v7088_v53  ;;  %v1660_v53 = vadd.f32 %v7099_v10, %v7102_v25  ;;  %v2450_v18 = vunpack.c.l.b16 %v2369_v36  ;;  %v1871_v10 = vadd.f32 %v7334_v24, %v7116_v23  ;;  %v6209_v24 = vld [vmem:[%s8158_s3 + $0xe8] sm:$0xff] }
 0x2d8   :  { %2932 = vmatpush.bf16.msrb.mxu1 %v6209_v24 }
 0x2d9   :  { %v2306_v43 = vadd.f32 %v7307_v54, %v2270_v33  ;;  %v1870_v6 = vadd.f32 %v7322_v13, %v1660_v53  ;;  %v2026_v28 = vpop.f32.mrf.mxu3 }
 0x2db   :  { %v2338_v51 = vmax.f32 %v2306_v43, 0.0  ;;  %v2080_v7 = vadd.f32 %v7332_v50, %v1870_v6  ;;  %v7394_v13 = vpop.f32.mrf.mxu2  ;;  %v1662_v6 = vadd.f32 %v7120_v61, %v7123_v2 }
 0x2dd   :  { %v2370_v17 = vpack.c.bf16 %v2338_v51, %v2338_v51 }
 0x2de   :  { %v2203_v19 = vpop.f32.mrf.mxu0 }
 0x2df   :  { %v2451_v44 = vunpack.c.l.b16 %v2370_v17  ;;  %v2271_v41 = vadd.f32 %v2203_v19, %v2079_v63 }
 0x2e1   :  { %2242 = vmatmul.bf16.gmra.mxu0 %v7110_v3  ;;  %v2466_v11 = vpack.c.b16 %v2451_v44, %v2450_v18  ;;  %v2307_v39 = vadd.f32 %v7307_v54, %v2271_v41  ;;  %v2081_v3 = vadd.f32 %v7338_v32, %v1871_v10  ;;  %v1872_v18 = vadd.f32 %v7340_v14, %v1662_v6  ;;  %v7400_v44 = vpop.f32.mrf.mxu3 }
 0x2e3   :  { %2548 = vmatmul.bf16.gmra.mxu1 %v2466_v11  ;;  %v2339_v52 = vmax.f32 %v2307_v39, 0.0  ;;  %v2082_v61 = vadd.f32 %v7355_v48, %v1872_v18  ;;  %v1821_v2 = vpop.f32.mrf.mxu2  ;;  %v1873_v39 = vadd.f32 %v7357_v55, %v7137_v20  ;;  %v6208_v20 = vld [vmem:[%s8158_s3 + $0xe0] sm:$0xff] }
 0x2e4   :  { %2933 = vmatpush.bf16.msrb.mxu1 %v6208_v20 }
 0x2e5   :  { %v2371_v36 = vpack.c.bf16 %v2339_v52, %v2339_v52 }
 0x2e6   :  { %v2205_v33 = vpop.f32.mrf.mxu0 }
 0x2e7   :  { %v2272_v43 = vadd.f32 %v2205_v33, %v2080_v7  ;;  %v2592_v50 = vunpack.c.l.b16 %v2371_v36  ;;  %v1664_v36 = vadd.f32 %v7144_v34, %v7147_v60 }
 0x2e9   :  { %v2308_v25 = vadd.f32 %v7307_v54, %v2272_v43  ;;  %v2031_v7 = vpop.f32.mrf.mxu3  ;;  %v2083_v43 = vadd.f32 %v7368_v57, %v1873_v39  ;;  %v1874_v55 = vadd.f32 %v7370_v29, %v1664_v36  ;;  %v1875_v29 = vadd.f32 %v7386_v21, %v7164_v1  ;;  %v6207_v1 = vld [vmem:[%s8158_s3 + $0xd8] sm:$0xff] }
 0x2ea   :  { %2934 = vmatpush.bf16.msrb.mxu1 %v6207_v1 }
 0x2eb   :  { %v2340_v51 = vmax.f32 %v2308_v25, 0.0  ;;  %v1823_v48 = vpop.f32.mrf.mxu2  ;;  %v2084_v34 = vadd.f32 %v7381_v5, %v1874_v55  ;;  %v2085_v24 = vadd.f32 %v2026_v28, %v1875_v29  ;;  %v1666_v5 = vadd.f32 %v7167_v27, %v7170_v8 }
 0x2ed   :  { %v2372_v63 = vpack.c.bf16 %v2340_v51, %v2340_v51  ;;  %v1876_v21 = vadd.f32 %v7394_v13, %v1666_v5  ;;  %v1877_v13 = vadd.f32 %v1821_v2, %v7173_v16  ;;  %v6206_v16 = vld [vmem:[%s8158_s3 + $0xd0] sm:$0xff] }
 0x2ee   :  { %v2208_v17 = vpop.f32.mrf.mxu0  ;;  %2935 = vmatpush.bf16.msrb.mxu1 %v6206_v16 }
 0x2ef   :  { %v2593_v19 = vunpack.c.l.b16 %v2372_v63  ;;  %v2273_v53 = vadd.f32 %v2208_v17, %v2081_v3  ;;  %v2086_v27 = vadd.f32 %v7400_v44, %v1876_v21 }
 0x2f1   :  { %2247 = vmatmul.bf16.gmra.mxu0 %v7131_v37  ;;  %v2597_v23 = vpack.c.b16 %v2593_v19, %v2592_v50  ;;  %v2309_v32 = vadd.f32 %v7307_v54, %v2273_v53  ;;  %v2033_v60 = vpop.f32.mrf.mxu3 }
 0x2f3   :  { %2673 = vmatmul.bf16.gmra.mxu2 %v2597_v23  ;;  %2795 = vmatmul.bf16.vlgmr.msra.gmra.mxu3 %v2597_v23  ;;  %v2341_v11 = vmax.f32 %v2309_v32, 0.0  ;;  %v1826_v53 = vpop.f32.mrf.mxu2 }
 0x2f5   :  { %v2373_v33 = vpack.c.bf16 %v2341_v11, %v2341_v11 }
 0x2f6   :  { %v2210_v41 = vpop.f32.mrf.mxu0 }
 0x2f7   :  { %v2274_v14 = vadd.f32 %v2210_v41, %v2082_v61  ;;  %v2452_v51 = vunpack.c.l.b16 %v2373_v33  ;;  %v6107_v61 = vld [vmem:[%s8157_s0 + $0x280] sm:$0xff] }
 0x2f9   :  { %v2310_v37 = vadd.f32 %v7307_v54, %v2274_v14  ;;  %v2036_v11 = vpop.f32.mrf.mxu3 }
 0x2fb   :  { %v2342_v52 = vmax.f32 %v2310_v37, 0.0  ;;  %v1828_v33 = vpop.f32.mrf.mxu2 }
 0x2fd   :  { %v2374_v10 = vpack.c.bf16 %v2342_v52, %v2342_v52 }
 0x2fe   :  { %v2213_v25 = vpop.f32.mrf.mxu0 }
 0x2ff   :  { %v2453_v3 = vunpack.c.l.b16 %v2374_v10  ;;  %v2275_v63 = vadd.f32 %v2213_v25, %v2083_v43 }
 0x301   :  { %v7418_v17 = vpack.c.b16 %v2453_v3, %v2452_v51  ;;  %2252 = vmatmul.bf16.gmra.mxu0 %v7158_v40  ;;  %v2311_v57 = vadd.f32 %v7307_v54, %v2275_v63  ;;  %v2038_v25 = vpop.f32.mrf.mxu3  ;;  %v2087_v63 = vadd.f32 %v2031_v7, %v1877_v13 }
 0x303   :  { %2553 = vmatmul.bf16.gmra.mxu1 %v7418_v17  ;;  %2678 = vmatmul.bf16.gmra.mxu2 %v7418_v17  ;;  %v2343_v50 = vmax.f32 %v2311_v57, 0.0  ;;  %v1668_v57 = vadd.f32 %v7181_v12, %v7184_v15  ;;  %v1831_v44 = vpop.f32.mrf.mxu2 }
 0x304   :  { %2800 = vmatmul.bf16.gmra.mxu3 %v7418_v17 }
 0x305   :  { %v2375_v18 = vpack.c.bf16 %v2343_v50, %v2343_v50 }
 0x306   :  { %v2215_v6 = vpop.f32.mrf.mxu0 }
 0x307   :  { %v2276_v19 = vadd.f32 %v2215_v6, %v2084_v34  ;;  %v2454_v14 = vunpack.c.l.b16 %v2375_v18 }
 0x309   :  { %v2312_v40 = vadd.f32 %v7307_v54, %v2276_v19  ;;  %v1878_v19 = vadd.f32 %v1823_v48, %v1668_v57  ;;  %v2041_v2 = vpop.f32.mrf.mxu3 }
 0x30b   :  { %v2344_v23 = vmax.f32 %v2312_v40, 0.0  ;;  %v2088_v7 = vadd.f32 %v2033_v60, %v1878_v19 }
 0x30d   :  { %v2376_v32 = vpack.c.bf16 %v2344_v23, %v2344_v23  ;;  %v1879_v23 = vadd.f32 %v1826_v53, %v7187_v45 }
 0x30e   :  { %v2218_v41 = vpop.f32.mrf.mxu0 }
 0x30f   :  { %v2455_v39 = vunpack.c.l.b16 %v2376_v32  ;;  %v2277_v37 = vadd.f32 %v2218_v41, %v2085_v24  ;;  %v1833_v24 = vpop.f32.mrf.mxu2  ;;  %v2089_v41 = vadd.f32 %v2036_v11, %v1879_v23 }
 0x311   :  { %v7438_v28 = vpack.c.b16 %v2455_v39, %v2454_v14  ;;  %2257 = vmatmul.bf16.gmra.mxu0 %v6107_v61  ;;  %v2313_v52 = vadd.f32 %v7307_v54, %v2277_v37  ;;  %v2043_v5 = vpop.f32.mrf.mxu3  ;;  %v1670_v37 = vadd.f32 %v7192_v59, %v7195_v38  ;;  %v1881_v59 = vadd.f32 %v1831_v44, %v7198_v46  ;;  %v7473_v44 = vpop.f32.mrf.mxu1 }
 0x313   :  { %2558 = vmatmul.bf16.gmra.mxu1 %v7438_v28  ;;  %2683 = vmatmul.bf16.gmra.mxu2 %v7438_v28  ;;  %v2345_v43 = vmax.f32 %v2313_v52, 0.0  ;;  %v1880_v52 = vadd.f32 %v1828_v33, %v1670_v37 }
 0x314   :  { %2805 = vmatmul.bf16.gmra.mxu3 %v7438_v28 }
 0x315   :  { %v2377_v51 = vpack.c.bf16 %v2345_v43, %v2345_v43  ;;  %v2090_v53 = vadd.f32 %v2038_v25, %v1880_v52  ;;  %v1672_v25 = vadd.f32 %v7206_v22, %v7209_v49 }
 0x316   :  { %v2220_v8 = vpop.f32.mrf.mxu0 }
 0x317   :  { %v2278_v10 = vadd.f32 %v2220_v8, %v2086_v27  ;;  %v2456_v34 = vunpack.c.l.b16 %v2377_v51  ;;  %v1836_v45 = vpop.f32.mrf.mxu2 }
 0x319   :  { %v2314_v36 = vadd.f32 %v7307_v54, %v2278_v10  ;;  %v2046_v10 = vpop.f32.mrf.mxu3 }
 0x31b   :  { %v2346_v3 = vmax.f32 %v2314_v36, 0.0  ;;  %v6205_v36 = vld [vmem:[%s8158_s3 + $0xc8] sm:$0xff] }
 0x31c   :  { %2936 = vmatpush.bf16.msrb.mxu1 %v6205_v36 }
 0x31d   :  { %v2378_v20 = vpack.c.bf16 %v2346_v3, %v2346_v3  ;;  %v2091_v3 = vadd.f32 %v2041_v2, %v1881_v59 }
 0x31e   :  { %v2223_v55 = vpop.f32.mrf.mxu0 }
 0x31f   :  { %v2457_v6 = vunpack.c.l.b16 %v2378_v20  ;;  %v2279_v50 = vadd.f32 %v2223_v55, %v2087_v63  ;;  %v1838_v20 = vpop.f32.mrf.mxu2 }
 0x321   :  { %v7449_v29 = vpack.c.b16 %v2457_v6, %v2456_v34  ;;  %v2315_v40 = vadd.f32 %v7307_v54, %v2279_v50  ;;  %v1882_v50 = vadd.f32 %v1833_v24, %v1672_v25  ;;  %v2048_v19 = vpop.f32.mrf.mxu3 }
 0x323   :  { %2563 = vmatmul.bf16.gmra.mxu1 %v7449_v29  ;;  %v2347_v12 = vmax.f32 %v2315_v40, 0.0  ;;  %v2092_v2 = vadd.f32 %v2043_v5, %v1882_v50 }
 0x325   :  { %v2379_v32 = vpack.c.bf16 %v2347_v12, %v2347_v12  ;;  %v1883_v12 = vadd.f32 %v1836_v45, %v7218_v26 }
 0x326   :  { %v2225_v18 = vpop.f32.mrf.mxu0 }
 0x327   :  { %v2280_v15 = vadd.f32 %v2225_v18, %v2088_v7  ;;  %v2594_v1 = vunpack.c.l.b16 %v2379_v32  ;;  %v6204_v7 = vld [vmem:[%s8158_s3 + $0xc0] sm:$0xff]  ;;  %v1841_v18 = vpop.f32.mrf.mxu2 }
 0x328   :  { %2937 = vmatpush.bf16.msrb.mxu1 %v6204_v7 }
 0x329   :  { %v2316_v48 = vadd.f32 %v7307_v54, %v2280_v15  ;;  %v2051_v23 = vpop.f32.mrf.mxu3 }
 0x32b   :  { %v2348_v61 = vmax.f32 %v2316_v48, 0.0 }
 0x32d   :  { %v2380_v14 = vpack.c.bf16 %v2348_v61, %v2348_v61  ;;  %v2093_v61 = vadd.f32 %v2046_v10, %v1883_v12 }
 0x32e   :  { %v2228_v39 = vpop.f32.mrf.mxu0 }
 0x32f   :  { %v2595_v21 = vunpack.c.l.b16 %v2380_v14  ;;  %v2281_v60 = vadd.f32 %v2228_v39, %v2089_v41  ;;  %v1674_v14 = vadd.f32 %v7223_v0, %v7226_v42  ;;  %v1843_v26 = vpop.f32.mrf.mxu2 }
 0x331   :  { %v2598_v27 = vpack.c.b16 %v2595_v21, %v2594_v1  ;;  %v2317_v8 = vadd.f32 %v7307_v54, %v2281_v60  ;;  %v1884_v21 = vadd.f32 %v1838_v20, %v1674_v14 }
 0x333   :  { %2688 = vmatmul.bf16.gmra.mxu2 %v2598_v27  ;;  %2810 = vmatmul.bf16.gmra.mxu3 %v2598_v27  ;;  %v2349_v11 = vmax.f32 %v2317_v8, 0.0  ;;  %v2094_v27 = vadd.f32 %v2048_v19, %v1884_v21  ;;  %v2053_v8 = vpop.f32.mrf.mxu3 }
 0x335   :  { %v2381_v33 = vpack.c.bf16 %v2349_v11, %v2349_v11 }
 0x336   :  { %v2230_v43 = vpop.f32.mrf.mxu0 }
 0x337   :  { %v2282_v13 = vadd.f32 %v2230_v43, %v2090_v53  ;;  %v2458_v57 = vunpack.c.l.b16 %v2381_v33  ;;  %v1885_v43 = vadd.f32 %v1841_v18, %v7229_v30  ;;  %v1846_v36 = vpop.f32.mrf.mxu2 }
 0x339   :  { %v2318_v38 = vadd.f32 %v7307_v54, %v2282_v13  ;;  %v2095_v59 = vadd.f32 %v2051_v23, %v1885_v43 }
 0x33b   :  { %v2350_v51 = vmax.f32 %v2318_v38, 0.0 }
 0x33d   :  { %v2382_v63 = vpack.c.bf16 %v2350_v51, %v2350_v51  ;;  %v1676_v51 = vadd.f32 %v7237_v35, %v7240_v56  ;;  %v6283_v35 = vld [vmem:[%s8160_s5 + $0x238] sm:$0xff]  ;;  %v1887_v56 = vadd.f32 %v1846_v36, %v7249_v4 }
 0x33e   :  { %v2233_v55 = vpop.f32.mrf.mxu0  ;;  %3822 = vmatpush.bf16.msrb.mxu0 %v6283_v35 }
 0x33f   :  { %v2459_v34 = vunpack.c.l.b16 %v2382_v63  ;;  %v2283_v6 = vadd.f32 %v2233_v55, %v2091_v3  ;;  %v2056_v3 = vpop.f32.mrf.mxu3  ;;  %v1848_v50 = vpop.f32.mrf.mxu2 }
 0x340   :  { %v7481_v32 = vpop.f32.mrf.mxu1  ;;  %v2097_v12 = vadd.f32 %v2056_v3, %v1887_v56  ;;  %v6282_v3 = vld [vmem:[%s8160_s5 + $0x230] sm:$0xff] }
 0x341   :  { %v7468_v16 = vpack.c.b16 %v2459_v34, %v2458_v57  ;;  %v2319_v46 = vadd.f32 %v7307_v54, %v2283_v6  ;;  %v1886_v57 = vadd.f32 %v1843_v26, %v1676_v51 }
 0x342   :  { %3823 = vmatpush.bf16.msrb.mxu0 %v6282_v3  ;;  %v6215_v3 = vld [vmem:[%s8160_s5 + $0x18] sm:$0xff] }
 0x343   :  { %2568 = vmatmul.bf16.gmra.mxu1 %v7468_v16  ;;  %2693 = vmatmul.bf16.gmra.mxu2 %v7468_v16  ;;  %v2351_v22 = vmax.f32 %v2319_v46, 0.0  ;;  %v2096_v6 = vadd.f32 %v2053_v8, %v1886_v57 }
 0x344   :  { %2815 = vmatmul.bf16.gmra.mxu3 %v7468_v16 }
 0x345   :  { %v2383_v48 = vpack.c.bf16 %v2351_v22, %v2351_v22 }
 0x346   :  { %v2235_v40 = vpop.f32.mrf.mxu0 }
 0x347   :  { %v2284_v49 = vadd.f32 %v2235_v40, %v2092_v2  ;;  %v2460_v39 = vunpack.c.l.b16 %v2383_v48  ;;  %v2058_v40 = vpop.f32.mrf.mxu3  ;;  %v1678_v48 = vadd.f32 %v7254_v58, %v7257_v31 }
 0x348   :  { %v7491_v45 = vpop.f32.mrf.mxu1 }
 0x349   :  { %v2320_v15 = vadd.f32 %v7307_v54, %v2284_v49  ;;  %v1888_v14 = vadd.f32 %v1848_v50, %v1678_v48 }
 0x34b   :  { %v2352_v24 = vmax.f32 %v2320_v15, 0.0  ;;  %v2098_v21 = vadd.f32 %v2058_v40, %v1888_v14 }
 0x34d   :  { %v2384_v41 = vpack.c.bf16 %v2352_v24, %v2352_v24 }
 0x34e   :  { %v2238_v5 = vpop.f32.mrf.mxu0 }
 0x34f   :  { %v2461_v37 = vunpack.c.l.b16 %v2384_v41  ;;  %v2285_v1 = vadd.f32 %v2238_v5, %v2093_v61  ;;  %v1851_v5 = vpop.f32.mrf.mxu2 }
 0x350   :  { %v7497_v25 = vpop.f32.mrf.mxu1  ;;  %v1889_v58 = vadd.f32 %v1851_v5, %v7266_v9 }
 0x351   :  { %v7485_v60 = vpack.c.b16 %v2461_v37, %v2460_v39  ;;  %v2321_v52 = vadd.f32 %v7307_v54, %v2285_v1  ;;  %v2061_v39 = vpop.f32.mrf.mxu3 }
 0x353   :  { %2573 = vmatmul.bf16.gmra.mxu1 %v7485_v60  ;;  %2698 = vmatmul.bf16.gmra.mxu2 %v7485_v60  ;;  %v2353_v42 = vmax.f32 %v2321_v52, 0.0 }
 0x354   :  { %2820 = vmatmul.bf16.gmra.mxu3 %v7485_v60 }
 0x355   :  { %v2385_v11 = vpack.c.bf16 %v2353_v42, %v2353_v42 }
 0x356   :  { %v2240_v0 = vpop.f32.mrf.mxu0 }
 0x357   :  { %v2286_v53 = vadd.f32 %v2240_v0, %v2094_v27  ;;  %v2462_v63 = vunpack.c.l.b16 %v2385_v11  ;;  %v1853_v8 = vpop.f32.mrf.mxu2 }
 0x358   :  { %v7508_v49 = vpop.f32.mrf.mxu1 }
 0x359   :  { %v2322_v10 = vadd.f32 %v7307_v54, %v2286_v53  ;;  %v2099_v53 = vadd.f32 %v2061_v39, %v1889_v58  ;;  %v2063_v43 = vpop.f32.mrf.mxu3 }
 0x35b   :  { %v2354_v13 = vmax.f32 %v2322_v10, 0.0 }
 0x35d   :  { %v2386_v38 = vpack.c.bf16 %v2354_v13, %v2354_v13 }
 0x35e   :  { %v2243_v33 = vpop.f32.mrf.mxu0 }
 0x35f   :  { %v2463_v20 = vunpack.c.l.b16 %v2386_v38  ;;  %v2287_v55 = vadd.f32 %v2243_v33, %v2095_v59 }
 0x360   :  { %v7514_v1 = vpop.f32.mrf.mxu1 }
 0x361   :  { %v7499_v34 = vpack.c.b16 %v2463_v20, %v2462_v63  ;;  %v2323_v30 = vadd.f32 %v7307_v54, %v2287_v55  ;;  %v1856_v63 = vpop.f32.mrf.mxu2 }
 0x363   :  { %2578 = vmatmul.bf16.gmra.mxu1 %v7499_v34  ;;  %v2355_v46 = vmax.f32 %v2323_v30, 0.0  ;;  %v2066_v30 = vpop.f32.mrf.mxu3 }
 0x365   :  { %v2387_v7 = vpack.c.bf16 %v2355_v46, %v2355_v46 }
 0x366   :  { %v2245_v19 = vpop.f32.mrf.mxu0 }
 0x367   :  { %v2288_v2 = vadd.f32 %v2245_v19, %v2096_v6  ;;  %v2727_v24 = vunpack.c.l.b16 %v2387_v7  ;;  %v8177_v6 = vld [vmem:[#allocation2_spill] sm:$0xff] }
 0x368   :  { %v7518_v11 = vpop.f32.mrf.mxu1  ;;  %v1891_v50 = vadd.f32 %v1856_v63, %v8177_v6 }
 0x369   :  { %v2324_v22 = vadd.f32 %v7307_v54, %v2288_v2  ;;  %v1858_v56 = vpop.f32.mrf.mxu2 }
 0x36b   :  { %v2356_v18 = vmax.f32 %v2324_v22, 0.0  ;;  %v8178_v22 = vld [vmem:[#allocation4_spill] sm:$0xff] }
 0x36c   :  { %v1682_v7 = vadd.f32 %v7473_v44, %v8178_v22  ;;  %v6227_v44 = vld [vmem:[%s8160_s5 + $0x78] sm:$0xff]  ;;  %v6234_v22 = vld [vmem:[%s8160_s5 + $0xb0] sm:$0xff] }
 0x36d   :  { %v2388_v15 = vpack.c.bf16 %v2356_v18, %v2356_v18  ;;  %3147 = vmatpush.bf16.msrb.mxu2 %v6227_v44  ;;  %v6243_v44 = vld [vmem:[%s8160_s5 + $0xf8] sm:$0xff] }
 0x36e   :  { %v2248_v23 = vpop.f32.mrf.mxu0  ;;  %v1892_v48 = vadd.f32 %v1858_v56, %v1682_v7 }
 0x36f   :  { %v2728_v61 = vunpack.c.l.b16 %v2388_v15  ;;  %v2289_v41 = vadd.f32 %v2248_v23, %v2097_v12 }
 0x371   :  { %v2733_v4 = vpack.c.b16 %v2728_v61, %v2727_v24  ;;  %v2325_v37 = vadd.f32 %v7307_v54, %v2289_v41  ;;  %v2068_v61 = vpop.f32.mrf.mxu3 }
 0x372   :  { %v2102_v5 = vadd.f32 %v2068_v61, %v1892_v48 }
 0x373   :  { %2825 = vmatmul.bf16.gmra.mxu3 %v2733_v4  ;;  %2938 = vmatmul.bf16.vlgmr.msrb.gmra.mxu1 %v7418_v17  ;;  %v2357_v52 = vmax.f32 %v2325_v37, 0.0  ;;  %v1680_v17 = vadd.f32 %v7274_v62, %v7277_v47  ;;  %v6219_v37 = vld [vmem:[%s8160_s5 + $0x38] sm:$0xff] }
 0x374   :  { %3215 = vmatpush.bf16.msrb.mxu3 %v6219_v37 }
 0x375   :  { %v2389_v0 = vpack.c.bf16 %v2357_v52, %v2357_v52  ;;  %v1890_v33 = vadd.f32 %v1853_v8, %v1680_v17  ;;  %v6217_v17 = vld [vmem:[%s8160_s5 + $0x28] sm:$0xff] }
 0x376   :  { %v2250_v26 = vpop.f32.mrf.mxu0 }
 0x377   :  { %v2290_v27 = vadd.f32 %v2250_v26, %v2098_v21  ;;  %v2729_v36 = vunpack.c.l.b16 %v2389_v0  ;;  %v2100_v20 = vadd.f32 %v2063_v43, %v1890_v33  ;;  %v6281_v0 = vld [vmem:[%s8160_s5 + $0x228] sm:$0xff]  ;;  %v6218_v43 = vld [vmem:[%s8160_s5 + $0x30] sm:$0xff] }
 0x378   :  { %3824 = vmatpush.bf16.msrb.mxu0 %v6281_v0  ;;  %3216 = vmatpush.bf16.msrb.mxu3 %v6218_v43  ;;  %v6229_v43 = vld [vmem:[%s8160_s5 + $0x88] sm:$0xff] }
 0x379   :  { %v2326_v31 = vadd.f32 %v7307_v54, %v2290_v27 }
 0x37b   :  { %v2358_v42 = vmax.f32 %v2326_v31, 0.0 }
 0x37c   :  { %3217 = vmatpush.bf16.msrb.mxu3 %v6217_v17 }
 0x37d   :  { %v2390_v10 = vpack.c.bf16 %v2358_v42, %v2358_v42 }
 0x37e   :  { %v2253_v13 = vpop.f32.mrf.mxu0 }
 0x37f   :  { %v2730_v59 = vunpack.c.l.b16 %v2390_v10  ;;  %v2291_v38 = vadd.f32 %v2253_v13, %v2099_v53  ;;  %v6225_v13 = vld [vmem:[%s8160_s5 + $0x68] sm:$0xff] }
 0x380   :  { %v7530_v62 = vpop.f32.mrf.mxu1 }
 0x381   :  { %v7522_v51 = vpack.c.b16 %v2730_v59, %v2729_v36  ;;  %v2327_v9 = vadd.f32 %v7307_v54, %v2291_v38  ;;  %v2659_v59 = vpop.f32.mrf.mxu2  ;;  %v2796_v38 = vpop.f32.mrf.mxu3 }
 0x383   :  { %2830 = vmatmul.bf16.gmra.mxu3 %v7522_v51  ;;  %2943 = vmatmul.bf16.gmra.mxu1 %v7438_v28  ;;  %v2359_v55 = vmax.f32 %v2327_v9, 0.0  ;;  %v2101_v28 = vadd.f32 %v2066_v30, %v1891_v50  ;;  %v6216_v9 = vld [vmem:[%s8160_s5 + $0x20] sm:$0xff]  ;;  %v6213_v30 = vld [vmem:[%s8160_s5 + $0x8] sm:$0xff] }
 0x384   :  { %3218 = vmatpush.bf16.msrb.mxu3 %v6216_v9  ;;  %v6221_v50 = vld [vmem:[%s8160_s5 + $0x48] sm:$0xff] }
 0x385   :  { %v2391_v46 = vpack.c.bf16 %v2359_v55, %v2359_v55  ;;  %v6223_v55 = vld [vmem:[%s8160_s5 + $0x58] sm:$0xff] }
 0x386   :  { %v2255_v47 = vpop.f32.mrf.mxu0 }
 0x387   :  { %v2292_v57 = vadd.f32 %v2255_v47, %v2100_v20  ;;  %v2731_v18 = vunpack.c.l.b16 %v2391_v46  ;;  %v6212_v46 = vld [vmem:[%s8160_s5] sm:$0xff] }
 0x388   :  { %v7536_v23 = vpop.f32.mrf.mxu1  ;;  %3219 = vmatpush.bf16.msrb.mxu3 %v6215_v3 }
 0x389   :  { %v2328_v19 = vadd.f32 %v7307_v54, %v2292_v57  ;;  %v2661_v63 = vpop.f32.mrf.mxu2  ;;  %v2798_v20 = vpop.f32.mrf.mxu3  ;;  %v6222_v57 = vld [vmem:[%s8160_s5 + $0x50] sm:$0xff] }
 0x38b   :  { %v2360_v2 = vmax.f32 %v2328_v19, 0.0 }
 0x38d   :  { %v2392_v35 = vpack.c.bf16 %v2360_v2, %v2360_v2 }
 0x38e   :  { %v2258_v40 = vpop.f32.mrf.mxu0 }
 0x38f   :  { %v2732_v12 = vunpack.c.l.b16 %v2392_v35  ;;  %v2293_v15 = vadd.f32 %v2258_v40, %v2101_v28  ;;  %v6220_v28 = vld [vmem:[%s8160_s5 + $0x40] sm:$0xff]  ;;  %v6235_v35 = vld [vmem:[%s8160_s5 + $0xb8] sm:$0xff] }
 0x390   :  { %v7550_v26 = vpop.f32.mrf.mxu1  ;;  %v6279_v40 = vld [vmem:[%s8160_s5 + $0x218] sm:$0xff] }
 0x391   :  { %v7538_v24 = vpack.c.b16 %v2732_v12, %v2731_v18  ;;  %v2329_v41 = vadd.f32 %v7307_v54, %v2293_v15  ;;  %v2664_v19 = vpop.f32.mrf.mxu2  ;;  %v2801_v2 = vpop.f32.mrf.mxu3  ;;  %v2660_v12 = vadd.f32 %v2659_v59, %v7481_v32  ;;  %v6233_v15 = vld [vmem:[%s8160_s5 + $0xa8] sm:$0xff]  ;;  %v2662_v32 = vadd.f32 %v2661_v63, %v7491_v45  ;;  %v6230_v45 = vld [vmem:[%s8160_s5 + $0x90] sm:$0xff]  ;;  %v6228_v63 = vld [vmem:[%s8160_s5 + $0x80] sm:$0xff] }
 0x393   :  { %2835 = vmatmul.bf16.gmra.mxu3 %v7538_v24  ;;  %2948 = vmatmul.bf16.gmra.mxu1 %v7449_v29  ;;  %v2361_v4 = vmax.f32 %v2329_v41, 0.0  ;;  %v2841_v48 = vadd.f32 %v2796_v38, %v2660_v12  ;;  %v7641_v41 = vld [vmem:[%s8161_s4] ss:$0 sm:$0xff] }
 0x395   :  { %v2393_v52 = vpack.c.bf16 %v2361_v4, %v2361_v4 }
 0x396   :  { %v2260_v14 = vpop.f32.mrf.mxu0 }
 0x397   :  { %v2294_v39 = vadd.f32 %v2260_v14, %v2102_v5  ;;  %v2878_v58 = vunpack.c.l.b16 %v2393_v52  ;;  %v6232_v5 = vld [vmem:[%s8160_s5 + $0xa0] sm:$0xff] }
 0x398   :  { %v7558_v42 = vpop.f32.mrf.mxu1 }
 0x399   :  { %v2330_v21 = vadd.f32 %v7307_v54, %v2294_v39  ;;  %v6226_v54 = vld [vmem:[%s8160_s5 + $0x70] sm:$0xff]  ;;  %v2666_v7 = vpop.f32.mrf.mxu2  ;;  %v2803_v18 = vpop.f32.mrf.mxu3  ;;  %v6231_v39 = vld [vmem:[%s8160_s5 + $0x98] sm:$0xff] }
 0x39a   :  { %3148 = vmatpush.bf16.msrb.mxu2 %v6226_v54 }
 0x39b   :  { %v2362_v29 = vmax.f32 %v2330_v21, 0.0  ;;  %v2842_v21 = vadd.f32 %v2798_v20, %v2662_v32  ;;  %v6240_v20 = vld [vmem:[%s8160_s5 + $0xe0] sm:$0xff] }
 0x39d   :  { %v2394_v27 = vpack.c.bf16 %v2362_v29, %v2362_v29 }
 0x39e   :  { %3149 = vmatpush.bf16.msrb.mxu2 %v6225_v13  ;;  %v6241_v13 = vld [vmem:[%s8160_s5 + $0xe8] sm:$0xff] }
 0x39f   :  { %v2879_v31 = vunpack.c.l.b16 %v2394_v27 }
 0x3a0   :  { %v7563_v53 = vpop.f32.mrf.mxu1 }
 0x3a1   :  { %v7552_v8 = vpack.c.b16 %v2879_v31, %v2878_v58  ;;  %v2669_v14 = vpop.f32.mrf.mxu2  ;;  %v2806_v37 = vpop.f32.mrf.mxu3  ;;  %v6242_v58 = vld [vmem:[%s8160_s5 + $0xf0] sm:$0xff] }
 0x3a3   :  { %2953 = vmatmul.bf16.gmra.mxu1 %v7468_v16 }
 0x3a8   :  { %v7569_v16 = vpop.f32.mrf.mxu1 }
 0x3a9   :  { %v2671_v17 = vpop.f32.mrf.mxu2  ;;  %v2808_v38 = vpop.f32.mrf.mxu3 }
 0x3b3   :  { %2958 = vmatmul.bf16.gmra.mxu1 %v7485_v60  ;;  %v6280_v60 = vld [vmem:[%s8160_s5 + $0x220] sm:$0xff] }
 0x3b4   :  { %3825 = vmatpush.bf16.msrb.mxu0 %v6280_v60 }
 0x3b8   :  { %3826 = vmatpush.bf16.msrb.mxu0 %v6279_v40  ;;  %v6278_v40 = vld [vmem:[%s8160_s5 + $0x210] sm:$0xff] }
 0x3bc   :  { %3827 = vmatpush.bf16.msrb.mxu0 %v6278_v40 }
 0x3c0   :  { %v7571_v10 = vpop.f32.mrf.mxu1 }
 0x3c3   :  { %2963 = vmatmul.bf16.gmra.mxu1 %v7499_v34  ;;  %v6224_v34 = vld [vmem:[%s8160_s5 + $0x60] sm:$0xff] }
 0x3c4   :  { %3150 = vmatpush.bf16.msrb.mxu2 %v6224_v34 }
 0x3c8   :  { %v7583_v36 = vpop.f32.mrf.mxu1  ;;  %3151 = vmatpush.bf16.msrb.mxu2 %v6223_v55 }
 0x3cc   :  { %3152 = vmatpush.bf16.msrb.mxu2 %v6222_v57 }
 0x3d0   :  { %v7585_v33 = vpop.f32.mrf.mxu1  ;;  %3153 = vmatpush.bf16.msrb.mxu2 %v6221_v50  ;;  %v2674_v50 = vpop.f32.mrf.mxu2 }
 0x3d3   :  { %2968 = vmatmul.bf16.gmra.mxu1 %v7522_v51  ;;  %v6214_v51 = vld [vmem:[%s8160_s5 + $0x10] sm:$0xff] }
 0x3d4   :  { %3220 = vmatpush.bf16.msrb.mxu3 %v6214_v51  ;;  %3154 = vmatpush.bf16.msrb.mxu2 %v6220_v28  ;;  %v2667_v51 = vadd.f32 %v2666_v7, %v7508_v49  ;;  %v6238_v49 = vld [vmem:[%s8160_s5 + $0xd0] sm:$0xff]  ;;  %v2670_v7 = vadd.f32 %v2669_v14, %v7514_v1  ;;  %v6251_v1 = vld [vmem:[%s8160_s5 + $0x138] sm:$0xff] }
 0x3d8   :  { %v7597_v47 = vpop.f32.mrf.mxu1  ;;  %3221 = vmatpush.bf16.msrb.mxu3 %v6213_v30  ;;  %3300 = vmatpush.bf16.msra.mxu2 %v6235_v35  ;;  %v6239_v30 = vld [vmem:[%s8160_s5 + $0xd8] sm:$0xff] }
 0x3dc   :  { %3222 = vmatpush.bf16.msrb.mxu3 %v6212_v46  ;;  %3301 = vmatpush.bf16.msra.mxu2 %v6234_v22  ;;  %v2811_v46 = vpop.f32.mrf.mxu3 }
 0x3e0   :  { %v7611_v6 = vpop.f32.mrf.mxu1  ;;  %3302 = vmatpush.bf16.msra.mxu2 %v6233_v15  ;;  %3387 = vmatpush.bf16.msra.mxu3 %v6243_v44  ;;  %v6237_v15 = vld [vmem:[%s8160_s5 + $0xc8] sm:$0xff]  ;;  %v6236_v44 = vld [vmem:[%s8160_s5 + $0xc0] sm:$0xff] }
 0x3e3   :  { %2973 = vmatmul.bf16.gmra.mxu1 %v7538_v24 }
 0x3e4   :  { %3303 = vmatpush.bf16.msra.mxu2 %v6232_v5  ;;  %3388 = vmatpush.bf16.msra.mxu3 %v6242_v58  ;;  %v2676_v5 = vpop.f32.mrf.mxu2 }
 0x3e8   :  { %v7626_v56 = vpop.f32.mrf.mxu1  ;;  %3304 = vmatpush.bf16.msra.mxu2 %v6231_v39  ;;  %3389 = vmatpush.bf16.msra.mxu3 %v6241_v13 }
 0x3ec   :  { %3305 = vmatpush.bf16.msra.mxu2 %v6230_v45  ;;  %3390 = vmatpush.bf16.msra.mxu3 %v6240_v20 }
 0x3f0   :  { %v2939_v24 = vpop.f32.mrf.mxu1  ;;  %3306 = vmatpush.bf16.msra.mxu2 %v6229_v43  ;;  %3391 = vmatpush.bf16.msra.mxu3 %v6239_v30  ;;  %v2677_v30 = vadd.f32 %v2676_v5, %v7536_v23  ;;  %v6277_v23 = vld [vmem:[%s8160_s5 + $0x208] sm:$0xff]  ;;  %v6244_v5 = vld [vmem:[%s8160_s5 + $0x100] sm:$0xff] }
 0x3f1   :  { %v2984_v61 = vadd.f32 %v2939_v24, %v2841_v48  ;;  %v2845_v48 = vadd.f32 %v2806_v37, %v2670_v7  ;;  %v2672_v37 = vadd.f32 %v2671_v17, %v7518_v11  ;;  %v6258_v11 = vld [vmem:[%s8160_s5 + $0x170] sm:$0xff]  ;;  %v2675_v17 = vadd.f32 %v2674_v50, %v7530_v62  ;;  %v6256_v62 = vld [vmem:[%s8160_s5 + $0x160] sm:$0xff]  ;;  %3828 = vmatpush.bf16.msrb.mxu0 %v6277_v23 }
 0x3f2   :  { %v6254_v7 = vld [vmem:[%s8160_s5 + $0x150] sm:$0xff] }
 0x3f3   :  { %2978 = vmatmul.bf16.gmra.mxu1 %v7552_v8  ;;  %v3006_v4 = vadd.f32 %v7641_v41, %v2984_v61  ;;  %v2665_v8 = vadd.f32 %v2664_v19, %v7497_v25  ;;  %v2844_v19 = vadd.f32 %v2803_v18, %v2667_v51  ;;  %v2846_v45 = vadd.f32 %v2808_v38, %v2672_v37  ;;  %v6257_v38 = vld [vmem:[%s8160_s5 + $0x168] sm:$0xff]  ;;  %v6247_v51 = vld [vmem:[%s8160_s5 + $0x118] sm:$0xff] }
 0x3f4   :  { %3307 = vmatpush.bf16.msra.mxu2 %v6228_v63  ;;  %3392 = vmatpush.bf16.msra.mxu3 %v6238_v49 }
 0x3f5   :  { %v3024_v29 = vmax.f32 %v3006_v4, 0.0  ;;  %v2843_v60 = vadd.f32 %v2801_v2, %v2665_v8 }
 0x3f7   :  { %v3042_v0 = vpack.c.bf16 %v3024_v29, %v3024_v29  ;;  %v6259_v29 = vld [vmem:[%s8160_s5 + $0x178] sm:$0xff] }
 0x3f8   :  { %v2941_v52 = vpop.f32.mrf.mxu1  ;;  %3393 = vmatpush.bf16.msra.mxu3 %v6237_v15 }
 0x3f9   :  { %v2985_v27 = vadd.f32 %v2941_v52, %v2842_v21  ;;  %v3163_v34 = vunpack.c.l.b16 %v3042_v0  ;;  %v2813_v21 = vpop.f32.mrf.mxu3  ;;  %v6249_v0 = vld [vmem:[%s8160_s5 + $0x128] sm:$0xff] }
 0x3fb   :  { %v3007_v31 = vadd.f32 %v7641_v41, %v2985_v27  ;;  %v6250_v27 = vld [vmem:[%s8160_s5 + $0x130] sm:$0xff] }
 0x3fc   :  { %3394 = vmatpush.bf16.msra.mxu3 %v6236_v44  ;;  %v6267_v44 = vld [vmem:[%s8160_s5 + $0x1b8] sm:$0xff] }
 0x3fd   :  { %v3025_v54 = vmax.f32 %v3007_v31, 0.0 }
 0x3ff   :  { %v3043_v59 = vpack.c.bf16 %v3025_v54, %v3025_v54  ;;  %v2679_v54 = vpop.f32.mrf.mxu2 }
 0x400   :  { %v2944_v9 = vpop.f32.mrf.mxu1  ;;  %v2680_v15 = vadd.f32 %v2679_v54, %v7550_v26 }
 0x401   :  { %v3164_v3 = vunpack.c.l.b16 %v3043_v59  ;;  %v2986_v25 = vadd.f32 %v2944_v9, %v2843_v60  ;;  %v2816_v13 = vpop.f32.mrf.mxu3  ;;  %v6248_v9 = vld [vmem:[%s8160_s5 + $0x120] sm:$0xff] }
 0x403   :  { %v3165_v55 = vpack.c.b16 %v3164_v3, %v3163_v34  ;;  %v3008_v57 = vadd.f32 %v7641_v41, %v2986_v25  ;;  %v2847_v34 = vadd.f32 %v2811_v46, %v2675_v17  ;;  %v6255_v46 = vld [vmem:[%s8160_s5 + $0x158] sm:$0xff] }
 0x405   :  { %3223 = vmatmul.bf16.vlgmr.msrb.gmra.mxu3 %v3165_v55  ;;  %v3026_v28 = vmax.f32 %v3008_v57, 0.0 }
 0x406   :  { %3561 = vmatpush.bf16.msrb.mxu3 %v6259_v29 }
 0x407   :  { %v3044_v18 = vpack.c.bf16 %v3026_v28, %v3026_v28  ;;  %v2681_v50 = vpop.f32.mrf.mxu2  ;;  %v6246_v28 = vld [vmem:[%s8160_s5 + $0x110] sm:$0xff] }
 0x408   :  { %v2946_v2 = vpop.f32.mrf.mxu1 }
 0x409   :  { %v2987_v35 = vadd.f32 %v2946_v2, %v2844_v19  ;;  %v3095_v32 = vunpack.c.l.b16 %v3044_v18  ;;  %v2818_v2 = vpop.f32.mrf.mxu3  ;;  %v6245_v18 = vld [vmem:[%s8160_s5 + $0x108] sm:$0xff] }
 0x40a   :  { %3562 = vmatpush.bf16.msrb.mxu3 %v6258_v11  ;;  %v6265_v11 = vld [vmem:[%s8160_s5 + $0x1a8] sm:$0xff] }
 0x40b   :  { %v3009_v22 = vadd.f32 %v7641_v41, %v2987_v35  ;;  %v2848_v35 = vadd.f32 %v2813_v21, %v2677_v30 }
 0x40d   :  { %v3027_v12 = vmax.f32 %v3009_v22, 0.0 }
 0x40e   :  { %3563 = vmatpush.bf16.msrb.mxu3 %v6257_v38 }
 0x40f   :  { %v3045_v24 = vpack.c.bf16 %v3027_v12, %v3027_v12 }
 0x410   :  { %v2949_v61 = vpop.f32.mrf.mxu1 }
 0x411   :  { %v3096_v4 = vunpack.c.l.b16 %v3045_v24  ;;  %v2988_v39 = vadd.f32 %v2949_v61, %v2845_v48  ;;  %v6253_v61 = vld [vmem:[%s8160_s5 + $0x148] sm:$0xff]  ;;  %v2821_v26 = vpop.f32.mrf.mxu3 }
 0x412   :  { %3564 = vmatpush.bf16.msrb.mxu3 %v6256_v62 }
 0x413   :  { %v3097_v14 = vpack.c.b16 %v3096_v4, %v3095_v32  ;;  %v3010_v52 = vadd.f32 %v7641_v41, %v2988_v39  ;;  %v2684_v32 = vpop.f32.mrf.mxu2  ;;  %v2849_v4 = vadd.f32 %v2816_v13, %v2680_v15 }
 0x414   :  { %v2685_v38 = vadd.f32 %v2684_v32, %v7563_v53  ;;  %v6272_v53 = vld [vmem:[%s8160_s5 + $0x1e0] sm:$0xff] }
 0x415   :  { %3155 = vmatmul.bf16.vlgmr.msrb.gmra.mxu2 %v3097_v14  ;;  %v3028_v31 = vmax.f32 %v3010_v52, 0.0  ;;  %v6252_v52 = vld [vmem:[%s8160_s5 + $0x140] sm:$0xff] }
 0x416   :  { %3474 = vmatpush.bf16.msrb.mxu2 %v6251_v1  ;;  %3565 = vmatpush.bf16.msrb.mxu3 %v6255_v46  ;;  %v6262_v46 = vld [vmem:[%s8160_s5 + $0x190] sm:$0xff] }
 0x417   :  { %v3046_v60 = vpack.c.bf16 %v3028_v31, %v3028_v31  ;;  %v6275_v31 = vld [vmem:[%s8160_s5 + $0x1f8] sm:$0xff] }
 0x418   :  { %v2951_v58 = vpop.f32.mrf.mxu1 }
 0x419   :  { %v2989_v8 = vadd.f32 %v2951_v58, %v2846_v45  ;;  %v3248_v63 = vunpack.c.l.b16 %v3046_v60  ;;  %v2682_v45 = vadd.f32 %v2681_v50, %v7558_v42  ;;  %v6274_v42 = vld [vmem:[%s8160_s5 + $0x1f0] sm:$0xff]  ;;  %v2823_v17 = vpop.f32.mrf.mxu3 }
 0x41a   :  { %3475 = vmatpush.bf16.msrb.mxu2 %v6250_v27  ;;  %3566 = vmatpush.bf16.msrb.mxu3 %v6254_v7  ;;  %v6266_v27 = vld [vmem:[%s8160_s5 + $0x1b0] sm:$0xff] }
 0x41b   :  { %v3011_v43 = vadd.f32 %v7641_v41, %v2989_v8  ;;  %v2850_v8 = vadd.f32 %v2818_v2, %v2682_v45  ;;  %v2686_v54 = vpop.f32.mrf.mxu2 }
 0x41c   :  { %v2687_v2 = vadd.f32 %v2686_v54, %v7569_v16  ;;  %v6276_v16 = vld [vmem:[%s8160_s5 + $0x200] sm:$0xff] }
 0x41d   :  { %v3029_v59 = vmax.f32 %v3011_v43, 0.0  ;;  %3829 = vmatpush.bf16.msrb.mxu0 %v6276_v16 }
 0x41e   :  { %3476 = vmatpush.bf16.msrb.mxu2 %v6249_v0  ;;  %3567 = vmatpush.bf16.msrb.mxu3 %v6253_v61 }
 0x41f   :  { %v3047_v3 = vpack.c.bf16 %v3029_v59, %v3029_v59  ;;  %v6264_v59 = vld [vmem:[%s8160_s5 + $0x1a0] sm:$0xff] }
 0x420   :  { %v2954_v25 = vpop.f32.mrf.mxu1 }
 0x421   :  { %v3249_v20 = vunpack.c.l.b16 %v3047_v3  ;;  %v2990_v55 = vadd.f32 %v2954_v25, %v2847_v34  ;;  %v6273_v3 = vld [vmem:[%s8160_s5 + $0x1e8] sm:$0xff]  ;;  %v2851_v25 = vadd.f32 %v2821_v26, %v2685_v38  ;;  %v2826_v50 = vpop.f32.mrf.mxu3 }
 0x422   :  { %3477 = vmatpush.bf16.msrb.mxu2 %v6248_v9  ;;  %3568 = vmatpush.bf16.msrb.mxu3 %v6252_v52 }
 0x423   :  { %v3250_v57 = vpack.c.b16 %v3249_v20, %v3248_v63  ;;  %v3012_v19 = vadd.f32 %v7641_v41, %v2990_v55  ;;  %v6263_v20 = vld [vmem:[%s8160_s5 + $0x198] sm:$0xff]  ;;  %v2689_v62 = vpop.f32.mrf.mxu2 }
 0x424   :  { %v2690_v61 = vadd.f32 %v2689_v62, %v7571_v10 }
 0x425   :  { %3308 = vmatmul.bf16.vlgmr.msra.gmra.mxu2 %v3250_v57  ;;  %v3030_v49 = vmax.f32 %v3012_v19, 0.0 }
 0x426   :  { %3478 = vmatpush.bf16.msrb.mxu2 %v6247_v51 }
 0x427   :  { %v3048_v48 = vpack.c.bf16 %v3030_v49, %v3030_v49  ;;  %v6261_v49 = vld [vmem:[%s8160_s5 + $0x188] sm:$0xff] }
 0x428   :  { %v2956_v40 = vpop.f32.mrf.mxu1 }
 0x429   :  { %v2991_v22 = vadd.f32 %v2956_v40, %v2848_v35  ;;  %v3335_v1 = vunpack.c.l.b16 %v3048_v48  ;;  %v6271_v35 = vld [vmem:[%s8160_s5 + $0x1d8] sm:$0xff]  ;;  %v2852_v40 = vadd.f32 %v2823_v17, %v2687_v2  ;;  %v6260_v48 = vld [vmem:[%s8160_s5 + $0x180] sm:$0xff] }
 0x42a   :  { %3479 = vmatpush.bf16.msrb.mxu2 %v6246_v28 }
 0x42b   :  { %v3013_v12 = vadd.f32 %v7641_v41, %v2991_v22 }
 0x42d   :  { %v3031_v24 = vmax.f32 %v3013_v12, 0.0  ;;  %v2691_v12 = vpop.f32.mrf.mxu2 }
 0x42e   :  { %3480 = vmatpush.bf16.msrb.mxu2 %v6245_v18  ;;  %v6270_v18 = vld [vmem:[%s8160_s5 + $0x1d0] sm:$0xff] }
 0x42f   :  { %v3049_v39 = vpack.c.bf16 %v3031_v24, %v3031_v24  ;;  %v2828_v24 = vpop.f32.mrf.mxu3 }
 0x430   :  { %v2959_v21 = vpop.f32.mrf.mxu1 }
 0x431   :  { %v3336_v14 = vunpack.c.l.b16 %v3049_v39  ;;  %v2992_v37 = vadd.f32 %v2959_v21, %v2849_v4  ;;  %v6269_v4 = vld [vmem:[%s8160_s5 + $0x1c8] sm:$0xff]  ;;  %v2853_v39 = vadd.f32 %v2826_v50, %v2690_v61 }
 0x432   :  { %3481 = vmatpush.bf16.msrb.mxu2 %v6244_v5 }
 0x433   :  { %v3337_v29 = vpack.c.b16 %v3336_v14, %v3335_v1  ;;  %v3014_v58 = vadd.f32 %v7641_v41, %v2992_v37  ;;  %v6268_v37 = vld [vmem:[%s8160_s5 + $0x1c0] sm:$0xff] }
 0x435   :  { %3395 = vmatmul.bf16.vlgmr.msra.gmra.mxu3 %v3337_v29  ;;  %v3032_v43 = vmax.f32 %v3014_v58, 0.0  ;;  %v2694_v10 = vpop.f32.mrf.mxu2  ;;  %v2692_v29 = vadd.f32 %v2691_v12, %v7583_v36 }
 0x436   :  { %3648 = vmatpush.bf16.msra.mxu2 %v6267_v44  ;;  %3735 = vmatpush.bf16.msra.mxu3 %v6275_v31  ;;  %v2695_v54 = vadd.f32 %v2694_v10, %v7585_v33  ;;  %v6301_v10 = vld [vmem:[%s8162_s7 + $0x8c] sm:$0xf] }
 0x437   :  { %v3050_v9 = vpack.c.bf16 %v3032_v43, %v3032_v43  ;;  %v2831_v45 = vpop.f32.mrf.mxu3  ;;  %v2854_v58 = vadd.f32 %v2828_v24, %v2692_v29  ;;  %v5847_v29 = vld [vmem:[%s8162_s7 + $0x98] sm:$0xf0] }
 0x438   :  { %v2961_v0 = vpop.f32.mrf.mxu1  ;;  %v2855_v17 = vadd.f32 %v2831_v45, %v2695_v54  ;;  %v6297_v45 = vld [vmem:[%s8162_s7 + $0x6c] sm:$0xf]  ;;  %v5815_v54 = vld [vmem:[%s8162_s7 + $0x58] sm:$0xf0] }
 0x439   :  { %v2993_v13 = vadd.f32 %v2961_v0, %v2850_v8  ;;  %v3422_v51 = vunpack.c.l.b16 %v3050_v9 }
 0x43a   :  { %3649 = vmatpush.bf16.msra.mxu2 %v6266_v27  ;;  %3736 = vmatpush.bf16.msra.mxu3 %v6274_v42 }
 0x43b   :  { %v3015_v60 = vadd.f32 %v7641_v41, %v2993_v13 }
 0x43d   :  { %v3033_v34 = vmax.f32 %v3015_v60, 0.0  ;;  %v2696_v42 = vpop.f32.mrf.mxu2 }
 0x43e   :  { %3650 = vmatpush.bf16.msra.mxu2 %v6265_v11  ;;  %3737 = vmatpush.bf16.msra.mxu3 %v6273_v3 }
 0x43f   :  { %v3051_v63 = vpack.c.bf16 %v3033_v34, %v3033_v34 }
 0x440   :  { %v2964_v55 = vpop.f32.mrf.mxu1 }
 0x441   :  { %v3423_v57 = vunpack.c.l.b16 %v3051_v63  ;;  %v2994_v30 = vadd.f32 %v2964_v55, %v2851_v25  ;;  %v2697_v25 = vadd.f32 %v2696_v42, %v7597_v47  ;;  %v6313_v47 = vld [vmem:[%s8162_s7 + $0xec] sm:$0xf] }
 0x442   :  { %3651 = vmatpush.bf16.msra.mxu2 %v6264_v59  ;;  %3738 = vmatpush.bf16.msra.mxu3 %v6272_v53  ;;  %v2833_v59 = vpop.f32.mrf.mxu3 }
 0x443   :  { %v3424_v19 = vpack.c.b16 %v3423_v57, %v3422_v51  ;;  %v3016_v28 = vadd.f32 %v7641_v41, %v2994_v30 }
 0x445   :  { %3482 = vmatmul.bf16.vlgmr.msrb.gmra.mxu2 %v3424_v19  ;;  %v3034_v23 = vmax.f32 %v3016_v28, 0.0  ;;  %v2699_v51 = vpop.f32.mrf.mxu2 }
 0x446   :  { %3652 = vmatpush.bf16.msra.mxu2 %v6263_v20  ;;  %3739 = vmatpush.bf16.msra.mxu3 %v6271_v35  ;;  %v2856_v20 = vadd.f32 %v2833_v59, %v2697_v25  ;;  %v2700_v53 = vadd.f32 %v2699_v51, %v7611_v6  ;;  %v5895_v35 = vld [vmem:[%s8162_s7 + $0xf8] sm:$0xf0]  ;;  %v6312_v59 = vld [vmem:[%s8162_s7 + $0xe4] sm:$0xf]  ;;  %v5871_v51 = vld [vmem:[%s8162_s7 + $0xd0] sm:$0xf0] }
 0x447   :  { %v3052_v5 = vpack.c.bf16 %v3034_v23, %v3034_v23  ;;  %v5898_v23 = vor.u32 %v6313_v47, %v5895_v35  ;;  %v5855_v35 = vld [vmem:[%s8162_s7 + $0xb0] sm:$0xf0] }
 0x448   :  { %v2966_v22 = vpop.f32.mrf.mxu1 }
 0x449   :  { %v2995_v7 = vadd.f32 %v2966_v22, %v2852_v40  ;;  %v3509_v21 = vunpack.c.l.b16 %v3052_v5  ;;  %4091 = vmatpush.bf16.msra.mxu1 %v5898_v23 }
 0x44a   :  { %3653 = vmatpush.bf16.msra.mxu2 %v6262_v46  ;;  %3740 = vmatpush.bf16.msra.mxu3 %v6270_v18  ;;  %v2836_v57 = vpop.f32.mrf.mxu3 }
 0x44b   :  { %v3017_v15 = vadd.f32 %v7641_v41, %v2995_v7  ;;  %v2857_v46 = vadd.f32 %v2836_v57, %v2700_v53  ;;  %v5877_v57 = vld [vmem:[%s8162_s7 + $0xc8] sm:$0xf] }
 0x44d   :  { %v3035_v32 = vmax.f32 %v3017_v15, 0.0  ;;  %v2701_v6 = vpop.f32.mrf.mxu2 }
 0x44e   :  { %3654 = vmatpush.bf16.msra.mxu2 %v6261_v49  ;;  %3741 = vmatpush.bf16.msra.mxu3 %v6269_v4  ;;  %v2702_v18 = vadd.f32 %v2701_v6, %v7626_v56  ;;  %v5879_v56 = vld [vmem:[%s8162_s7 + $0xd8] sm:$0xf0]  ;;  %v6302_v6 = vld [vmem:[%s8162_s7 + $0x8c] sm:$0xf0] }
 0x44f   :  { %v3053_v44 = vpack.c.bf16 %v3035_v32, %v3035_v32 }
 0x450   :  { %v2969_v26 = vpop.f32.mrf.mxu1 }
 0x451   :  { %v3510_v1 = vunpack.c.l.b16 %v3053_v44  ;;  %v2996_v14 = vadd.f32 %v2969_v26, %v2853_v39 }
 0x452   :  { %3655 = vmatpush.bf16.msra.mxu2 %v6260_v48  ;;  %3742 = vmatpush.bf16.msra.mxu3 %v6268_v37  ;;  %v2838_v16 = vpop.f32.mrf.mxu3  ;;  %v5863_v37 = vld [vmem:[%s8162_s7 + $0xb8] sm:$0xf0] }
 0x453   :  { %v3511_v52 = vpack.c.b16 %v3510_v1, %v3509_v21  ;;  %v3018_v27 = vadd.f32 %v7641_v41, %v2996_v14  ;;  %v2858_v15 = vadd.f32 %v2838_v16, %v2702_v18  ;;  %v6309_v21 = vld [vmem:[%s8162_s7 + $0xcc] sm:$0xf]  ;;  %v6300_v16 = vld [vmem:[%s8162_s7 + $0x84] sm:$0xf] }
 0x454   :  { %v5882_v1 = vor.u32 %v6309_v21, %v5879_v56  ;;  %v6298_v21 = vld [vmem:[%s8162_s7 + $0x6c] sm:$0xf0]  ;;  %v6296_v56 = vld [vmem:[%s8162_s7 + $0x64] sm:$0xf] }
 0x455   :  { %3569 = vmatmul.bf16.vlgmr.msrb.gmra.mxu3 %v3511_v52  ;;  %v3036_v8 = vmax.f32 %v3018_v27, 0.0  ;;  %v5850_v27 = vor.u32 %v6301_v10, %v5847_v29  ;;  %v5805_v29 = vld [vmem:[%s8162_s7 + $0x40] sm:$0xf] }
 0x456   :  { %4092 = vmatpush.bf16.msra.mxu1 %v5882_v1 }
 0x457   :  { %v3054_v43 = vpack.c.bf16 %v3036_v8, %v3036_v8 }
 0x458   :  { %v2971_v31 = vpop.f32.mrf.mxu1 }
 0x459   :  { %v2997_v11 = vadd.f32 %v2971_v31, %v2854_v58  ;;  %v3596_v36 = vunpack.c.l.b16 %v3054_v43  ;;  %v5831_v58 = vld [vmem:[%s8162_s7 + $0x78] sm:$0xf0] }
 0x45a   :  { %v5834_v31 = vor.u32 %v6297_v45, %v5831_v58  ;;  %v6292_v45 = vld [vmem:[%s8162_s7 + $0x44] sm:$0xf] }
 0x45b   :  { %v3019_v0 = vadd.f32 %v7641_v41, %v2997_v11 }
 0x45d   :  { %v3037_v13 = vmax.f32 %v3019_v0, 0.0  ;;  %v6293_v0 = vld [vmem:[%s8162_s7 + $0x4c] sm:$0xf] }
 0x45e   :  { %v5818_v43 = vor.u32 %v6293_v0, %v5815_v54  ;;  %v5813_v0 = vld [vmem:[%s8162_s7 + $0x48] sm:$0xf]  ;;  %v6295_v54 = vld [vmem:[%s8162_s7 + $0x54] sm:$0xf0] }
 0x45f   :  { %v3055_v60 = vpack.c.bf16 %v3037_v13, %v3037_v13 }
 0x460   :  { %v2974_v38 = vpop.f32.mrf.mxu1 }
 0x461   :  { %v3597_v9 = vunpack.c.l.b16 %v3055_v60  ;;  %v2998_v34 = vadd.f32 %v2974_v38, %v2855_v17  ;;  %v5885_v17 = vld [vmem:[%s8162_s7 + $0xe0] sm:$0xf]  ;;  %v6314_v60 = vld [vmem:[%s8162_s7 + $0xec] sm:$0xf0] }
 0x462   :  { %v5886_v38 = vor.u32 %v6314_v60, %v5885_v17  ;;  %v5814_v60 = vor.u32 %v6295_v54, %v5813_v0 }
 0x463   :  { %v3598_v3 = vpack.c.b16 %v3597_v9, %v3596_v36  ;;  %v3020_v63 = vadd.f32 %v7641_v41, %v2998_v34  ;;  %v5887_v36 = vld [vmem:[%s8162_s7 + $0xf0] sm:$0xf0]  ;;  %v5893_v9 = vld [vmem:[%s8162_s7 + $0xe8] sm:$0xf]  ;;  %v6315_v34 = vld [vmem:[%s8162_s7 + $0xf4] sm:$0xf0] }
 0x464   :  { %v5894_v25 = vor.u32 %v6315_v34, %v5893_v9  ;;  %4049 = vmatpush.bf16.msrb.mxu2 %v5886_v38  ;;  %v5789_v38 = vld [vmem:[%s8162_s7 + $0x20] sm:$0xf]  ;;  %v6288_v9 = vld [vmem:[%s8162_s7 + $0x24] sm:$0xf] }
 0x465   :  { %3656 = vmatmul.bf16.vlgmr.msra.gmra.mxu2 %v3598_v3  ;;  %v3038_v62 = vmax.f32 %v3020_v63, 0.0  ;;  %v5890_v3 = vor.u32 %v6312_v59, %v5887_v36  ;;  %v6290_v36 = vld [vmem:[%s8162_s7 + $0x2c] sm:$0xf0] }
 0x466   :  { %4077 = vmatpush.bf16.msra.mxu0 %v5894_v25  ;;  %v5790_v34 = vor.u32 %v6290_v36, %v5789_v38  ;;  %v5797_v25 = vld [vmem:[%s8162_s7 + $0x28] sm:$0xf]  ;;  %v6335_v36 = vld [vmem:[%s8164_s9 + $0x98] sm:$0xff] }
 0x467   :  { %v3056_v50 = vpack.c.bf16 %v3038_v62, %v3038_v62  ;;  %4063 = vmatpush.bf16.msrb.mxu3 %v5890_v3  ;;  %v6308_v62 = vld [vmem:[%s8162_s7 + $0xc4] sm:$0xf]  ;;  %v5791_v3 = vld [vmem:[%s8162_s7 + $0x30] sm:$0xf0] }
 0x468   :  { %v2976_v55 = vpop.f32.mrf.mxu1 }
 0x469   :  { %v2999_v33 = vadd.f32 %v2976_v55, %v2856_v20  ;;  %v3683_v40 = vunpack.c.l.b16 %v3056_v50  ;;  %v5869_v20 = vld [vmem:[%s8162_s7 + $0xc0] sm:$0xf]  ;;  %v6310_v55 = vld [vmem:[%s8162_s7 + $0xcc] sm:$0xf0]  ;;  %v5874_v50 = vor.u32 %v6308_v62, %v5871_v51 }
 0x46a   :  { %v6286_v51 = vld [vmem:[%s8162_s7 + $0xc] sm:$0xf0] }
 0x46b   :  { %v3021_v30 = vadd.f32 %v7641_v41, %v2999_v33  ;;  %v5870_v33 = vor.u32 %v6310_v55, %v5869_v20  ;;  %4064 = vmatpush.bf16.msrb.mxu3 %v5874_v50  ;;  %v6291_v20 = vld [vmem:[%s8162_s7 + $0x34] sm:$0xf0]  ;;  %v5794_v55 = vor.u32 %v6288_v9, %v5791_v3  ;;  %v5775_v50 = vld [vmem:[%s8162_s7 + $0x10] sm:$0xf0]  ;;  %v6328_v3 = vld [vmem:[%s8164_s9 + $0x60] sm:$0xff] }
 0x46c   :  { %v5798_v62 = vor.u32 %v6291_v20, %v5797_v25  ;;  %v6343_v9 = vld [vmem:[%s8164_s9 + $0xd8] sm:$0xff]  ;;  %v6334_v25 = vld [vmem:[%s8164_s9 + $0x90] sm:$0xff] }
 0x46d   :  { %v3039_v19 = vmax.f32 %v3021_v30, 0.0  ;;  %v6311_v30 = vld [vmem:[%s8162_s7 + $0xd4] sm:$0xf0]  ;;  %4050 = vmatpush.bf16.msrb.mxu2 %v5870_v33  ;;  %v5773_v33 = vld [vmem:[%s8162_s7] sm:$0xf]  ;;  %v6342_v20 = vld [vmem:[%s8164_s9 + $0xd0] sm:$0xff] }
 0x46f   :  { %v3057_v2 = vpack.c.bf16 %v3039_v19, %v3039_v19  ;;  %v5878_v19 = vor.u32 %v6311_v30, %v5877_v57  ;;  %v6284_v57 = vld [vmem:[%s8162_s7 + $0x4] sm:$0xf]  ;;  %v5774_v30 = vor.u32 %v6286_v51, %v5773_v33  ;;  %v6333_v33 = vld [vmem:[%s8164_s9 + $0x88] sm:$0xff] }
 0x470   :  { %v2979_v28 = vpop.f32.mrf.mxu1  ;;  %v6341_v51 = vld [vmem:[%s8164_s9 + $0xc8] sm:$0xff] }
 0x471   :  { %v3684_v49 = vunpack.c.l.b16 %v3057_v2  ;;  %v3000_v22 = vadd.f32 %v2979_v28, %v2857_v46  ;;  %v5853_v46 = vld [vmem:[%s8162_s7 + $0xa0] sm:$0xf]  ;;  %v6306_v2 = vld [vmem:[%s8162_s7 + $0xac] sm:$0xf0]  ;;  %v6304_v28 = vld [vmem:[%s8162_s7 + $0xa4] sm:$0xf]  ;;  %4078 = vmatpush.bf16.msra.mxu0 %v5878_v19 }
 0x472   :  { %v5854_v47 = vor.u32 %v6306_v2, %v5853_v46  ;;  %v5781_v19 = vld [vmem:[%s8162_s7 + $0x8] sm:$0xf]  ;;  %v6287_v46 = vld [vmem:[%s8162_s7 + $0x14] sm:$0xf0]  ;;  %v5778_v2 = vor.u32 %v6284_v57, %v5775_v50  ;;  %v6318_v57 = vld [vmem:[%s8164_s9 + $0x10] sm:$0xff] }
 0x473   :  { %v3685_v7 = vpack.c.b16 %v3684_v49, %v3683_v40  ;;  %v3022_v12 = vadd.f32 %v7641_v41, %v3000_v22  ;;  %v5861_v40 = vld [vmem:[%s8162_s7 + $0xa8] sm:$0xf]  ;;  %v6307_v49 = vld [vmem:[%s8162_s7 + $0xb4] sm:$0xf0]  ;;  %v5858_v22 = vor.u32 %v6304_v28, %v5855_v35  ;;  %v5782_v28 = vor.u32 %v6287_v46, %v5781_v19  ;;  %v5783_v35 = vld [vmem:[%s8162_s7 + $0x18] sm:$0xf0] }
 0x474   :  { %v5862_v23 = vor.u32 %v6307_v49, %v5861_v40  ;;  %4051 = vmatpush.bf16.msrb.mxu2 %v5854_v47  ;;  %v6285_v47 = vld [vmem:[%s8162_s7 + $0xc] sm:$0xf]  ;;  %v6332_v50 = vld [vmem:[%s8164_s9 + $0x80] sm:$0xff] }
 0x475   :  { %3743 = vmatmul.bf16.vlgmr.msra.gmra.mxu3 %v3685_v7  ;;  %v3040_v24 = vmax.f32 %v3022_v12, 0.0  ;;  %v5837_v7 = vld [vmem:[%s8162_s7 + $0x80] sm:$0xf]  ;;  %v5839_v12 = vld [vmem:[%s8162_s7 + $0x90] sm:$0xf0]  ;;  %v5786_v40 = vor.u32 %v6285_v47, %v5783_v35  ;;  %v6317_v46 = vld [vmem:[%s8164_s9 + $0x8] sm:$0xff] }
 0x476   :  { %4065 = vmatpush.bf16.msrb.mxu3 %v5858_v22  ;;  %4079 = vmatpush.bf16.msra.mxu0 %v5862_v23  ;;  %v5838_v18 = vor.u32 %v6302_v6, %v5837_v7  ;;  %v6339_v23 = vld [vmem:[%s8164_s9 + $0xb8] sm:$0xff]  ;;  %v6340_v19 = vld [vmem:[%s8164_s9 + $0xc0] sm:$0xff] }
 0x477   :  { %v3058_v32 = vpack.c.bf16 %v3040_v24, %v3040_v24  ;;  %v6347_v7 = vld [vmem:[%s8164_s9 + $0xf8] sm:$0xff]  ;;  %v6324_v47 = vld [vmem:[%s8164_s9 + $0x40] sm:$0xff] }
 0x478   :  { %v2981_v48 = vpop.f32.mrf.mxu1  ;;  %4052 = vmatpush.bf16.msrb.mxu2 %v5838_v18  ;;  %v6323_v6 = vld [vmem:[%s8164_s9 + $0x38] sm:$0xff]  ;;  %v6338_v18 = vld [vmem:[%s8164_s9 + $0xb0] sm:$0xff]  ;;  %v3879_v35 = vld [vmem:[%s8165_s8] sm:$0xf] }
 0x479   :  { %v3001_v61 = vadd.f32 %v2981_v48, %v2858_v15  ;;  %v3770_v44 = vunpack.c.l.b16 %v3058_v32  ;;  %v5845_v15 = vld [vmem:[%s8162_s7 + $0x88] sm:$0xf]  ;;  %v6303_v48 = vld [vmem:[%s8162_s7 + $0x94] sm:$0xf0]  ;;  %v6289_v32 = vld [vmem:[%s8162_s7 + $0x2c] sm:$0xf] }
 0x47b   :  { %v3023_v5 = vadd.f32 %v7641_v41, %v3001_v61  ;;  %v6305_v41 = vld [vmem:[%s8162_s7 + $0xac] sm:$0xf]  ;;  %v5842_v61 = vor.u32 %v6300_v16, %v5839_v12  ;;  %v6331_v16 = vld [vmem:[%s8164_s9 + $0x78] sm:$0xff]  ;;  %v6346_v12 = vld [vmem:[%s8164_s9 + $0xf0] sm:$0xff] }
 0x47c   :  { %v5866_v52 = vor.u32 %v6305_v41, %v5863_v37  ;;  %v5829_v41 = vld [vmem:[%s8162_s7 + $0x68] sm:$0xf] }
 0x47d   :  { %v3041_v4 = vmax.f32 %v3023_v5, 0.0  ;;  %v5846_v5 = vor.u32 %v6303_v48, %v5845_v15  ;;  %4066 = vmatpush.bf16.msrb.mxu3 %v5842_v61  ;;  %v6322_v15 = vld [vmem:[%s8164_s9 + $0x30] sm:$0xff] }
 0x47e   :  { %4093 = vmatpush.bf16.msra.mxu1 %v5866_v52  ;;  %v6299_v52 = vld [vmem:[%s8162_s7 + $0x74] sm:$0xf0]  ;;  %v6330_v48 = vld [vmem:[%s8164_s9 + $0x70] sm:$0xff] }
 0x47f   :  { %v3059_v39 = vpack.c.bf16 %v3041_v4, %v3041_v4  ;;  %v5799_v4 = vld [vmem:[%s8162_s7 + $0x38] sm:$0xf0]  ;;  %4080 = vmatpush.bf16.msra.mxu0 %v5846_v5  ;;  %v5830_v10 = vor.u32 %v6299_v52, %v5829_v41 }
 0x481   :  { %v3771_v26 = vunpack.c.l.b16 %v3059_v39 }
 0x482   :  { %4094 = vmatpush.bf16.msra.mxu1 %v5850_v27  ;;  %v6294_v27 = vld [vmem:[%s8162_s7 + $0x4c] sm:$0xf0] }
 0x483   :  { %v3772_v14 = vpack.c.b16 %v3771_v26, %v3770_v44  ;;  %v5802_v44 = vor.u32 %v6289_v32, %v5799_v4  ;;  %v5821_v26 = vld [vmem:[%s8162_s7 + $0x60] sm:$0xf]  ;;  %4081 = vmatpush.bf16.msra.mxu0 %v5830_v10  ;;  %v5806_v58 = vor.u32 %v6294_v27, %v5805_v29  ;;  %v6337_v32 = vld [vmem:[%s8164_s9 + $0xa8] sm:$0xff] }
 0x484   :  { %v5822_v1 = vor.u32 %v6298_v21, %v5821_v26  ;;  %v6345_v4 = vld [vmem:[%s8164_s9 + $0xe8] sm:$0xff] }
 0x485   :  { %3830 = vmatmul.bf16.vlgmr.msrb.gmra.mxu0 %v3772_v14  ;;  %v5823_v14 = vld [vmem:[%s8162_s7 + $0x70] sm:$0xf0]  ;;  %v6321_v26 = vld [vmem:[%s8164_s9 + $0x28] sm:$0xff] }
 0x486   :  { %4095 = vmatpush.bf16.msra.mxu1 %v5834_v31  ;;  %v5826_v37 = vor.u32 %v6296_v56, %v5823_v14  ;;  %4053 = vmatpush.bf16.msrb.mxu2 %v5822_v1  ;;  %v5807_v31 = vld [vmem:[%s8162_s7 + $0x50] sm:$0xf0]  ;;  %v6344_v1 = vld [vmem:[%s8164_s9 + $0xe0] sm:$0xff] }
 0x487   :  { %v5810_v17 = vor.u32 %v6292_v45, %v5807_v31  ;;  %4082 = vmatpush.bf16.msra.mxu0 %v5814_v60 }
 0x488   :  { %v7855_v11 = vpop.f32.mrf.mxu3  ;;  %4067 = vmatpush.bf16.msrb.mxu3 %v5826_v37 }
 0x48a   :  { %4096 = vmatpush.bf16.msra.mxu1 %v5818_v43  ;;  %4054 = vmatpush.bf16.msrb.mxu2 %v5806_v58 }
 0x48b   :  { %4083 = vmatpush.bf16.msra.mxu0 %v5798_v62  ;;  %v6327_v62 = vld [vmem:[%s8164_s9 + $0x58] sm:$0xff] }
 0x48c   :  { %4068 = vmatpush.bf16.msrb.mxu3 %v5810_v17 }
 0x48e   :  { %4097 = vmatpush.bf16.msra.mxu1 %v5802_v44  ;;  %4055 = vmatpush.bf16.msrb.mxu2 %v5790_v34  ;;  %v6320_v34 = vld [vmem:[%s8164_s9 + $0x20] sm:$0xff] }
 0x48f   :  { %4084 = vmatpush.bf16.msra.mxu0 %v5782_v28  ;;  %v6316_v28 = vld [vmem:[%s8164_s9] sm:$0xff] }
 0x490   :  { %v7865_v42 = vpop.f32.mrf.mxu3  ;;  %4069 = vmatpush.bf16.msrb.mxu3 %v5794_v55  ;;  %v6319_v55 = vld [vmem:[%s8164_s9 + $0x18] sm:$0xff] }
 0x492   :  { %4056 = vmatpush.bf16.msrb.mxu2 %v5774_v30  ;;  %4098 = vmatpush.bf16.msra.mxu1 %v5786_v40  ;;  %v6326_v30 = vld [vmem:[%s8164_s9 + $0x50] sm:$0xff] }
 0x493   :  { %4405 = vmatpush.bf16.msrb.mxu0 %v6339_v23  ;;  %v3884_v23 = vperm.slane %v3879_v35, 3 }
 0x494   :  { %4070 = vmatpush.bf16.msrb.mxu3 %v5778_v2  ;;  %v6325_v2 = vld [vmem:[%s8164_s9 + $0x48] sm:$0xff] }
 0x496   :  { %4419 = vmatpush.bf16.msrb.mxu1 %v6347_v7  ;;  %4377 = vmatpush.bf16.msra.mxu2 %v6323_v6 }
 0x497   :  { %4406 = vmatpush.bf16.msrb.mxu0 %v6338_v18 }
 0x498   :  { %v7853_v8 = vpop.f32.mrf.mxu2  ;;  %4391 = vmatpush.bf16.msra.mxu3 %v6331_v16 }
 0x499   :  { %v3225_v61 = vadd.f32 %v7855_v11, %v7853_v8  ;;  %v6329_v8 = vld [vmem:[%s8164_s9 + $0x68] sm:$0xff] }
 0x49a   :  { %4420 = vmatpush.bf16.msrb.mxu1 %v6346_v12  ;;  %4378 = vmatpush.bf16.msra.mxu2 %v6322_v15  ;;  %v3881_v12 = vperm.slane %v3879_v35, 0  ;;  %v3882_v15 = vperm.slane %v3879_v35, 1 }
 0x49b   :  { %4407 = vmatpush.bf16.msrb.mxu0 %v6337_v32 }
 0x49c   :  { %4392 = vmatpush.bf16.msra.mxu3 %v6330_v48 }
 0x49e   :  { %4421 = vmatpush.bf16.msrb.mxu1 %v6345_v4  ;;  %4379 = vmatpush.bf16.msra.mxu2 %v6321_v26 }
 0x4a0   :  { %v7863_v13 = vpop.f32.mrf.mxu2  ;;  %4393 = vmatpush.bf16.msra.mxu3 %v6329_v8 }
 0x4a1   :  { %v3227_v21 = vadd.f32 %v7865_v42, %v7863_v13 }
 0x4a2   :  { %4422 = vmatpush.bf16.msrb.mxu1 %v6344_v1  ;;  %4380 = vmatpush.bf16.msra.mxu2 %v6320_v34 }
 0x4a4   :  { %4394 = vmatpush.bf16.msra.mxu3 %v6328_v3 }
 0x4a6   :  { %4423 = vmatpush.bf16.msrb.mxu1 %v6343_v9  ;;  %4381 = vmatpush.bf16.msra.mxu2 %v6319_v55 }
 0x4a8   :  { %v7885_v63 = vpop.f32.mrf.mxu2  ;;  %4395 = vmatpush.bf16.msra.mxu3 %v6327_v62 }
 0x4a9   :  { %v3314_v44 = vadd.f32 %v7885_v63, %v3225_v61  ;;  %v6336_v63 = vld [vmem:[%s8164_s9 + $0xa0] sm:$0xff] }
 0x4aa   :  { %4408 = vmatpush.bf16.msrb.mxu0 %v6336_v63  ;;  %4424 = vmatpush.bf16.msrb.mxu1 %v6342_v20 }
 0x4ab   :  { %4382 = vmatpush.bf16.msra.mxu2 %v6318_v57 }
 0x4ac   :  { %4396 = vmatpush.bf16.msra.mxu3 %v6326_v30 }
 0x4ae   :  { %4409 = vmatpush.bf16.msrb.mxu0 %v6335_v36  ;;  %4425 = vmatpush.bf16.msrb.mxu1 %v6341_v51 }
 0x4af   :  { %4383 = vmatpush.bf16.msra.mxu2 %v6317_v46 }
 0x4b0   :  { %v7943_v24 = vpop.f32.mrf.mxu2  ;;  %4397 = vmatpush.bf16.msra.mxu3 %v6325_v2 }
 0x4b1   :  { %v3315_v14 = vadd.f32 %v7943_v24, %v3227_v21  ;;  %v6350_v24 = vld [vmem:[%s8163_s6] ss:$0 sm:$0xff] }
 0x4b2   :  { %4410 = vmatpush.bf16.msrb.mxu0 %v6334_v25  ;;  %4426 = vmatpush.bf16.msrb.mxu1 %v6340_v19 }
 0x4b3   :  { %4384 = vmatpush.bf16.msra.mxu2 %v6316_v28 }
 0x4b4   :  { %4398 = vmatpush.bf16.msra.mxu3 %v6324_v47 }
 0x4b6   :  { %4411 = vmatpush.bf16.msrb.mxu0 %v6333_v33 }
 0x4b8   :  { %v7905_v53 = vpop.f32.mrf.mxu3 }
 0x4b9   :  { %v3401_v56 = vadd.f32 %v7905_v53, %v3314_v44 }
 0x4ba   :  { %4412 = vmatpush.bf16.msrb.mxu0 %v6332_v50 }
 0x4c0   :  { %v7951_v39 = vpop.f32.mrf.mxu3 }
 0x4c1   :  { %v3402_v13 = vadd.f32 %v7951_v39, %v3315_v14 }
 0x4c8   :  { %v7989_v43 = vpop.f32.mrf.mxu2 }
 0x4c9   :  { %v3488_v41 = vadd.f32 %v7989_v43, %v3401_v56 }
 0x4d0   :  { %v3485_v49 = vpop.f32.mrf.mxu2 }
 0x4d1   :  { %v3489_v37 = vadd.f32 %v3485_v49, %v3402_v13 }
 0x4d8   :  { %v7991_v59 = vpop.f32.mrf.mxu3 }
 0x4d9   :  { %v3575_v42 = vadd.f32 %v7991_v59, %v3488_v41 }
 0x4e0   :  { %v3572_v22 = vpop.f32.mrf.mxu3 }
 0x4e1   :  { %v3576_v29 = vadd.f32 %v3572_v22, %v3489_v37  ;;  %v3883_v22 = vperm.slane %v3879_v35, 2 }
 0x4e8   :  { %v3657_v5 = vpop.f32.mrf.mxu2 }
 0x4e9   :  { %v3662_v52 = vadd.f32 %v3657_v5, %v3575_v42 }
 0x4f0   :  { %v3659_v10 = vpop.f32.mrf.mxu2 }
 0x4f1   :  { %v3663_v58 = vadd.f32 %v3659_v10, %v3576_v29 }
 0x4f8   :  { %v3744_v11 = vpop.f32.mrf.mxu3 }
 0x4f9   :  { %v3749_v27 = vadd.f32 %v3744_v11, %v3662_v52 }
 0x500   :  { %v3746_v45 = vpop.f32.mrf.mxu3 }
 0x501   :  { %v3750_v0 = vadd.f32 %v3746_v45, %v3663_v58 }
 0x502   :  { %v3831_v53 = vpop.f32.mrf.mxu0 }
 0x503   :  { %v3836_v31 = vadd.f32 %v3831_v53, %v3749_v27  ;;  %v6351_v27 = vld [vmem:[%s8166_s10] ss:$0 sm:$0xff] }
 0x505   :  { %v3842_v39 = vadd.f32 %v6350_v24, %v3836_v31 }
 0x507   :  { %v3844_v60 = vmax.f32 %v3842_v39, 0.0 }
 0x50a   :  { %v3833_v54 = vpop.f32.mrf.mxu0 }
 0x50b   :  { %v3837_v43 = vadd.f32 %v3833_v54, %v3750_v0 }
 0x50d   :  { %v3843_v17 = vadd.f32 %v6350_v24, %v3837_v43 }
 0x50f   :  { %v3845_v59 = vmax.f32 %v3843_v17, 0.0 }
 0x511   :  { %v3846_v38 = vpack.c.bf16 %v3845_v59, %v3844_v60 }
 0x513   :  { %4057 = vmatmul.bf16.vlgmr.msrb.gmra.mxu2 %v3846_v38  ;;  %4071 = vmatmul.bf16.vlgmr.msrb.gmra.mxu3 %v3846_v38 }
 0x514   :  { %4085 = vmatmul.bf16.vlgmr.msra.gmra.mxu0 %v3846_v38  ;;  %4099 = vmatmul.bf16.vlgmr.msra.gmra.mxu1 %v3846_v38 }
 0x591   :  { %v4086_v40 = vpop.f32.mrf.mxu0  ;;  %v4100_v49 = vpop.f32.mrf.mxu1 }
 0x592   :  { %v4087_v16 = vadd.f32 %v4086_v40, %v3883_v22  ;;  %v4101_v18 = vadd.f32 %v4100_v49, %v3884_v23 }
 0x594   :  { %v4107_v4 = vmax.f32 %v4087_v16, 0.0  ;;  %v4108_v44 = vmax.f32 %v4101_v18, 0.0 }
 0x596   :  { %v4058_v7 = vpop.f32.mrf.mxu2  ;;  %v4072_v6 = vpop.f32.mrf.mxu3 }
 0x597   :  { %v4059_v11 = vadd.f32 %v4058_v7, %v3881_v12  ;;  %v4073_v21 = vadd.f32 %v4072_v6, %v3882_v15 }
 0x599   :  { %v4088_v48 = vpop.f32.mrf.mxu0  ;;  %v4102_v61 = vpop.f32.mrf.mxu1  ;;  %v4105_v42 = vmax.f32 %v4059_v11, 0.0  ;;  %v4106_v53 = vmax.f32 %v4073_v21, 0.0 }
 0x59a   :  { %v4089_v5 = vadd.f32 %v4088_v48, %v3883_v22  ;;  %v4103_v32 = vadd.f32 %v4102_v61, %v3884_v23 }
 0x59c   :  { %v4111_v26 = vmax.f32 %v4089_v5, 0.0  ;;  %v4112_v8 = vmax.f32 %v4103_v32, 0.0 }
 0x59e   :  { %v4115_v56 = vpack.c.bf16 %v4111_v26, %v4107_v4  ;;  %v4116_v63 = vpack.c.bf16 %v4112_v8, %v4108_v44  ;;  %v4060_v1 = vpop.f32.mrf.mxu2  ;;  %v4074_v14 = vpop.f32.mrf.mxu3 }
 0x59f   :  { %v4061_v41 = vadd.f32 %v4060_v1, %v3881_v12  ;;  %v4075_v13 = vadd.f32 %v4074_v14, %v3882_v15 }
 0x5a0   :  { %4413 = vmatmul.bf16.vlgmr.msrb.gmra.mxu0 %v4115_v56  ;;  %4427 = vmatmul.bf16.vlgmr.msrb.gmra.mxu1 %v4116_v63 }
 0x5a1   :  { %v4109_v37 = vmax.f32 %v4061_v41, 0.0  ;;  %v4110_v52 = vmax.f32 %v4075_v13, 0.0 }
 0x5a3   :  { %v4113_v10 = vpack.c.bf16 %v4109_v37, %v4105_v42  ;;  %v4114_v29 = vpack.c.bf16 %v4110_v52, %v4106_v53 }
 0x5a5   :  { %4385 = vmatmul.bf16.vlgmr.msra.gmra.mxu2 %v4113_v10  ;;  %4399 = vmatmul.bf16.vlgmr.msra.gmra.mxu3 %v4114_v29 }
 0x61d   :  { %v4414_v24 = vpop.f32.mrf.mxu0  ;;  %v4428_v54 = vpop.f32.mrf.mxu1 }
 0x625   :  { %v4416_v36 = vpop.f32.mrf.mxu0  ;;  %v4430_v34 = vpop.f32.mrf.mxu1 }
 0x628   :  { %v4386_v45 = vpop.f32.mrf.mxu2  ;;  %v4400_v58 = vpop.f32.mrf.mxu3 }
 0x629   :  { %v4387_v31 = vadd.f32 %v6351_v27, %v4386_v45 }
 0x62b   :  { %v4401_v0 = vadd.f32 %v4400_v58, %v4387_v31 }
 0x62d   :  { %v4415_v39 = vadd.f32 %v4414_v24, %v4401_v0 }
 0x62f   :  { %v4429_v43 = vadd.f32 %v4428_v54, %v4415_v39 }
 0x630   :  { %v4388_v17 = vpop.f32.mrf.mxu2  ;;  %v4402_v59 = vpop.f32.mrf.mxu3 }
 0x631   :  { %4433 = vst [vmem:[%s8167_s11] sm:$0xff] %v4429_v43  ;;  %v4389_v60 = vadd.f32 %v6351_v27, %v4388_v17 }
 0x633   :  { %v4403_v38 = vadd.f32 %v4402_v59, %v4389_v60 }
 0x635   :  { %v4417_v9 = vadd.f32 %v4416_v36, %v4403_v38 }
 0x637   :  { %v4431_v3 = vadd.f32 %v4430_v34, %v4417_v9 }
 0x639   :  { %4434 = vst [vmem:[%s8167_s11 + $0x8] sm:$0xff] %v4431_v3 }

</bundles_post_ra>
